<compile_context>
chip_gen: v7x
topology: tpu7x:2x2x1
jax: 0.10.0
libtpu: 0.0.40
codegen_flags: <defaults>
</compile_context>

<pallas_src>
import functools

import jax
import jax.numpy as jnp
from jax.experimental import pallas as pl
from jax.experimental.pallas import tpu as pltpu

NUM_BINS = 30          # bins used by the reference (np.histogram2d / np.digitize)
BIN_PAD = 32           # sublane-aligned padded bin count (padded bins stay empty)
ONE_HOT_DTYPE = jnp.bfloat16   # 0/1 exact; counts accumulate exactly in f32 on the MXU


def _miloss_kernel(ystats_ref, y_true_ref, y_pred_ref, x_ref, xlo_ref, xscale_ref,
                   u3_ref, s3_ref, out_ref, joint_acc, yhist_acc, lpt_acc,
                   *, loss_l, loss_a, num_bins, bin_pad, n_total):
    f32 = jnp.float32
    B = num_bins           # 30 real bins
    Bp = bin_pad           # 32 padded bins (layout only)
    k = pl.program_id(0)
    last = pl.num_programs(0) - 1

    @pl.when(k == 0)
    def _init():
        joint_acc[...] = jnp.zeros_like(joint_acc)
        yhist_acc[...] = jnp.zeros_like(yhist_acc)
        lpt_acc[...] = jnp.zeros_like(lpt_acc)

    y_true = y_true_ref[...]           # (1, tileN)
    y_pred = y_pred_ref[...]           # (1, tileN)
    x = x_ref[...]                     # (F = 2D, tileN)
    tile_n = y_pred.shape[1]
    F = x.shape[0]

    # ---------------- L_PT partial sum ----------------
    lpt_acc[...] += jnp.sum(jnp.abs(y_true - y_pred))

    # ------- y one-hot (Bp, tileN) with GLOBAL edges (np.histogram2d semantics) -------
    y_lo = ystats_ref[0]
    y_scale = ystats_ref[1]
    by = jnp.clip(jnp.floor((y_pred - y_lo) * y_scale), 0, B - 1).astype(jnp.int32)
    hy = (by == jax.lax.broadcasted_iota(jnp.int32, (Bp, tile_n), 0))       # (Bp, tileN)
    hyT = hy.astype(ONE_HOT_DTYPE)

    # p_y counts accumulated straight from the one-hot (decoupled from joint layout).
    yhist_acc[...] += jnp.sum(hy.astype(f32), axis=1, keepdims=True)        # (Bp, 1)

    # ------- stacked per-feature one-hot (F*Bp, tileN), GLOBAL per-feature edges -------
    bidx = jnp.clip(jnp.floor((x - xlo_ref[...]) * xscale_ref[...]),
                    0, B - 1).astype(jnp.int32)                              # (F, tileN)
    bin_iota = jax.lax.broadcasted_iota(jnp.int32, (F, Bp, tile_n), 1)
    oh = (bidx.reshape(F, 1, tile_n) == bin_iota).astype(ONE_HOT_DTYPE)      # (F, Bp, tileN)
    oh = oh.reshape(F * Bp, tile_n)          # layout-free merge (last dim unchanged)

    # ------- lane-dense joint histogram accumulation: one MXU matmul per tile -------
    #   joint[c, f*Bp + b] += #{n : y_bin[n] == c and x_bin[f, n] == b}
    joint_acc[...] += jnp.einsum('cn,rn->cr', hyT, oh, preferred_element_type=f32)

    @pl.when(k == last)
    def _finalize():
        eps = f32(1e-10)
        inv_n = f32(1.0 / n_total)
        joint = joint_acc[...]                                # (Bp, F*Bp) counts
        p_xy = joint * inv_n
        p_x = jnp.sum(joint, axis=0, keepdims=True) * inv_n   # (1, F*Bp)
        p_y = yhist_acc[...] * inv_n                          # (Bp, 1)
        # Reference semantics: substitute eps into zero cells and keep them in the sum.
        p_xy = jnp.where(p_xy == 0, eps, p_xy)
        p_x = jnp.where(p_x == 0, eps, p_x)
        p_y = jnp.where(p_y == 0, eps, p_y)
        ybin = jax.lax.broadcasted_iota(jnp.int32, joint.shape, 0)
        xbin = jax.lax.broadcasted_iota(jnp.int32, joint.shape, 1) & (Bp - 1)
        valid = (ybin < B) & (xbin < B)                       # real 30x30 cells only
        contrib = p_xy * (jnp.log(p_xy) - jnp.log(p_x) - jnp.log(p_y))
        mi_hist_total = jnp.sum(jnp.where(valid, contrib, f32(0.0)))   # L_MI_uq + L_MI_sq

        # ------- L_MI_us: mutual_info_score(digitize(u_vec[i]), digitize(s_vec[i])) -------
        u3 = u3_ref[...]     # (D, 1, D): u_vec[i, :] in slab i
        s3 = s3_ref[...]
        Dlen = u3.shape[2]

        def digitize(v3):
            # np.digitize(v, linspace(min, max, B)) up to a constant label shift
            # (MI is invariant to relabeling).
            lo = jnp.min(v3, axis=2, keepdims=True)
            hi = jnp.max(v3, axis=2, keepdims=True)
            rng = jnp.where(hi > lo, hi - lo, f32(1.0))
            return jnp.clip(jnp.floor((v3 - lo) * ((B - 1) / rng)), 0, B - 1).astype(jnp.int32)

        bu = digitize(u3)
        bs = digitize(s3)
        bin3 = jax.lax.broadcasted_iota(jnp.int32, (u3.shape[0], Bp, Dlen), 1)
        ohu = (bu == bin3).astype(ONE_HOT_DTYPE)              # (D, Bp, D)
        ohs = (bs == bin3).astype(ONE_HOT_DTYPE)
        # Batched contingency tables: cont[i, a, b] = #{j : bu[i,j]==a and bs[i,j]==b}
        cont = jnp.einsum('iaj,ibj->iab', ohu, ohs, preferred_element_type=f32)
        inv_d = f32(1.0 / Dlen)
        rs = jnp.sum(cont, axis=2, keepdims=True)
        cs = jnp.sum(cont, axis=1, keepdims=True)
        q_xy = cont * inv_d
        q_x = rs * inv_d
        q_y = cs * inv_d
        nz = cont > 0                                         # sklearn: only nonzero cells
        l_xy = jnp.log(jnp.where(nz, q_xy, f32(1.0)))
        l_x = jnp.log(jnp.where(rs > 0, q_x, f32(1.0)))
        l_y = jnp.log(jnp.where(cs > 0, q_y, f32(1.0)))
        mi_cells = jnp.where(nz, q_xy * (l_xy - l_x - l_y), f32(0.0))
        mi_rows = jnp.sum(jnp.sum(mi_cells, axis=2, keepdims=True), axis=1, keepdims=True)
        l_mi_us = jnp.sum(jnp.maximum(mi_rows, f32(0.0)))     # sklearn clips each call at 0

        l_pt = lpt_acc[...] * inv_n                           # (1, 1)
        result = l_pt + f32(loss_l) * (mi_hist_total - f32(loss_a) * l_mi_us)
        out_ref[...] = result.astype(out_ref.dtype)


def _pick_tile_n(n, target=512):
    """Largest multiple-of-128 divisor of n that is <= target, else n (single tile)."""
    if n <= target:
        return n
    t = (target // 128) * 128
    while t >= 128:
        if n % t == 0:
            return t
        t -= 128
    # TODO(synk): pad N with masked samples instead of falling back to one big tile.
    return n


def miloss_forward(y_true, y_pred, u_attr, s_attr, u_vec, s_vec,
                   *, loss_l=0.1, loss_a=0.5):
    """Pallas implementation of MILoss.forward (u_attr / s_attr are unused, exactly as
    in the reference forward)."""
    del u_attr, s_attr
    y_true = jnp.asarray(y_true, jnp.float32).reshape(1, -1)   # lane-dense rows
    y_pred = jnp.asarray(y_pred, jnp.float32).reshape(1, -1)
    u_vec = jnp.asarray(u_vec, jnp.float32)
    s_vec = jnp.asarray(s_vec, jnp.float32)
    N, D = u_vec.shape
    assert D <= N, "reference indexes rows u_vec[i]/s_vec[i] for i in range(D)"
    B = NUM_BINS
    F = 2 * D

    # Feature-major stack [u_vec.T ; s_vec.T].  NO 32x replication: the stacked one-hot
    # is built inside the kernel.
    xT = jnp.concatenate([u_vec.T, s_vec.T], axis=0)           # (2D, N)

    # Global bin edges (histogram2d over the full sample axis), hoisted out of the
    # per-tile loop: cheap XLA reduces, passed via SMEM (y) / tiny VMEM columns (x).
    ymin = jnp.min(y_pred)
    ymax = jnp.max(y_pred)
    yrng = jnp.where(ymax > ymin, ymax - ymin, jnp.float32(1.0))
    ystats = jnp.stack([ymin, jnp.float32(B) / yrng]).astype(jnp.float32)   # (2,)

    xmin = jnp.min(xT, axis=1, keepdims=True)                   # (2D, 1)
    xmax = jnp.max(xT, axis=1, keepdims=True)
    xrng = jnp.where(xmax > xmin, xmax - xmin, jnp.float32(1.0))
    xscale = (jnp.float32(B) / xrng).astype(jnp.float32)        # (2D, 1)

    # Rows 0..D-1 (the ones L_MI_us touches), one row per rank-3 slab.
    u3 = u_vec[:D, :].reshape(D, 1, D)
    s3 = s_vec[:D, :].reshape(D, 1, D)

    # Tile the sample axis; 512 is sized for v7x's 64 MiB VMEM with bf16 one-hots.
    # TODO(synk): pick per-chip tile (2-4x larger on v5e/v6e) via pltpu.get_tpu_info()
    # and add a leading 'parallel' feature-axis split for v7x megacore.
    tile_n = _pick_tile_n(N, target=512)
    num_tiles = N // tile_n

    kernel = functools.partial(
        _miloss_kernel,
        loss_l=float(loss_l), loss_a=float(loss_a),
        num_bins=B, bin_pad=BIN_PAD, n_total=N)

    out = pl.pallas_call(
        kernel,
        out_shape=jax.ShapeDtypeStruct((1, 1), jnp.float32),
        grid=(num_tiles,),
        in_specs=[
            pl.BlockSpec(memory_space=pltpu.MemorySpace.SMEM),       # ystats (2,) in SMEM
            pl.BlockSpec((1, tile_n), lambda k: (0, k)),             # y_true tile
            pl.BlockSpec((1, tile_n), lambda k: (0, k)),             # y_pred tile
            pl.BlockSpec((F, tile_n), lambda k: (0, k)),             # xT tile
            pl.BlockSpec((F, 1), lambda k: (0, 0)),                  # per-feature lo
            pl.BlockSpec((F, 1), lambda k: (0, 0)),                  # per-feature scale
            pl.BlockSpec((D, 1, D), lambda k: (0, 0, 0)),            # u3 (resident)
            pl.BlockSpec((D, 1, D), lambda k: (0, 0, 0)),            # s3 (resident)
        ],
        out_specs=pl.BlockSpec((1, 1), lambda k: (0, 0)),
        scratch_shapes=[
            pltpu.VMEM((BIN_PAD, F * BIN_PAD), jnp.float32),   # lane-dense joint accumulator
            pltpu.VMEM((BIN_PAD, 1), jnp.float32),             # y-histogram accumulator
            pltpu.VMEM((1, 1), jnp.float32),                   # L_PT partial sum
        ],
        compiler_params=pltpu.CompilerParams(
            dimension_semantics=("arbitrary",),
            vmem_limit_bytes=32 * 1024 * 1024),
    )(ystats, y_true, y_pred, xT, xmin, xscale, u3, s3)
    return out[0, 0]


if __name__ == "__main__":
    key = jax.random.PRNGKey(0)
    k1, k2, k3, k4, k5, k6 = jax.random.split(key, 6)

    N, D = 1024, 8        # N samples, D feature columns (D <= N so u_vec[i] row indexing is valid)
    y_true = jax.random.normal(k1, (N, 1), jnp.float32)
    y_pred = jax.random.normal(k2, (N, 1), jnp.float32)
    u_attr = jax.random.normal(k3, (N, 4), jnp.float32)   # unused by forward
    s_attr = jax.random.normal(k4, (N, 4), jnp.float32)   # unused by forward
    u_vec = jax.random.normal(k5, (N, D), jnp.float32)
    s_vec = jax.random.normal(k6, (N, D), jnp.float32)

    # loss_l / loss_a are the module's __init__ parameters; fixed deterministically.
    loss = miloss_forward(y_true, y_pred, u_attr, s_attr, u_vec, s_vec,
                          loss_l=0.1, loss_a=0.5)
    jax.block_until_ready(loss)
    print("KERNEL_OK")
</pallas_src>

<mosaic_0001>
module attributes {stable_mosaic.version = 11 : i64} {
  func.func @_miloss_kernel(%arg0: i32, %arg1: memref<2xf32, #tpu.memory_space<smem>>, %arg2: memref<1x512xf32, #tpu.memory_space<vmem>>, %arg3: memref<1x512xf32, #tpu.memory_space<vmem>>, %arg4: memref<16x512xf32, #tpu.memory_space<vmem>>, %arg5: memref<16x1xf32, #tpu.memory_space<vmem>>, %arg6: memref<16x1xf32, #tpu.memory_space<vmem>>, %arg7: memref<8x1x8xf32, #tpu.memory_space<vmem>>, %arg8: memref<8x1x8xf32, #tpu.memory_space<vmem>>, %arg9: memref<1x1xf32, #tpu.memory_space<vmem>>, %arg10: memref<32x512xf32, #tpu.memory_space<vmem>>, %arg11: memref<32x1xf32, #tpu.memory_space<vmem>>, %arg12: memref<1x1xf32, #tpu.memory_space<vmem>>) attributes {dimension_semantics = [#tpu.dimension_semantics<arbitrary>], iteration_bounds = array<i64: 2>, scalar_prefetch = 0 : i64, scratch_operands = 3 : i64, tpu.core_type = #tpu.core_type<tc>, window_params = [{transform_indices = @transform_0, window_bounds = array<i64: 2>}, {transform_indices = @transform_1, window_bounds = array<i64: 1, 512>}, {transform_indices = @transform_2, window_bounds = array<i64: 1, 512>}, {transform_indices = @transform_3, window_bounds = array<i64: 16, 512>}, {pipeline_mode = #tpu.pipeline_mode<synchronous>, transform_indices = @transform_4, window_bounds = array<i64: 16, 1>}, {pipeline_mode = #tpu.pipeline_mode<synchronous>, transform_indices = @transform_5, window_bounds = array<i64: 16, 1>}, {pipeline_mode = #tpu.pipeline_mode<synchronous>, transform_indices = @transform_6, window_bounds = array<i64: 8, 1, 8>}, {pipeline_mode = #tpu.pipeline_mode<synchronous>, transform_indices = @transform_7, window_bounds = array<i64: 8, 1, 8>}, {pipeline_mode = #tpu.pipeline_mode<synchronous>, transform_indices = @transform_8, window_bounds = array<i64: 1, 1>}]} {
    %c0_i32 = arith.constant 0 : i32
    %0 = arith.cmpi eq, %arg0, %c0_i32 : i32
    %1 = arith.extui %0 : i1 to i32
    %c0_i32_0 = arith.constant 0 : i32
    %2 = arith.cmpi ne, %1, %c0_i32_0 : i32
    scf.if %2 {
      %cst_29 = arith.constant 0.000000e+00 : f32
      %72 = vector.broadcast %cst_29 : f32 to vector<32x512xf32>
      %c0_30 = arith.constant 0 : index
      %c0_31 = arith.constant 0 : index
      %73 = vector.load %arg10[%c0_30, %c0_31] : memref<32x512xf32, #tpu.memory_space<vmem>>, vector<32x512xf32>
      tpu.vector_store %arg10[%c0_30, %c0_31], %72 {strides = array<i32>} : memref<32x512xf32, #tpu.memory_space<vmem>>, vector<32x512xf32>,
      %cst_32 = arith.constant 0.000000e+00 : f32
      %74 = vector.broadcast %cst_32 : f32 to vector<32x1xf32>
      %c0_33 = arith.constant 0 : index
      %c0_34 = arith.constant 0 : index
      %75 = vector.load %arg11[%c0_33, %c0_34] : memref<32x1xf32, #tpu.memory_space<vmem>>, vector<32x1xf32>
      tpu.vector_store %arg11[%c0_33, %c0_34], %74 {strides = array<i32>} : memref<32x1xf32, #tpu.memory_space<vmem>>, vector<32x1xf32>,
      %cst_35 = arith.constant 0.000000e+00 : f32
      %76 = vector.broadcast %cst_35 : f32 to vector<1x1xf32>
      %c0_36 = arith.constant 0 : index
      %c0_37 = arith.constant 0 : index
      %77 = vector.load %arg12[%c0_36, %c0_37] : memref<1x1xf32, #tpu.memory_space<vmem>>, vector<1x1xf32>
      tpu.vector_store %arg12[%c0_36, %c0_37], %76 {strides = array<i32>} : memref<1x1xf32, #tpu.memory_space<vmem>>, vector<1x1xf32>,
    } else {
    }
    %c0 = arith.constant 0 : index
    %c0_1 = arith.constant 0 : index
    %3 = vector.load %arg2[%c0, %c0_1] : memref<1x512xf32, #tpu.memory_space<vmem>>, vector<1x512xf32>
    %c0_2 = arith.constant 0 : index
    %c0_3 = arith.constant 0 : index
    %4 = vector.load %arg3[%c0_2, %c0_3] : memref<1x512xf32, #tpu.memory_space<vmem>>, vector<1x512xf32>
    %c0_4 = arith.constant 0 : index
    %c0_5 = arith.constant 0 : index
    %5 = vector.load %arg4[%c0_4, %c0_5] : memref<16x512xf32, #tpu.memory_space<vmem>>, vector<16x512xf32>
    %c0_6 = arith.constant 0 : index
    %c0_7 = arith.constant 0 : index
    %6 = vector.load %arg12[%c0_6, %c0_7] : memref<1x1xf32, #tpu.memory_space<vmem>>, vector<1x1xf32>
    %7 = arith.subf %3, %4 : vector<1x512xf32>
    %8 = math.absf %7 : vector<1x512xf32>
    %9 = vector.shape_cast %8 : vector<1x512xf32> to vector<1x1x512xf32>
    %cst = arith.constant dense<0.000000e+00> : vector<1xf32>
    %10 = vector.multi_reduction <add>, %9, %cst [1, 2] : vector<1x1x512xf32> to vector<1xf32>
    %11 = vector.shape_cast %10 : vector<1xf32> to vector<1x1x1xf32>
    %12 = vector.extract %11[0, 0, 0] : f32 from vector<1x1x1xf32>
    %13 = vector.broadcast %12 : f32 to vector<1x1xf32>
    %14 = arith.addf %6, %13 : vector<1x1xf32>
    %c0_8 = arith.constant 0 : index
    %c0_9 = arith.constant 0 : index
    %15 = vector.load %arg12[%c0_8, %c0_9] : memref<1x1xf32, #tpu.memory_space<vmem>>, vector<1x1xf32>
    tpu.vector_store %arg12[%c0_8, %c0_9], %14 {strides = array<i32>} : memref<1x1xf32, #tpu.memory_space<vmem>>, vector<1x1xf32>,
    %c0_10 = arith.constant 0 : index
    %16 = memref.load %arg1[%c0_10] : memref<2xf32, #tpu.memory_space<smem>>
    %c1 = arith.constant 1 : index
    %17 = memref.load %arg1[%c1] : memref<2xf32, #tpu.memory_space<smem>>
    %18 = vector.broadcast %16 : f32 to vector<1x512xf32>
    %19 = arith.subf %4, %18 : vector<1x512xf32>
    %20 = vector.broadcast %17 : f32 to vector<1x512xf32>
    %21 = arith.mulf %19, %20 : vector<1x512xf32>
    %22 = math.floor %21 : vector<1x512xf32>
    %c0_i32_11 = arith.constant 0 : i32
    %c29_i32 = arith.constant 29 : i32
    %23 = arith.sitofp %c0_i32_11 : i32 to f32
    %24 = vector.broadcast %23 : f32 to vector<1x512xf32>
    %25 = arith.maximumf %24, %22 : vector<1x512xf32>
    %26 = arith.sitofp %c29_i32 : i32 to f32
    %27 = vector.broadcast %26 : f32 to vector<1x512xf32>
    %28 = arith.minimumf %27, %25 : vector<1x512xf32>
    %29 = arith.fptosi %28 : vector<1x512xf32> to vector<1x512xi32>
    %30 = tpu.iota {dimensions = array<i32: 0>} : vector<32x512xi32>
    %31 = vector.broadcast %29 : vector<1x512xi32> to vector<32x512xi32>
    %32 = arith.cmpi eq, %31, %30 : vector<32x512xi32>
    %33 = arith.extui %32 : vector<32x512xi1> to vector<32x512xi32>
    %34 = arith.sitofp %33 : vector<32x512xi32> to vector<32x512xf32>
    %35 = arith.truncf %34 : vector<32x512xf32> to vector<32x512xbf16>
    %c0_12 = arith.constant 0 : index
    %c0_13 = arith.constant 0 : index
    %36 = vector.load %arg11[%c0_12, %c0_13] : memref<32x1xf32, #tpu.memory_space<vmem>>, vector<32x1xf32>
    %37 = arith.extui %32 : vector<32x512xi1> to vector<32x512xi32>
    %38 = arith.sitofp %37 : vector<32x512xi32> to vector<32x512xf32>
    %cst_14 = arith.constant dense<0.000000e+00> : vector<32xf32>
    %39 = vector.multi_reduction <add>, %38, %cst_14 [1] : vector<32x512xf32> to vector<32xf32>
    %40 = vector.shape_cast %39 : vector<32xf32> to vector<32x1xf32>
    %41 = arith.addf %36, %40 : vector<32x1xf32>
    %c0_15 = arith.constant 0 : index
    %c0_16 = arith.constant 0 : index
    %42 = vector.load %arg11[%c0_15, %c0_16] : memref<32x1xf32, #tpu.memory_space<vmem>>, vector<32x1xf32>
    tpu.vector_store %arg11[%c0_15, %c0_16], %41 {strides = array<i32>} : memref<32x1xf32, #tpu.memory_space<vmem>>, vector<32x1xf32>,
    %c0_17 = arith.constant 0 : index
    %c0_18 = arith.constant 0 : index
    %43 = vector.load %arg5[%c0_17, %c0_18] : memref<16x1xf32, #tpu.memory_space<vmem>>, vector<16x1xf32>
    %44 = vector.broadcast %43 : vector<16x1xf32> to vector<16x512xf32>
    %45 = arith.subf %5, %44 : vector<16x512xf32>
    %c0_19 = arith.constant 0 : index
    %c0_20 = arith.constant 0 : index
    %46 = vector.load %arg6[%c0_19, %c0_20] : memref<16x1xf32, #tpu.memory_space<vmem>>, vector<16x1xf32>
    %47 = vector.broadcast %46 : vector<16x1xf32> to vector<16x512xf32>
    %48 = arith.mulf %45, %47 : vector<16x512xf32>
    %49 = math.floor %48 : vector<16x512xf32>
    %c0_i32_21 = arith.constant 0 : i32
    %c29_i32_22 = arith.constant 29 : i32
    %50 = arith.sitofp %c0_i32_21 : i32 to f32
    %51 = vector.broadcast %50 : f32 to vector<16x512xf32>
    %52 = arith.maximumf %51, %49 : vector<16x512xf32>
    %53 = arith.sitofp %c29_i32_22 : i32 to f32
    %54 = vector.broadcast %53 : f32 to vector<16x512xf32>
    %55 = arith.minimumf %54, %52 : vector<16x512xf32>
    %56 = arith.fptosi %55 : vector<16x512xf32> to vector<16x512xi32>
    %57 = tpu.iota {dimensions = array<i32: 1>} : vector<16x32x512xi32>
    %58 = vector.shape_cast %56 : vector<16x512xi32> to vector<16x1x512xi32>
    %59 = vector.broadcast %58 : vector<16x1x512xi32> to vector<16x32x512xi32>
    %60 = arith.cmpi eq, %59, %57 : vector<16x32x512xi32>
    %61 = arith.extui %60 : vector<16x32x512xi1> to vector<16x32x512xi32>
    %62 = arith.sitofp %61 : vector<16x32x512xi32> to vector<16x32x512xf32>
    %63 = arith.truncf %62 : vector<16x32x512xf32> to vector<16x32x512xbf16>
    %64 = vector.shape_cast %63 : vector<16x32x512xbf16> to vector<512x512xbf16>
    %c0_23 = arith.constant 0 : index
    %c0_24 = arith.constant 0 : index
    %65 = vector.load %arg10[%c0_23, %c0_24] : memref<32x512xf32, #tpu.memory_space<vmem>>, vector<32x512xf32>
    "tpu.trace_start"() <{level = 10 : i32, message = "cn,rn->cr"}> : () -> ()
    %cst_25 = arith.constant dense<0.000000e+00> : vector<32x512xf32>
    %66 = tpu.matmul %35, %64, %cst_25 {dimension_numbers = #tpu.dot_dimension_numbers<[1], [1], [0], [0], [0, 0, 1, 0], [], []>} : vector<32x512xbf16>, vector<512x512xbf16>, vector<32x512xf32> -> vector<32x512xf32>
    "tpu.trace_stop"() : () -> ()
    %67 = arith.addf %65, %66 : vector<32x512xf32>
    %c0_26 = arith.constant 0 : index
    %c0_27 = arith.constant 0 : index
    %68 = vector.load %arg10[%c0_26, %c0_27] : memref<32x512xf32, #tpu.memory_space<vmem>>, vector<32x512xf32>
    tpu.vector_store %arg10[%c0_26, %c0_27], %67 {strides = array<i32>} : memref<32x512xf32, #tpu.memory_space<vmem>>, vector<32x512xf32>,
    %c1_i32 = arith.constant 1 : i32
    %69 = arith.cmpi eq, %arg0, %c1_i32 : i32
    %70 = arith.extui %69 : i1 to i32
    %c0_i32_28 = arith.constant 0 : i32
    %71 = arith.cmpi ne, %70, %c0_i32_28 : i32
    scf.if %71 {
      %c0_29 = arith.constant 0 : index
      %c0_30 = arith.constant 0 : index
      %72 = vector.load %arg10[%c0_29, %c0_30] : memref<32x512xf32, #tpu.memory_space<vmem>>, vector<32x512xf32>
      %cst_31 = arith.constant 9.765625E-4 : f32
      %73 = vector.broadcast %cst_31 : f32 to vector<32x512xf32>
      %74 = arith.mulf %72, %73 : vector<32x512xf32>
      %cst_32 = arith.constant dense<0.000000e+00> : vector<512xf32>
      %75 = vector.multi_reduction <add>, %72, %cst_32 [0] : vector<32x512xf32> to vector<512xf32>
      %76 = vector.shape_cast %75 : vector<512xf32> to vector<1x512xf32>
      %cst_33 = arith.constant 9.765625E-4 : f32
      %77 = vector.broadcast %cst_33 : f32 to vector<1x512xf32>
      %78 = arith.mulf %76, %77 : vector<1x512xf32>
      %c0_34 = arith.constant 0 : index
      %c0_35 = arith.constant 0 : index
      %79 = vector.load %arg11[%c0_34, %c0_35] : memref<32x1xf32, #tpu.memory_space<vmem>>, vector<32x1xf32>
      %cst_36 = arith.constant 9.765625E-4 : f32
      %80 = vector.broadcast %cst_36 : f32 to vector<32x1xf32>
      %81 = arith.mulf %79, %80 : vector<32x1xf32>
      %cst_37 = arith.constant 0.000000e+00 : f32
      %82 = vector.broadcast %cst_37 : f32 to vector<32x512xf32>
      %83 = arith.cmpf oeq, %74, %82 : vector<32x512xf32>
      %cst_38 = arith.constant 1.000000e-10 : f32
      %84 = vector.broadcast %cst_38 : f32 to vector<32x512xf32>
      %85 = arith.select %83, %84, %74 : vector<32x512xi1>, vector<32x512xf32>
      %cst_39 = arith.constant 0.000000e+00 : f32
      %86 = vector.broadcast %cst_39 : f32 to vector<1x512xf32>
      %87 = arith.cmpf oeq, %78, %86 : vector<1x512xf32>
      %cst_40 = arith.constant 1.000000e-10 : f32
      %88 = vector.broadcast %cst_40 : f32 to vector<1x512xf32>
      %89 = arith.select %87, %88, %78 : vector<1x512xi1>, vector<1x512xf32>
      %cst_41 = arith.constant 0.000000e+00 : f32
      %90 = vector.broadcast %cst_41 : f32 to vector<32x1xf32>
      %91 = arith.cmpf oeq, %81, %90 : vector<32x1xf32>
      %cst_42 = arith.constant 1.000000e-10 : f32
      %92 = vector.broadcast %cst_42 : f32 to vector<32x1xf32>
      %93 = arith.select %91, %92, %81 : vector<32x1xi1>, vector<32x1xf32>
      %94 = tpu.iota {dimensions = array<i32: 0>} : vector<32x512xi32>
      %95 = tpu.iota {dimensions = array<i32: 1>} : vector<32x512xi32>
      %c31_i32 = arith.constant 31 : i32
      %96 = vector.broadcast %c31_i32 : i32 to vector<32x512xi32>
      %97 = arith.andi %95, %96 : vector<32x512xi32>
      %c30_i32 = arith.constant 30 : i32
      %98 = vector.broadcast %c30_i32 : i32 to vector<32x512xi32>
      %99 = arith.cmpi slt, %94, %98 : vector<32x512xi32>
      %c30_i32_43 = arith.constant 30 : i32
      %100 = vector.broadcast %c30_i32_43 : i32 to vector<32x512xi32>
      %101 = arith.cmpi slt, %97, %100 : vector<32x512xi32>
      %102 = arith.andi %99, %101 : vector<32x512xi1>
      %103 = math.log %85 : vector<32x512xf32>
      %104 = math.log %89 : vector<1x512xf32>
      %105 = vector.broadcast %104 : vector<1x512xf32> to vector<32x512xf32>
      %106 = arith.subf %103, %105 : vector<32x512xf32>
      %107 = math.log %93 : vector<32x1xf32>
      %108 = vector.broadcast %107 : vector<32x1xf32> to vector<32x512xf32>
      %109 = arith.subf %106, %108 : vector<32x512xf32>
      %110 = arith.mulf %85, %109 : vector<32x512xf32>
      %cst_44 = arith.constant 0.000000e+00 : f32
      %111 = vector.broadcast %cst_44 : f32 to vector<32x512xf32>
      %112 = arith.select %102, %110, %111 : vector<32x512xi1>, vector<32x512xf32>
      %113 = vector.shape_cast %112 : vector<32x512xf32> to vector<1x32x512xf32>
      %cst_45 = arith.constant dense<0.000000e+00> : vector<1xf32>
      %114 = vector.multi_reduction <add>, %113, %cst_45 [1, 2] : vector<1x32x512xf32> to vector<1xf32>
      %115 = vector.shape_cast %114 : vector<1xf32> to vector<1x1x1xf32>
      %116 = vector.extract %115[0, 0, 0] : f32 from vector<1x1x1xf32>
      %c0_46 = arith.constant 0 : index
      %c0_47 = arith.constant 0 : index
      %c0_48 = arith.constant 0 : index
      %117 = vector.load %arg7[%c0_46, %c0_47, %c0_48] : memref<8x1x8xf32, #tpu.memory_space<vmem>>, vector<8x1x8xf32>
      %c0_49 = arith.constant 0 : index
      %c0_50 = arith.constant 0 : index
      %c0_51 = arith.constant 0 : index
      %118 = vector.load %arg8[%c0_49, %c0_50, %c0_51] : memref<8x1x8xf32, #tpu.memory_space<vmem>>, vector<8x1x8xf32>
      %cst_52 = arith.constant dense<0x7F800000> : vector<8x1xf32>
      %119 = vector.multi_reduction <minimumf>, %117, %cst_52 [2] : vector<8x1x8xf32> to vector<8x1xf32>
      %120 = vector.shape_cast %119 : vector<8x1xf32> to vector<8x1x1xf32>
      %cst_53 = arith.constant dense<0xFF800000> : vector<8x1xf32>
      %121 = vector.multi_reduction <maximumf>, %117, %cst_53 [2] : vector<8x1x8xf32> to vector<8x1xf32>
      %122 = vector.shape_cast %121 : vector<8x1xf32> to vector<8x1x1xf32>
      %123 = arith.cmpf ogt, %122, %120 : vector<8x1x1xf32>
      %124 = arith.subf %122, %120 : vector<8x1x1xf32>
      %cst_54 = arith.constant 1.000000e+00 : f32
      %125 = vector.broadcast %cst_54 : f32 to vector<8x1x1xf32>
      %126 = arith.select %123, %124, %125 : vector<8x1x1xi1>, vector<8x1x1xf32>
      %127 = vector.broadcast %120 : vector<8x1x1xf32> to vector<8x1x8xf32>
      %128 = arith.subf %117, %127 : vector<8x1x8xf32>
      %cst_55 = arith.constant 2.900000e+01 : f32
      %129 = vector.broadcast %cst_55 : f32 to vector<8x1x1xf32>
      %130 = arith.divf %129, %126 : vector<8x1x1xf32>
      %131 = vector.broadcast %130 : vector<8x1x1xf32> to vector<8x1x8xf32>
      %132 = arith.mulf %128, %131 : vector<8x1x8xf32>
      %133 = math.floor %132 : vector<8x1x8xf32>
      %c0_i32_56 = arith.constant 0 : i32
      %c29_i32_57 = arith.constant 29 : i32
      %134 = arith.sitofp %c0_i32_56 : i32 to f32
      %135 = vector.broadcast %134 : f32 to vector<8x1x8xf32>
      %136 = arith.maximumf %135, %133 : vector<8x1x8xf32>
      %137 = arith.sitofp %c29_i32_57 : i32 to f32
      %138 = vector.broadcast %137 : f32 to vector<8x1x8xf32>
      %139 = arith.minimumf %138, %136 : vector<8x1x8xf32>
      %140 = arith.fptosi %139 : vector<8x1x8xf32> to vector<8x1x8xi32>
      %cst_58 = arith.constant dense<0x7F800000> : vector<8x1xf32>
      %141 = vector.multi_reduction <minimumf>, %118, %cst_58 [2] : vector<8x1x8xf32> to vector<8x1xf32>
      %142 = vector.shape_cast %141 : vector<8x1xf32> to vector<8x1x1xf32>
      %cst_59 = arith.constant dense<0xFF800000> : vector<8x1xf32>
      %143 = vector.multi_reduction <maximumf>, %118, %cst_59 [2] : vector<8x1x8xf32> to vector<8x1xf32>
      %144 = vector.shape_cast %143 : vector<8x1xf32> to vector<8x1x1xf32>
      %145 = arith.cmpf ogt, %144, %142 : vector<8x1x1xf32>
      %146 = arith.subf %144, %142 : vector<8x1x1xf32>
      %cst_60 = arith.constant 1.000000e+00 : f32
      %147 = vector.broadcast %cst_60 : f32 to vector<8x1x1xf32>
      %148 = arith.select %145, %146, %147 : vector<8x1x1xi1>, vector<8x1x1xf32>
      %149 = vector.broadcast %142 : vector<8x1x1xf32> to vector<8x1x8xf32>
      %150 = arith.subf %118, %149 : vector<8x1x8xf32>
      %cst_61 = arith.constant 2.900000e+01 : f32
      %151 = vector.broadcast %cst_61 : f32 to vector<8x1x1xf32>
      %152 = arith.divf %151, %148 : vector<8x1x1xf32>
      %153 = vector.broadcast %152 : vector<8x1x1xf32> to vector<8x1x8xf32>
      %154 = arith.mulf %150, %153 : vector<8x1x8xf32>
      %155 = math.floor %154 : vector<8x1x8xf32>
      %c0_i32_62 = arith.constant 0 : i32
      %c29_i32_63 = arith.constant 29 : i32
      %156 = arith.sitofp %c0_i32_62 : i32 to f32
      %157 = vector.broadcast %156 : f32 to vector<8x1x8xf32>
      %158 = arith.maximumf %157, %155 : vector<8x1x8xf32>
      %159 = arith.sitofp %c29_i32_63 : i32 to f32
      %160 = vector.broadcast %159 : f32 to vector<8x1x8xf32>
      %161 = arith.minimumf %160, %158 : vector<8x1x8xf32>
      %162 = arith.fptosi %161 : vector<8x1x8xf32> to vector<8x1x8xi32>
      %163 = tpu.iota {dimensions = array<i32: 1>} : vector<8x32x8xi32>
      %164 = vector.broadcast %140 : vector<8x1x8xi32> to vector<8x32x8xi32>
      %165 = arith.cmpi eq, %164, %163 : vector<8x32x8xi32>
      %166 = arith.extui %165 : vector<8x32x8xi1> to vector<8x32x8xi32>
      %167 = arith.sitofp %166 : vector<8x32x8xi32> to vector<8x32x8xf32>
      %168 = arith.truncf %167 : vector<8x32x8xf32> to vector<8x32x8xbf16>
      %169 = vector.broadcast %162 : vector<8x1x8xi32> to vector<8x32x8xi32>
      %170 = arith.cmpi eq, %169, %163 : vector<8x32x8xi32>
      %171 = arith.extui %170 : vector<8x32x8xi1> to vector<8x32x8xi32>
      %172 = arith.sitofp %171 : vector<8x32x8xi32> to vector<8x32x8xf32>
      %173 = arith.truncf %172 : vector<8x32x8xf32> to vector<8x32x8xbf16>
      "tpu.trace_start"() <{level = 10 : i32, message = "iaj,ibj->iab"}> : () -> ()
      %cst_64 = arith.constant dense<0.000000e+00> : vector<8x32x32xf32>
      %174 = tpu.matmul %168, %173, %cst_64 {dimension_numbers = #tpu.dot_dimension_numbers<[2], [2], [1], [1], [0, 0, 0, 1, 1, 1], [0], [0]>} : vector<8x32x8xbf16>, vector<8x32x8xbf16>, vector<8x32x32xf32> -> vector<8x32x32xf32>
      "tpu.trace_stop"() : () -> ()
      %cst_65 = arith.constant dense<0.000000e+00> : vector<8x32xf32>
      %175 = vector.multi_reduction <add>, %174, %cst_65 [2] : vector<8x32x32xf32> to vector<8x32xf32>
      %176 = vector.shape_cast %175 : vector<8x32xf32> to vector<8x32x1xf32>
      %cst_66 = arith.constant dense<0.000000e+00> : vector<8x32xf32>
      %177 = vector.multi_reduction <add>, %174, %cst_66 [1] : vector<8x32x32xf32> to vector<8x32xf32>
      %178 = vector.shape_cast %177 : vector<8x32xf32> to vector<8x1x32xf32>
      %cst_67 = arith.constant 1.250000e-01 : f32
      %179 = vector.broadcast %cst_67 : f32 to vector<8x32x32xf32>
      %180 = arith.mulf %174, %179 : vector<8x32x32xf32>
      %cst_68 = arith.constant 1.250000e-01 : f32
      %181 = vector.broadcast %cst_68 : f32 to vector<8x32x1xf32>
      %182 = arith.mulf %176, %181 : vector<8x32x1xf32>
      %cst_69 = arith.constant 1.250000e-01 : f32
      %183 = vector.broadcast %cst_69 : f32 to vector<8x1x32xf32>
      %184 = arith.mulf %178, %183 : vector<8x1x32xf32>
      %cst_70 = arith.constant 0.000000e+00 : f32
      %185 = vector.broadcast %cst_70 : f32 to vector<8x32x32xf32>
      %186 = arith.cmpf ogt, %174, %185 : vector<8x32x32xf32>
      %cst_71 = arith.constant 1.000000e+00 : f32
      %187 = vector.broadcast %cst_71 : f32 to vector<8x32x32xf32>
      %188 = arith.select %186, %180, %187 : vector<8x32x32xi1>, vector<8x32x32xf32>
      %189 = math.log %188 : vector<8x32x32xf32>
      %cst_72 = arith.constant 0.000000e+00 : f32
      %190 = vector.broadcast %cst_72 : f32 to vector<8x32x1xf32>
      %191 = arith.cmpf ogt, %176, %190 : vector<8x32x1xf32>
      %cst_73 = arith.constant 1.000000e+00 : f32
      %192 = vector.broadcast %cst_73 : f32 to vector<8x32x1xf32>
      %193 = arith.select %191, %182, %192 : vector<8x32x1xi1>, vector<8x32x1xf32>
      %194 = math.log %193 : vector<8x32x1xf32>
      %cst_74 = arith.constant 0.000000e+00 : f32
      %195 = vector.broadcast %cst_74 : f32 to vector<8x1x32xf32>
      %196 = arith.cmpf ogt, %178, %195 : vector<8x1x32xf32>
      %cst_75 = arith.constant 1.000000e+00 : f32
      %197 = vector.broadcast %cst_75 : f32 to vector<8x1x32xf32>
      %198 = arith.select %196, %184, %197 : vector<8x1x32xi1>, vector<8x1x32xf32>
      %199 = math.log %198 : vector<8x1x32xf32>
      %200 = vector.broadcast %194 : vector<8x32x1xf32> to vector<8x32x32xf32>
      %201 = arith.subf %189, %200 : vector<8x32x32xf32>
      %202 = vector.broadcast %199 : vector<8x1x32xf32> to vector<8x32x32xf32>
      %203 = arith.subf %201, %202 : vector<8x32x32xf32>
      %204 = arith.mulf %180, %203 : vector<8x32x32xf32>
      %cst_76 = arith.constant 0.000000e+00 : f32
      %205 = vector.broadcast %cst_76 : f32 to vector<8x32x32xf32>
      %206 = arith.select %186, %204, %205 : vector<8x32x32xi1>, vector<8x32x32xf32>
      %cst_77 = arith.constant dense<0.000000e+00> : vector<8x32xf32>
      %207 = vector.multi_reduction <add>, %206, %cst_77 [2] : vector<8x32x32xf32> to vector<8x32xf32>
      %208 = vector.shape_cast %207 : vector<8x32xf32> to vector<8x32x1xf32>
      %cst_78 = arith.constant dense<0.000000e+00> : vector<8x1xf32>
      %209 = vector.multi_reduction <add>, %208, %cst_78 [1] : vector<8x32x1xf32> to vector<8x1xf32>
      %210 = vector.shape_cast %209 : vector<8x1xf32> to vector<8x1x1xf32>
      %cst_79 = arith.constant 0.000000e+00 : f32
      %211 = vector.broadcast %cst_79 : f32 to vector<8x1x1xf32>
      %212 = arith.maximumf %210, %211 : vector<8x1x1xf32>
      %213 = vector.shape_cast %212 : vector<8x1x1xf32> to vector<1x8x1x1xf32>
      %cst_80 = arith.constant dense<0.000000e+00> : vector<1xf32>
      %214 = vector.multi_reduction <add>, %213, %cst_80 [1, 2, 3] : vector<1x8x1x1xf32> to vector<1xf32>
      %215 = vector.shape_cast %214 : vector<1xf32> to vector<1x1x1x1xf32>
      %216 = vector.extract %215[0, 0, 0, 0] : f32 from vector<1x1x1x1xf32>
      %c0_81 = arith.constant 0 : index
      %c0_82 = arith.constant 0 : index
      %217 = vector.load %arg12[%c0_81, %c0_82] : memref<1x1xf32, #tpu.memory_space<vmem>>, vector<1x1xf32>
      %cst_83 = arith.constant 9.765625E-4 : f32
      %218 = vector.broadcast %cst_83 : f32 to vector<1x1xf32>
      %219 = arith.mulf %217, %218 : vector<1x1xf32>
      %cst_84 = arith.constant 5.000000e-01 : f32
      %220 = arith.mulf %cst_84, %216 : f32
      %221 = arith.subf %116, %220 : f32
      %cst_85 = arith.constant 1.000000e-01 : f32
      %222 = arith.mulf %cst_85, %221 : f32
      %223 = vector.broadcast %222 : f32 to vector<1x1xf32>
      %224 = arith.addf %219, %223 : vector<1x1xf32>
      %c0_86 = arith.constant 0 : index
      %c0_87 = arith.constant 0 : index
      %225 = vector.load %arg9[%c0_86, %c0_87] : memref<1x1xf32, #tpu.memory_space<vmem>>, vector<1x1xf32>
      tpu.vector_store %arg9[%c0_86, %c0_87], %224 {strides = array<i32>} : memref<1x1xf32, #tpu.memory_space<vmem>>, vector<1x1xf32>,
    } else {
    }
    return
  }
  func.func @transform_0(%arg0: i32) -> i32 {
    %c0_i32 = arith.constant 0 : i32
    %c0_i32_0 = arith.constant 0 : i32
    return %c0_i32 : i32
  }
  func.func @transform_1(%arg0: i32) -> (i32, i32) {
    %c0_i32 = arith.constant 0 : i32
    %c0_i32_0 = arith.constant 0 : i32
    return %c0_i32, %arg0 : i32, i32
  }
  func.func @transform_2(%arg0: i32) -> (i32, i32) {
    %c0_i32 = arith.constant 0 : i32
    %c0_i32_0 = arith.constant 0 : i32
    return %c0_i32, %arg0 : i32, i32
  }
  func.func @transform_3(%arg0: i32) -> (i32, i32) {
    %c0_i32 = arith.constant 0 : i32
    %c0_i32_0 = arith.constant 0 : i32
    return %c0_i32, %arg0 : i32, i32
  }
  func.func @transform_4(%arg0: i32) -> (i32, i32) {
    %c0_i32 = arith.constant 0 : i32
    %c0_i32_0 = arith.constant 0 : i32
    %c0_i32_1 = arith.constant 0 : i32
    return %c0_i32, %c0_i32_0 : i32, i32
  }
  func.func @transform_5(%arg0: i32) -> (i32, i32) {
    %c0_i32 = arith.constant 0 : i32
    %c0_i32_0 = arith.constant 0 : i32
    %c0_i32_1 = arith.constant 0 : i32
    return %c0_i32, %c0_i32_0 : i32, i32
  }
  func.func @transform_6(%arg0: i32) -> (i32, i32, i32) {
    %c0_i32 = arith.constant 0 : i32
    %c0_i32_0 = arith.constant 0 : i32
    %c0_i32_1 = arith.constant 0 : i32
    %c0_i32_2 = arith.constant 0 : i32
    return %c0_i32, %c0_i32_0, %c0_i32_1 : i32, i32, i32
  }
  func.func @transform_7(%arg0: i32) -> (i32, i32, i32) {
    %c0_i32 = arith.constant 0 : i32
    %c0_i32_0 = arith.constant 0 : i32
    %c0_i32_1 = arith.constant 0 : i32
    %c0_i32_2 = arith.constant 0 : i32
    return %c0_i32, %c0_i32_0, %c0_i32_1 : i32, i32, i32
  }
  func.func @transform_8(%arg0: i32) -> (i32, i32) {
    %c0_i32 = arith.constant 0 : i32
    %c0_i32_0 = arith.constant 0 : i32
    %c0_i32_1 = arith.constant 0 : i32
    return %c0_i32, %c0_i32_0 : i32, i32
  }
}

</mosaic_0001>

<bundles_post_ra>
// kernel: tpu_custom_call.1
= control target key start
LH: loop header
LB: loop body
LE: loop exit
PB: predicated region body
PF: predicated region fallthrough
CT: control target
= control target key end

     0   :  { %13 = vsyncpa [#allocation8], 0  ;;  %s8611_s0 = inlined_call_operand.vmem [shape: f32[2], index: 0, kind: input, shape index: {}]   ;;  %s8612_s1 = inlined_call_operand.vmem [shape: f32[1,1024], index: 1, kind: input, shape index: {}]   ;;  %s8613_s2 = inlined_call_operand.vmem [shape: f32[1,1024], index: 2, kind: input, shape index: {}]   ;;  %s8614_s3 = inlined_call_operand.hbm [shape: f32[16,1024], index: 3, kind: input, shape index: {}]   ;;  %s8615_s4 = inlined_call_operand.vmem [shape: f32[16,1], index: 4, kind: input, shape index: {}]   ;;  %s8616_s5 = inlined_call_operand.vmem [shape: f32[16,1], index: 5, kind: input, shape index: {}]   ;;  %s8617_s6 = inlined_call_operand.vmem [shape: f32[8,1,8], index: 6, kind: input, shape index: {}]   ;;  %s8618_s7 = inlined_call_operand.vmem [shape: f32[8,1,8], index: 7, kind: input, shape index: {}]   ;;  %s8619_s8 = inlined_call_operand.hbm [shape: f32[1,1], index: 8, kind: output, shape index: {}]  }
   0x1   :  { %14 = vsyncpa [#allocation6], 0 }
   0x2   :  { %16 = vsyncpa [#allocation6 + $0x1], 0 }
   0x3   :  { %17 = vsyncpa [#allocation7], 0  ;;  %s5839_s27 = smov 0   ;;  %s5841_s28 = smov 0  }
   0x4   :  { %s5843_s29 = smov 0   ;;  %s5845_s30 = smov 0  }
   0x5 LB: > { %s5858_s9 = sadd.s32 4294967295, %s5779_s30   ;;  %s5861_s10 = sadd.s32 1, %s5779_s30   ;;  %s5779_s30 = sphi %s5845_s30, %s8911_s30   ;;  %s5775_s29 = sphi %s5843_s29, %s8910_s29   ;;  %s5771_s28 = sphi %s5841_s28, %s8909_s28   ;;  %s5767_s27 = sphi %s5839_s27, %s8908_s27  }
   0x6   : > { %s100_s11 = ssub.s32 %s5779_s30, %s5861_s10  ;;  %s103_s12 = sadd.s32 1, %s5775_s29 }
   0x7   : > { %p101_p0 = scmp.eq.s32.totalorder %s100_s11, 0  ;;  %p110_p1 = scmp.ne.s32.totalorder %s5775_s29, %s5771_s28 }
   0x8   : > { %p111_p2 = scmp.eq.s32.totalorder %s5779_s30, 0  ;;  %p116_p3 = scmp.ne.s32.totalorder %s5771_s28, %s5767_s27 }
   0x9   : > { %s5871_s13 = scalar_select %p101_p0, %s5775_s29, %s103_s12  }
   0xa   : > { %p5873_p4 = por %p111_p2, %p110_p1  ;;  %p8621_p5 = scmp.eq.s32.totalorder %s5858_s9, 0 }
   0xb   : > { %p4528_p6 = scmp.ge.s32.totalorder %s5779_s30, 1  ;;  %p232_p7 = scmp.lt.s32.totalorder %s5779_s30, 3 }
   0xc   : > { %p5882_p8 = por %p8621_p5, %p116_p3  ;;  %s245_s19 = sshll.u32 %s8611_s0, 4  ;;  %s246_s19 = int_to_ptr.vmem [resolvable:$true] %s245_s19 }
   0xd   : > { %p5887_p10 = pnand %p4528_p6, %p232_p7  ;;  %p5390_p12 = scmp.lt.s32.totalorder %s5779_s30, 2 }
   0xe   : > { %s8713_s15 = scalar_select %p5882_p8, 1, 0 }
   0xf   : > { %p5381_p11 = pneg %p5887_p10  ;;  %s284_s20 = sand.u32 1, %s5775_s29  }
  0x10   : > { %p5906_p0 = pnand %p5390_p12, %p5873_p4  ;;  %s4531_s23 = sshll.u32 %s284_s20, 6 }
  0x11   : > { %p5900_p13 = pnand %p5381_p11, %p8621_p5  ;;  %s5666_s24 = scalar_lea.vmem %s246_s19, 16 }
  0x12   : > { %p5667_p1 = scmp.ne.s32.totalorder %s246_s19, %s5666_s24  ;;  %p5674_p7 = scmp.lt.s32.totalorder %s246_s19, %s246_s19 }
  0x13   : > { %p5668_p2 = pneg %p5900_p13  ;;  %p5675_p9 = scmp.lt.s32.totalorder %s5666_s24, %s5666_s24 }
  0x15   : > { %p5669_p3 = pnand %p5668_p2, %p5667_p1  ;;  %p5676_p8 = por %p5675_p9, %p5674_p7 }
  0x17   : > { %p5670_p6 = pneg %p5669_p3 }
  0x19   : > { %p5677_p11 = pnand %p5676_p8, %p5670_p6 }
  0x1b   : > { %5680 = shalt.err (!%p5677_p11)
}
  0x1c   : > { %s5781_s25 = smov [#allocation5]   ;;  %s5186_s26 = sshll.u32 %s5779_s30, 9 }
  0x1d   : > { %5384 = dma.vmem_to_smem (!%p5900_p13), %s246_s19, 16, %s5781_s25, [#allocation8]  }
  0x1e   : > { %s5918_s12 = scalar_lea.hbm %s8614_s3, %s5186_s26  ;;  %s288_s14 = scalar_lea.vmem [#allocation9], %s4531_s23 }
  0x1f   : > { %s295_s17 = sshll.u32 %s288_s14, 4  ;;  %s5922_s18 = scalar_lea.sflag [#allocation6], %s284_s20  ;;  %s5920_s17 = int_to_ptr.vmem [resolvable:$true] %s295_s17 }
  0x20   : > { %s5681_s21 = scalar_lea.hbm %s5918_s12, 1024  ;;  %p5683_p8 = pneg %p5906_p0 }
  0x21   : > { %p5682_p4 = scmp.ne.s32.totalorder %s5918_s12, %s5681_s21  ;;  %s5686_s24 = scalar_lea.hbm %s8614_s3, 2048 }
  0x22   : > { %p5687_p13 = scmp.lt.u32.totalorder %s5918_s12, %s8614_s3  ;;  %p5688_p1 = scmp.lt.u32.totalorder %s5686_s24, %s5681_s21 }
  0x23   : > { %p5684_p9 = pnand %p5683_p8, %p5682_p4  ;;  %p5690_p3 = scmp.lt.u32.totalorder %s5681_s21, %s5918_s12 }
  0x24   : > { %p5689_p2 = por %p5688_p1, %p5687_p13 }
  0x25   : > { %p5685_p12 = pneg %p5684_p9 }
  0x26   : > { %p5691_p6 = por %p5690_p3, %p5689_p2 }
  0x28   : > { %p5692_p7 = pnand %p5691_p6, %p5685_p12 }
  0x2a   : > { %5695 = shalt.err (!%p5692_p7)
}
  0x2b   : > { %s5696_s20 = scalar_lea.vmem %s5920_s17, 1024  ;;  %s5782_s23 = smov [#allocation9]  }
  0x2c   : > { %p5697_p11 = scmp.ne.s32.totalorder %s5920_s17, %s5696_s20  ;;  %s5701_s27 = sshll.u32 %s5782_s23, 4  ;;  %s5702_s27 = int_to_ptr.vmem [resolvable:$false] %s5701_s27 }
  0x2d   : > { %s5703_s11 = scalar_lea.vmem %s5702_s27, 2048  ;;  %p5704_p5 = scmp.lt.s32.totalorder %s5920_s17, %s5702_s27 }
  0x2e   : > { %p5699_p4 = pnand %p5697_p11, %p5683_p8  ;;  %p5705_p13 = scmp.lt.s32.totalorder %s5703_s11, %s5696_s20 }
  0x30   : > { %p5700_p9 = pneg %p5699_p4  ;;  %p5706_p1 = por %p5705_p13, %p5704_p5 }
  0x32   : > { %p5707_p2 = pnand %p5706_p1, %p5700_p9 }
  0x34   : > { %5710 = shalt.err (!%p5707_p2)
}
  0x35   : > { %s5783_s14 = smov 1024   ;;  %s5784_s21 = smov 512  }
  0x36   : > { %s5785_s30 = smov 32   ;;  %307 = sbr.rel (%p5887_p10) target bundleno = 1833 (0x729), region = 52 }
  0x37   : > { %5388 = dma.hbm_to_vmem [thread:$0]  (!%p5906_p0), %s5918_s12, 1024, %s5920_s17, %s5922_s18, %s5783_s14, %s5784_s21, %s5785_s30  }
  0x3d   : > { %p8717_p8 = scmp.eq.s32.totalorder %s5858_s9, 0 }
  0x3f   : > { %5754 = dma.done.wait (%p8717_p8), [#allocation8], 16   ;;  %p8718_p12 = pmov %p8717_p8 }
  0x40   : > { %s313_s19 = sand.u32 1, %s5771_s28   ;;  %p8719_p5 = scmp.ne.s32.totalorder %s8713_s15, 0 }
  0x41   : > { %5756 = vsyncadd (%p8718_p12), [#allocation8], 4294967280  ;;  %s4536_s24 = sshll.u32 %s313_s19, 6  ;;  %s314_s25 = scalar_lea.sflag [#allocation6], %s313_s19 }
  0x42   : > { %s5957_s26 = scalar_lea.vmem [#allocation9], %s4536_s24 }
  0x43   : > { %5758 = dma.done.wait (%p8719_p5), %s314_s25, 1024  }
  0x44   : > { %5760 = vsyncadd (%p8719_p5), %s314_s25, 4294966272 }
  0x45   : > { %322 = sfence }
  0x46   : > { %s4537_s16 = sshll.u32 %s5858_s9, 2  ;;  %p8720_p0 = scmp.ne.s32.totalorder %s5858_s9, 0 }
  0x47   : > { %p355_p10 = scmp.lt.s32.totalorder %s4537_s16, 7  ;;  %vm386_vm0 = vcmask (!%p8720_p0), 7168   ;;  %vm391_vm1 = vcmask (!%p8720_p0), 0   ;;  %v5786_v0 = vmov (!%p8720_p0), 0.0  }
  0x48   : > { %369 = sbr.rel (%p8720_p0) target bundleno = 83 (0x53), region = 64  ;;  %370 = vst [vmem:[#allocation2] sm:$0xff] (!%p8720_p0), %v5786_v0  ;;  %371 = vst [vmem:[#allocation2 + $0x8] sm:$0xff] (!%p8720_p0), %v5786_v0 }
  0x49   : > { %s8913_s16 = smov (!%p355_p10, %s4537_s16), 7  ;;  %372 = vst [vmem:[#allocation2 + $0x10] sm:$0xff] (!%p8720_p0), %v5786_v0  ;;  %373 = vst [vmem:[#allocation2 + $0x18] sm:$0xff] (!%p8720_p0), %v5786_v0 }
  0x4a   : > { %s357_s17 = scalar_lea.vmem %s8612_s1, %s8913_s16  ;;  %s362_s23 = scalar_lea.vmem %s8613_s2, %s8913_s16  ;;  %374 = vst [vmem:[#allocation2 + $0x20] sm:$0xff] (!%p8720_p0), %v5786_v0  ;;  %375 = vst [vmem:[#allocation2 + $0x28] sm:$0xff] (!%p8720_p0), %v5786_v0 }
  0x4b   : > { %376 = vst [vmem:[#allocation2 + $0x30] sm:$0xff] (!%p8720_p0), %v5786_v0  ;;  %377 = vst [vmem:[#allocation2 + $0x38] sm:$0xff] (!%p8720_p0), %v5786_v0 }
  0x4c   : > { %378 = vst [vmem:[#allocation2 + $0x40] sm:$0xff] (!%p8720_p0), %v5786_v0  ;;  %379 = vst [vmem:[#allocation2 + $0x48] sm:$0xff] (!%p8720_p0), %v5786_v0 }
  0x4d   : > { %380 = vst [vmem:[#allocation2 + $0x50] sm:$0xff] (!%p8720_p0), %v5786_v0  ;;  %381 = vst [vmem:[#allocation2 + $0x58] sm:$0xff] (!%p8720_p0), %v5786_v0 }
  0x4e   : > { %382 = vst [vmem:[#allocation2 + $0x60] sm:$0xff] (!%p8720_p0), %v5786_v0  ;;  %383 = vst [vmem:[#allocation2 + $0x68] sm:$0xff] (!%p8720_p0), %v5786_v0 }
  0x4f   : > { %384 = vst [vmem:[#allocation2 + $0x70] sm:$0xff] %v5786_v0  ;;  %385 = vst [vmem:[#allocation2 + $0x78] sm:$0xff] %v5786_v0 }
  0x50   : > { %387 = vst.msk [vmem:[#allocation3] sm:$0xff] %vm386_vm0, %v5786_v0  ;;  %388 = vst.msk [vmem:[#allocation3 + $0x8] sm:$0xff] %vm386_vm0, %v5786_v0 }
  0x51   : > { %389 = vst.msk [vmem:[#allocation3 + $0x10] sm:$0xff] %vm386_vm0, %v5786_v0  ;;  %390 = vst.msk [vmem:[#allocation3 + $0x18] sm:$0xff] %vm386_vm0, %v5786_v0 }
  0x52   : > { %392 = vst.msk [vmem:[#allocation4] sm:$0x1] %vm391_vm1, %v5786_v0 }
  0x53 PF: > { %v588_v1 = vld [vmem:[%s8616_s5] sm:$0xff]  ;;  %v5787_v3 = vmov 0   ;;  %v589_v4 = vld [vmem:[%s8616_s5 + $0x8] sm:$0xff]  ;;  %v5788_v6 = vmov 1966171168   ;;  %v8637_v8 = vlaneseq  ;;  %v397_v11 = vld [vmem:[%s5957_s26 + $0x10] sm:$0xff] }
  0x54   : > { %v568_v2 = vld [vmem:[%s8615_s4] sm:$0xff]  ;;  %5439 = vset.pattern.permute.xlu1 %v5787_v3  ;;  %5438 = vset.pattern.permute.xlu0 %v5787_v3  ;;  %v569_v5 = vld [vmem:[%s8615_s4 + $0x8] sm:$0xff]  ;;  %v645_v7 = vunpack.c.l.s4 %v5788_v6  ;;  %v401_v27 = vld [vmem:[%s5957_s26 + $0x30] sm:$0xff]  ;;  %s6181_s25 = sld [smem:[#allocation5]]  ;;  %p5101_p3 = scmp.ne.s32.totalorder %s5858_s9, 1 }
  0x55   : > { %592 = vperm.xlu1 %5439, %v588_v1   ;;  %572 = vperm.xlu0 %5438, %v568_v2   ;;  %v395_v9 = vld [vmem:[%s5957_s26] sm:$0xff]  ;;  %v396_v10 = vld [vmem:[%s5957_s26 + $0x8] sm:$0xff]  ;;  %v398_v12 = vld [vmem:[%s5957_s26 + $0x18] sm:$0xff]  ;;  %v5998_v15 = vshrl.u32 %v8637_v8, 7 }
  0x56   : > { %v646_v13 = vunpack.c.0.s8 %v645_v7  ;;  %v399_v21 = vld [vmem:[%s5957_s26 + $0x20] sm:$0xff]  ;;  %v400_v26 = vld [vmem:[%s5957_s26 + $0x28] sm:$0xff]  ;;  %v402_v28 = vld [vmem:[%s5957_s26 + $0x38] sm:$0xff]  ;;  %s6183_s26 = sld [smem:[#allocation5 + $0x1]] }
  0x58   : > { %v6005_v29 = vsub.s32 %v646_v13, %v5998_v15 }
  0x59   : > { %597 = vperm.xlu1 %5439, %v589_v4   ;;  %577 = vperm.xlu0 %5438, %v569_v5  }
  0xd4   : > { %v573_v14 = vpop.permute.xlu0 %572  ;;  %v593_v16 = vpop.permute.xlu1 %592 }
  0xd5   : > { %v580_v17 = vsub.f32 %v395_v9, %v573_v14  ;;  %v581_v18 = vsub.f32 %v396_v10, %v573_v14  ;;  %v582_v19 = vsub.f32 %v397_v11, %v573_v14  ;;  %v583_v20 = vsub.f32 %v398_v12, %v573_v14 }
  0xd7   : > { %v600_v22 = vmul.f32 %v593_v16, %v580_v17  ;;  %v601_v23 = vmul.f32 %v593_v16, %v581_v18  ;;  %v602_v24 = vmul.f32 %v593_v16, %v582_v19  ;;  %v603_v25 = vmul.f32 %v593_v16, %v583_v20 }
  0xd8   : > { %v578_v30 = vpop.permute.xlu0 %577  ;;  %v598_v43 = vpop.permute.xlu1 %597 }
  0xd9   : > { %v608_v31 = vfloor.f32 %v600_v22  ;;  %v609_v32 = vfloor.f32 %v601_v23  ;;  %v610_v33 = vfloor.f32 %v602_v24  ;;  %v611_v34 = vfloor.f32 %v603_v25 }
  0xda   : > { %v584_v35 = vsub.f32 %v399_v21, %v578_v30  ;;  %v585_v36 = vsub.f32 %v400_v26, %v578_v30  ;;  %v586_v37 = vsub.f32 %v401_v27, %v578_v30  ;;  %v587_v38 = vsub.f32 %v402_v28, %v578_v30 }
  0xdb   : > { %v616_v39 = vmax.f32 %v608_v31, 0.0  ;;  %v617_v40 = vmax.f32 %v609_v32, 0.0  ;;  %v618_v41 = vmax.f32 %v610_v33, 0.0  ;;  %v619_v42 = vmax.f32 %v611_v34, 0.0 }
  0xdc   : > { %v604_v44 = vmul.f32 %v598_v43, %v584_v35  ;;  %v605_v45 = vmul.f32 %v598_v43, %v585_v36  ;;  %v606_v46 = vmul.f32 %v598_v43, %v586_v37  ;;  %v607_v47 = vmul.f32 %v598_v43, %v587_v38 }
  0xdd   : > { %v624_v48 = vmin.f32 %v616_v39, 29.0  ;;  %v625_v49 = vmin.f32 %v617_v40, 29.0  ;;  %v626_v50 = vmin.f32 %v618_v41, 29.0  ;;  %v627_v51 = vmin.f32 %v619_v42, 29.0 }
  0xde   : > { %v612_v52 = vfloor.f32 %v604_v44  ;;  %v613_v53 = vfloor.f32 %v605_v45  ;;  %v614_v54 = vfloor.f32 %v606_v46  ;;  %v615_v55 = vfloor.f32 %v607_v47 }
  0xdf   : > { %v6007_v56 = vtrunc.f32 %v624_v48  ;;  %v6009_v57 = vtrunc.f32 %v625_v49  ;;  %v6011_v58 = vtrunc.f32 %v626_v50  ;;  %v6013_v59 = vtrunc.f32 %v627_v51 }
  0xe0   : > { %v620_v60 = vmax.f32 %v612_v52, 0.0  ;;  %v621_v61 = vmax.f32 %v613_v53, 0.0  ;;  %v622_v62 = vmax.f32 %v614_v54, 0.0  ;;  %v623_v63 = vmax.f32 %v615_v55, 0.0 }
  0xe1   : > { %v5320_v0 = vcvt.f32.s32 %v6007_v56  ;;  %v5322_v1 = vcvt.f32.s32 %v6009_v57  ;;  %v5324_v2 = vcvt.f32.s32 %v6011_v58  ;;  %v5326_v3 = vcvt.f32.s32 %v6013_v59 }
  0xe2   : > { %v628_v4 = vmin.f32 %v620_v60, 29.0  ;;  %v629_v5 = vmin.f32 %v621_v61, 29.0  ;;  %v630_v6 = vmin.f32 %v622_v62, 29.0  ;;  %v631_v7 = vmin.f32 %v623_v63, 29.0 }
  0xe3   : > { %v640_v9 = vcombine.low %v5320_v0, %v5322_v1  ;;  %v642_v10 = vcombine.low %v5324_v2, %v5326_v3  ;;  %v6042_v23 = vsub.s32 1, %v5998_v15  ;;  %v6045_v24 = vsub.s32 0, %v5998_v15 }
  0xe4   : > { %v6027_v11 = vtrunc.f32 %v628_v4  ;;  %v6029_v12 = vtrunc.f32 %v629_v5  ;;  %v6031_v13 = vtrunc.f32 %v630_v6  ;;  %v6033_v14 = vtrunc.f32 %v631_v7 }
  0xe5   : > { %v650_v16 = vrot.slane %v640_v9, %v6005_v29  ;;  %v664_v17 = vrot.slane %v642_v10, %v6005_v29  ;;  %v6059_v30 = vadd.s32 8, %v5998_v15  ;;  %v6068_v35 = vadd.s32 16, %v5998_v15 }
  0xe6   : > { %v5328_v18 = vcvt.f32.s32 %v6027_v11  ;;  %v5330_v19 = vcvt.f32.s32 %v6029_v12  ;;  %v5332_v20 = vcvt.f32.s32 %v6031_v13  ;;  %v5334_v21 = vcvt.f32.s32 %v6033_v14 }
  0xe7   : > { %v672_v22 = vcombine.low %v650_v16, %v664_v17  ;;  %v673_v25 = vcombine.high %v650_v16, %v664_v17  ;;  %v6071_v36 = vadd.s32 24, %v5998_v15  ;;  %v5789_v41 = vmov 1.0|1.0  }
  0xe8   : > { %v708_v26 = vcombine.low %v5328_v18, %v5330_v19  ;;  %v710_v27 = vcombine.low %v5332_v20, %v5334_v21  ;;  %v641_v60 = vcombine.high %v5320_v0, %v5322_v1  ;;  %v643_v61 = vcombine.high %v5324_v2, %v5326_v3  ;;  %v6223_v1 = vld [vmem:[%s362_s23] sm:$0xf] }
  0xe9   : > { %v6056_v28 = vrot.slane %v672_v22, %v6005_v29  ;;  %8721 = vst [vmem:[#allocation14_spill] sm:$0xff] %v6071_v36  ;;  %v6074_v37 = vrot.slane %v673_v25, %v6005_v29  ;;  %v709_v62 = vcombine.high %v5328_v18, %v5330_v19  ;;  %v711_v63 = vcombine.high %v5332_v20, %v5334_v21 }
  0xea   : > { %v718_v31 = vrot.slane %v708_v26, %v6005_v29  ;;  %v732_v32 = vrot.slane %v710_v27, %v6005_v29  ;;  %v6197_v58 = vrot.slane %v641_v60, %v6005_v29  ;;  %v6200_v59 = vrot.slane %v643_v61, %v6005_v29 }
  0xeb   : > { %v783_v33 = vrot.slane %v6056_v28, %v6042_v23  ;;  %v779_v34 = vrot.slane %v6056_v28, %v6045_v24  ;;  %v799_v45 = vrot.slane %v6074_v37, %v6042_v23  ;;  %v795_v47 = vrot.slane %v6074_v37, %v6045_v24 }
  0xec   : > { %v740_v38 = vcombine.low %v718_v31, %v732_v32  ;;  %v741_v39 = vcombine.high %v718_v31, %v732_v32  ;;  %v6129_v49 = vcombine.high %v6056_v28, %v6056_v28  ;;  %v6169_v55 = vcombine.high %v6074_v37, %v6074_v37 }
  0xed   : > { %vm1033_vm2 = vcmp.eq.s32.totalorder %v783_v33, %v5998_v15  ;;  %vm1037_vm3 = vcmp.eq.s32.totalorder %v783_v33, %v6059_v30  ;;  %vm1032_vm4 = vcmp.eq.s32.totalorder %v779_v34, %v5998_v15  ;;  %vm1036_vm5 = vcmp.eq.s32.totalorder %v779_v34, %v6059_v30 }
  0xee   : > { %v6081_v40 = vrot.slane %v740_v38, %v6005_v29  ;;  %vm4813_vm6 = vmpackc.low %vm1037_vm3, %vm1033_vm2  ;;  %vm1041_vm8 = vcmp.eq.s32.totalorder %v783_v33, %v6068_v35  ;;  %vm1045_vm9 = vcmp.eq.s32.totalorder %v783_v33, %v6071_v36  ;;  %v6092_v44 = vrot.slane %v741_v39, %v6005_v29 }
  0xef   : > { %4814 = vmatprep.subr.msk.bf16.mxu0 %vm4813_vm6, %v5789_v41  ;;  %vm4815_vm7 = vmpackc.low %vm1036_vm5, %vm1032_vm4  ;;  %vm1040_vm3 = vcmp.eq.s32.totalorder %v779_v34, %v6068_v35  ;;  %vm1044_vm4 = vcmp.eq.s32.totalorder %v779_v34, %v6071_v36  ;;  %vm1049_vm6 = vcmp.eq.s32.totalorder %v799_v45, %v5998_v15  ;;  %v815_v50 = vrot.slane %v6129_v49, %v6042_v23 }
  0xf0   : > { %4816 = vmatpush1.bf16.xpose.msk.msra.mxu0 %vm4815_vm7, %v5789_v41  ;;  %vm4817_vm10 = vmpackc.low %vm1045_vm9, %vm1041_vm8  ;;  %v911_v42 = vrot.slane %v6081_v40, %v6042_v23  ;;  %v907_v43 = vrot.slane %v6081_v40, %v6045_v24  ;;  %vm1053_vm7 = vcmp.eq.s32.totalorder %v799_v45, %v6059_v30  ;;  %v927_v46 = vrot.slane %v6092_v44, %v6042_v23 }
  0xf1   : > { %4818 = vmatprep.subr.msk.bf16.mxu0 %vm4817_vm10, %v5789_v41  ;;  %vm4819_vm8 = vmpackc.low %vm1044_vm4, %vm1040_vm3  ;;  %vm1061_vm3 = vcmp.eq.s32.totalorder %v799_v45, %v6071_v36  ;;  %v923_v48 = vrot.slane %v6092_v44, %v6045_v24  ;;  %v6142_v51 = vcombine.high %v6081_v40, %v6081_v40  ;;  %v811_v53 = vrot.slane %v6129_v49, %v6045_v24 }
  0xf2   : > { %vm1161_vm11 = vcmp.eq.s32.totalorder %v911_v42, %v5998_v15  ;;  %vm1165_vm12 = vcmp.eq.s32.totalorder %v911_v42, %v6059_v30  ;;  %vm1160_vm13 = vcmp.eq.s32.totalorder %v907_v43, %v5998_v15  ;;  %vm1164_vm14 = vcmp.eq.s32.totalorder %v907_v43, %v6059_v30  ;;  %vm4821_vm9 = vmpackc.low %vm1053_vm7, %vm1049_vm6 }
  0xf3   : > { %vm4957_vm15 = vmpackc.low %vm1165_vm12, %vm1161_vm11  ;;  %vm1169_vm0 = vcmp.eq.s32.totalorder %v911_v42, %v6068_v35  ;;  %vm1173_vm1 = vcmp.eq.s32.totalorder %v911_v42, %v6071_v36  ;;  %vm1168_vm10 = vcmp.eq.s32.totalorder %v907_v43, %v6068_v35  ;;  %vm1172_vm11 = vcmp.eq.s32.totalorder %v907_v43, %v6071_v36 }
  0xf4   : > { %4958 = vmatprep.subr.msk.bf16.mxu1 %vm4957_vm15, %v5789_v41  ;;  %vm4959_vm2 = vmpackc.low %vm1164_vm14, %vm1160_vm13  ;;  %vm1177_vm12 = vcmp.eq.s32.totalorder %v927_v46, %v5998_v15  ;;  %vm1181_vm13 = vcmp.eq.s32.totalorder %v927_v46, %v6059_v30  ;;  %vm1048_vm15 = vcmp.eq.s32.totalorder %v795_v47, %v5998_v15  ;;  %vm1176_vm6 = vcmp.eq.s32.totalorder %v923_v48, %v5998_v15 }
  0xf5   : > { %4960 = vmatpush1.bf16.xpose.msk.msra.mxu1 %vm4959_vm2, %v5789_v41  ;;  %vm4961_vm5 = vmpackc.low %vm1173_vm1, %vm1169_vm0  ;;  %vm1052_vm0 = vcmp.eq.s32.totalorder %v795_v47, %v6059_v30  ;;  %vm1057_vm2 = vcmp.eq.s32.totalorder %v799_v45, %v6068_v35  ;;  %vm1180_vm7 = vcmp.eq.s32.totalorder %v923_v48, %v6059_v30  ;;  %v943_v52 = vrot.slane %v6142_v51, %v6042_v23 }
  0xf6   : > { %4962 = vmatprep.subr.msk.bf16.mxu1 %vm4961_vm5, %v5789_v41  ;;  %vm4963_vm14 = vmpackc.low %vm1172_vm11, %vm1168_vm10  ;;  %vm1056_vm11 = vcmp.eq.s32.totalorder %v795_v47, %v6068_v35  ;;  %v939_v54 = vrot.slane %v6142_v51, %v6045_v24  ;;  %v831_v56 = vrot.slane %v6169_v55, %v6042_v23  ;;  %v6194_v57 = vcombine.high %v6092_v44, %v6092_v44 }
  0xf7   : > { %vm4965_vm1 = vmpackc.low %vm1181_vm13, %vm1177_vm12  ;;  %vm1060_vm12 = vcmp.eq.s32.totalorder %v795_v47, %v6071_v36  ;;  %v674_v2 = vcombine.low %v6197_v58, %v6200_v59  ;;  %v827_v3 = vrot.slane %v6169_v55, %v6045_v24  ;;  %v450_v4 = vstv %s6181_s25 }
  0xf8   : > { %4820 = vmatpush1.bf16.xpose.msk.msra.mxu0 %vm4819_vm8, %v5789_v41  ;;  %vm4823_vm4 = vmpackc.low %vm1052_vm0, %vm1048_vm15  ;;  %vm1185_vm8 = vcmp.eq.s32.totalorder %v927_v46, %v6068_v35  ;;  %vm1069_vm15 = vcmp.eq.s32.totalorder %v815_v50, %v6059_v30  ;;  %v959_v0 = vrot.slane %v6194_v57, %v6042_v23  ;;  %v452_v5 = vstv %s6183_s26 }
  0xf9   : > { %4822 = vmatprep.subr.msk.bf16.mxu0 %vm4821_vm9, %v5789_v41  ;;  %vm4825_vm5 = vmpackc.low %vm1061_vm3, %vm1057_vm2  ;;  %vm1189_vm9 = vcmp.eq.s32.totalorder %v927_v46, %v6071_v36  ;;  %vm1184_vm2 = vcmp.eq.s32.totalorder %v923_v48, %v6068_v35  ;;  %vm1188_vm3 = vcmp.eq.s32.totalorder %v923_v48, %v6071_v36  ;;  %v451_v6 = vsub.f32 %v6223_v1, %v450_v4 }
  0xfa   : > { %vm4967_vm10 = vmpackc.low %vm1180_vm7, %vm1176_vm6  ;;  %vm1064_vm7 = vcmp.eq.s32.totalorder %v811_v53, %v5998_v15  ;;  %v6237_v7 = vrot.slane %v709_v62, %v6005_v29  ;;  %v6240_v9 = vrot.slane %v711_v63, %v6005_v29  ;;  %v6245_v11 = vrot.slane %v674_v2, %v6005_v29 }
  0xfb   : > { %vm4969_vm13 = vmpackc.low %vm1189_vm9, %vm1185_vm8  ;;  %vm1068_vm8 = vcmp.eq.s32.totalorder %v811_v53, %v6059_v30  ;;  %v453_v10 = vmul.f32 %v452_v5, %v451_v6  ;;  %v955_v12 = vrot.slane %v6194_v57, %v6045_v24  ;;  %v675_v26 = vcombine.high %v6197_v58, %v6200_v59 }
  0xfc   : > { %vm4827_vm0 = vmpackc.low %vm1060_vm12, %vm1056_vm11  ;;  %vm1077_vm11 = vcmp.eq.s32.totalorder %v815_v50, %v6071_v36  ;;  %v742_v14 = vcombine.low %v6237_v7, %v6240_v9  ;;  %v847_v17 = vrot.slane %v6245_v11, %v6042_v23  ;;  %v843_v25 = vrot.slane %v6245_v11, %v6045_v24 }
  0xfd   : > { %4964 = vmatpush1.bf16.xpose.msk.msra.mxu1 %vm4963_vm14, %v5789_v41  ;;  %vm1065_vm14 = vcmp.eq.s32.totalorder %v815_v50, %v5998_v15  ;;  %vm4971_vm6 = vmpackc.low %vm1188_vm3, %vm1184_vm2  ;;  %vm1072_vm3 = vcmp.eq.s32.totalorder %v811_v53, %v6068_v35  ;;  %v454_v13 = vfloor.f32 %v453_v10  ;;  %v6297_v31 = vrot.slane %v675_v26, %v6005_v29 }
  0xfe   : > { %4966 = vmatprep.subr.msk.bf16.mxu1 %vm4965_vm1, %v5789_v41  ;;  %vm4829_vm1 = vmpackc.low %vm1069_vm15, %vm1065_vm14  ;;  %vm1192_vm14 = vcmp.eq.s32.totalorder %v939_v54, %v5998_v15  ;;  %vm1196_vm15 = vcmp.eq.s32.totalorder %v939_v54, %v6059_v30  ;;  %v6264_v19 = vrot.slane %v742_v14, %v6005_v29  ;;  %v743_v33 = vcombine.high %v6237_v7, %v6240_v9 }
  0xff   : > { %vm4831_vm12 = vmpackc.low %vm1068_vm8, %vm1064_vm7  ;;  %vm1085_vm7 = vcmp.eq.s32.totalorder %v831_v56, %v6059_v30  ;;  %v455_v16 = vmax.f32 %v454_v13, 0.0  ;;  %v863_v34 = vrot.slane %v6297_v31, %v6042_v23  ;;  %v859_v39 = vrot.slane %v6297_v31, %v6045_v24 }
 0x100   : > { %4824 = vmatpush1.bf16.xpose.msk.msra.mxu0 %vm4823_vm4, %v5789_v41  ;;  %vm1193_vm4 = vcmp.eq.s32.totalorder %v943_v52, %v5998_v15  ;;  %vm4975_vm2 = vmpackc.low %vm1196_vm15, %vm1192_vm14  ;;  %vm1080_vm15 = vcmp.eq.s32.totalorder %v827_v3, %v5998_v15  ;;  %v975_v22 = vrot.slane %v6264_v19, %v6042_v23  ;;  %v971_v32 = vrot.slane %v6264_v19, %v6045_v24 }
 0x101   : > { %4826 = vmatprep.subr.msk.bf16.mxu0 %vm4825_vm5, %v5789_v41  ;;  %vm1197_vm5 = vcmp.eq.s32.totalorder %v943_v52, %v6059_v30  ;;  %v456_v18 = vmin.f32 %v455_v16, 29.0  ;;  %v6323_v38 = vrot.slane %v743_v33, %v6005_v29  ;;  %v6353_v43 = vcombine.high %v6245_v11, %v6245_v11 }
 0x102   : > { %vm4973_vm9 = vmpackc.low %vm1197_vm5, %vm1193_vm4  ;;  %vm1076_vm4 = vcmp.eq.s32.totalorder %v811_v53, %v6071_v36  ;;  %v6366_v46 = vcombine.high %v6264_v19, %v6264_v19  ;;  %v6432_v58 = vsub.s32 3, %v5998_v15  ;;  %v6444_v62 = vsub.s32 2, %v5998_v15 }
 0x103   : > { %vm4835_vm8 = vmpackc.low %vm1076_vm4, %vm1072_vm3  ;;  %vm1093_vm3 = vcmp.eq.s32.totalorder %v831_v56, %v6071_v36  ;;  %v5317_v20 = vtrunc.f32 %v456_v18  ;;  %v991_v29 = vrot.slane %v6323_v38, %v6042_v23  ;;  %v987_v42 = vrot.slane %v6323_v38, %v6045_v24 }
 0x104   : > { %v879_v45 = vrot.slane %v6353_v43, %v6042_v23  ;;  %v1007_v47 = vrot.slane %v6366_v46, %v6042_v23  ;;  %v875_v48 = vrot.slane %v6353_v43, %v6045_v24  ;;  %v791_v59 = vrot.slane %v6056_v28, %v6432_v58 }
 0x105   : > { %4968 = vmatpush1.bf16.xpose.msk.msra.mxu1 %vm4967_vm10, %v5789_v41  ;;  %vm1073_vm10 = vcmp.eq.s32.totalorder %v815_v50, %v6068_v35  ;;  %v6273_v21 = vcvt.f32.s32 %v5317_v20  ;;  %v1003_v50 = vrot.slane %v6366_v46, %v6045_v24  ;;  %v919_v63 = vrot.slane %v6081_v40, %v6432_v58 }
 0x106   : > { %4970 = vmatprep.subr.msk.bf16.mxu1 %vm4969_vm13, %v5789_v41  ;;  %vm4833_vm13 = vmpackc.low %vm1077_vm11, %vm1073_vm10  ;;  %vm1200_vm10 = vcmp.eq.s32.totalorder %v939_v54, %v6068_v35  ;;  %vm1204_vm11 = vcmp.eq.s32.totalorder %v939_v54, %v6071_v36  ;;  %v6406_v54 = vcombine.high %v6323_v38, %v6323_v38  ;;  %v6460_v2 = vrot.slane %v6056_v28, %v6444_v62 }
 0x107   : > { %vm4979_vm14 = vmpackc.low %vm1204_vm11, %vm1200_vm10  ;;  %vm1088_vm11 = vcmp.eq.s32.totalorder %v827_v3, %v6068_v35  ;;  %v6288_v27 = vrot.slane %v6273_v21, %v6042_v23  ;;  %v6474_v28 = vrot.slane %v6081_v40, %v6444_v62  ;;  %v6507_v4 = vrot.slane %v6273_v21, %v6444_v62 }
 0x108   : > { %4828 = vmatpush1.bf16.xpose.msk.msra.mxu0 %vm4827_vm0, %v5789_v41  ;;  %vm1201_vm0 = vcmp.eq.s32.totalorder %v943_v52, %v6068_v35  ;;  %v1023_v60 = vrot.slane %v6406_v54, %v6042_v23  ;;  %v6548_v9 = vrot.slane %v6074_v37, %v6432_v58  ;;  %v5790_v16 = vmov 0.0  }
 0x109   : > { %4830 = vmatprep.subr.msk.bf16.mxu0 %vm4829_vm1, %v5789_v41  ;;  %vm1205_vm1 = vcmp.eq.s32.totalorder %v943_v52, %v6071_v36  ;;  %v6393_v52 = vcombine.high %v6297_v31, %v6297_v31  ;;  %v6632_v20 = vrot.slane %v6092_v44, %v6432_v58 }
 0x10a   : > { %vm4977_vm5 = vmpackc.low %vm1205_vm1, %vm1201_vm0  ;;  %vm1084_vm0 = vcmp.eq.s32.totalorder %v827_v3, %v6059_v30 }
 0x10b   : > { %vm4839_vm4 = vmpackc.low %vm1084_vm0, %vm1080_vm15  ;;  %vm1101_vm15 = vcmp.eq.s32.totalorder %v847_v17, %v6059_v30  ;;  %v895_v53 = vrot.slane %v6393_v52, %v6042_v23  ;;  %v891_v61 = vrot.slane %v6393_v52, %v6045_v24 }
 0x10d   : > { %4972 = vmatpush1.bf16.xpose.msk.msra.mxu1 %vm4971_vm6, %v5789_v41  ;;  %vm1081_vm6 = vcmp.eq.s32.totalorder %v831_v56, %v5998_v15 }
 0x10e   : > { %4974 = vmatprep.subr.msk.bf16.mxu1 %vm4973_vm9, %v5789_v41  ;;  %vm4837_vm9 = vmpackc.low %vm1085_vm7, %vm1081_vm6  ;;  %vm1208_vm6 = vcmp.eq.s32.totalorder %v955_v12, %v5998_v15  ;;  %vm1212_vm7 = vcmp.eq.s32.totalorder %v955_v12, %v6059_v30 }
 0x10f   : > { %vm4983_vm10 = vmpackc.low %vm1212_vm7, %vm1208_vm6  ;;  %vm1096_vm6 = vcmp.eq.s32.totalorder %v843_v25, %v5998_v15  ;;  %vm1100_vm7 = vcmp.eq.s32.totalorder %v843_v25, %v6059_v30 }
 0x110   : > { %4832 = vmatpush1.bf16.xpose.msk.msra.mxu0 %vm4831_vm12, %v5789_v41  ;;  %vm1209_vm12 = vcmp.eq.s32.totalorder %v959_v0, %v5998_v15 }
 0x111   : > { %4834 = vmatprep.subr.msk.bf16.mxu0 %vm4833_vm13, %v5789_v41  ;;  %vm1213_vm13 = vcmp.eq.s32.totalorder %v959_v0, %v6059_v30 }
 0x112   : > { %vm4981_vm1 = vmpackc.low %vm1213_vm13, %vm1209_vm12  ;;  %vm1092_vm12 = vcmp.eq.s32.totalorder %v827_v3, %v6071_v36  ;;  %v6503_v3 = vrot.slane %v6273_v21, %v6432_v58 }
 0x113   : > { %vm4843_vm0 = vmpackc.low %vm1092_vm12, %vm1088_vm11  ;;  %vm8624_vm12 = vcmp.eq.s32.totalorder %v6288_v27, %v5998_v15 }
 0x115   : > { %4976 = vmatpush1.bf16.xpose.msk.msra.mxu1 %vm4975_vm2, %v5789_v41  ;;  %vm1089_vm2 = vcmp.eq.s32.totalorder %v831_v56, %v6068_v35  ;;  %v1019_v56 = vrot.slane %v6406_v54, %v6045_v24 }
 0x116   : > { %4978 = vmatprep.subr.msk.bf16.mxu1 %vm4977_vm5, %v5789_v41  ;;  %vm4841_vm5 = vmpackc.low %vm1093_vm3, %vm1089_vm2  ;;  %vm1216_vm2 = vcmp.eq.s32.totalorder %v955_v12, %v6068_v35  ;;  %vm1220_vm3 = vcmp.eq.s32.totalorder %v955_v12, %v6071_v36 }
 0x118   : > { %4836 = vmatpush1.bf16.xpose.msk.msra.mxu0 %vm4835_vm8, %v5789_v41  ;;  %vm1217_vm8 = vcmp.eq.s32.totalorder %v959_v0, %v6068_v35 }
 0x119   : > { %4838 = vmatprep.subr.msk.bf16.mxu0 %vm4837_vm9, %v5789_v41  ;;  %vm1221_vm9 = vcmp.eq.s32.totalorder %v959_v0, %v6071_v36  ;;  %v6455_v0 = vrot.slane %v6273_v21, %v6045_v24  ;;  %v8739_v21 = vmov 0 }
 0x11a   : > { %vm4985_vm13 = vmpackc.low %vm1221_vm9, %vm1217_vm8  ;;  %vm1105_vm9 = vcmp.eq.s32.totalorder %v847_v17, %v6068_v35 }
 0x11b   : > { %vm4987_vm8 = vmpackc.low %vm1220_vm3, %vm1216_vm2  ;;  %vm1228_vm2 = vcmp.eq.s32.totalorder %v971_v32, %v6059_v30  ;;  %vm1233_vm3 = vcmp.eq.s32.totalorder %v975_v22, %v6068_v35 }
 0x11d   : > { %4980 = vmatpush1.bf16.xpose.msk.msra.mxu1 %vm4979_vm14, %v5789_v41  ;;  %vm1097_vm14 = vcmp.eq.s32.totalorder %v847_v17, %v5998_v15 }
 0x11e   : > { %4982 = vmatprep.subr.msk.bf16.mxu1 %vm4981_vm1, %v5789_v41  ;;  %vm4845_vm1 = vmpackc.low %vm1101_vm15, %vm1097_vm14 }
 0x11f   : > { %vm4847_vm14 = vmpackc.low %vm1100_vm7, %vm1096_vm6  ;;  %vm1104_vm6 = vcmp.eq.s32.totalorder %v843_v25, %v6068_v35  ;;  %vm1108_vm7 = vcmp.eq.s32.totalorder %v843_v25, %v6071_v36 }
 0x120   : > { %4840 = vmatpush1.bf16.xpose.msk.msra.mxu0 %vm4839_vm4, %v5789_v41  ;;  %vm1225_vm4 = vcmp.eq.s32.totalorder %v975_v22, %v5998_v15 }
 0x121   : > { %4842 = vmatprep.subr.msk.bf16.mxu0 %vm4841_vm5, %v5789_v41  ;;  %vm1229_vm5 = vcmp.eq.s32.totalorder %v975_v22, %v6059_v30 }
 0x122   : > { %vm4989_vm11 = vmpackc.low %vm1229_vm5, %vm1225_vm4  ;;  %vm1237_vm4 = vcmp.eq.s32.totalorder %v975_v22, %v6071_v36  ;;  %v6652_v22 = vrot.slane %v6074_v37, %v6444_v62  ;;  %v6674_v37 = vrot.slane %v6092_v44, %v6444_v62  ;;  %v393_v44 = vld [vmem:[%s357_s17] sm:$0xf] }
 0x125   : > { %4984 = vmatpush1.bf16.xpose.msk.msra.mxu1 %vm4983_vm10, %v5789_v41  ;;  %vm1109_vm10 = vcmp.eq.s32.totalorder %v847_v17, %v6071_v36 }
 0x126   : > { %4986 = vmatprep.subr.msk.bf16.mxu1 %vm4985_vm13, %v5789_v41  ;;  %vm8622_vm13 = vcmp.eq.s32.totalorder %v6288_v27, %v6059_v30  ;;  %vm4849_vm15 = vmpackc.low %vm1109_vm10, %vm1105_vm9  ;;  %vm1113_vm9 = vcmp.eq.s32.totalorder %v863_v34, %v5998_v15  ;;  %vm1117_vm10 = vcmp.eq.s32.totalorder %v863_v34, %v6059_v30 }
 0x128   : > { %4844 = vmatpush1.bf16.xpose.msk.msra.mxu0 %vm4843_vm0, %v5789_v41  ;;  %vm4877_vm0 = vmpackc.low %vm8622_vm13, %vm8624_vm12  ;;  %vm1171_vm13 = vcmp.eq.s32.totalorder %v919_v63, %v6068_v35 }
 0x129   : > { %4846 = vmatprep.subr.msk.bf16.mxu0 %vm4845_vm1, %v5789_v41  ;;  %vm1224_vm1 = vcmp.eq.s32.totalorder %v971_v32, %v5998_v15  ;;  %4878 = vmatprep.mubr.msk.bf16.mxu0 %vm4877_vm0, %v5789_v41 }
 0x12a   : > { %5022 = vmatprep.mubr.msk.bf16.mxu1 %vm4877_vm0, %v5789_v41  ;;  %vm4991_vm5 = vmpackc.low %vm1228_vm2, %vm1224_vm1  ;;  %vm1236_vm0 = vcmp.eq.s32.totalorder %v971_v32, %v6071_v36  ;;  %vm1241_vm1 = vcmp.eq.s32.totalorder %v991_v29, %v5998_v15  ;;  %vm1245_vm2 = vcmp.eq.s32.totalorder %v991_v29, %v6059_v30 }
 0x12d   : > { %4988 = vmatpush1.bf16.xpose.msk.msra.mxu1 %vm4987_vm8, %v5789_v41  ;;  %vm4993_vm8 = vmpackc.low %vm1237_vm4, %vm1233_vm3  ;;  %vm1112_vm4 = vcmp.eq.s32.totalorder %v859_v39, %v5998_v15 }
 0x12e   : > { %4990 = vmatprep.subr.msk.bf16.mxu1 %vm4989_vm11, %v5789_v41  ;;  %vm4851_vm11 = vmpackc.low %vm1108_vm7, %vm1104_vm6  ;;  %vm1121_vm7 = vcmp.eq.s32.totalorder %v863_v34, %v6068_v35 }
 0x12f   : > { %vm4997_vm6 = vmpackc.low %vm1245_vm2, %vm1241_vm1  ;;  %vm1120_vm2 = vcmp.eq.s32.totalorder %v859_v39, %v6068_v35 }
 0x130   : > { %4848 = vmatpush1.bf16.xpose.msk.msra.mxu0 %vm4847_vm14, %v5789_v41  ;;  %vm4853_vm14 = vmpackc.low %vm1117_vm10, %vm1113_vm9 }
 0x131   : > { %4850 = vmatprep.subr.msk.bf16.mxu0 %vm4849_vm15, %v5789_v41  ;;  %vm1232_vm15 = vcmp.eq.s32.totalorder %v971_v32, %v6068_v35 }
 0x132   : > { %vm4995_vm3 = vmpackc.low %vm1236_vm0, %vm1232_vm15  ;;  %vm1249_vm15 = vcmp.eq.s32.totalorder %v991_v29, %v6068_v35  ;;  %vm1253_vm0 = vcmp.eq.s32.totalorder %v991_v29, %v6071_v36  ;;  %v404_v29 = vsub.f32 %v393_v44, %v6223_v1 }
 0x135   : > { %4992 = vmatpush1.bf16.xpose.msk.msra.mxu1 %vm4991_vm5, %v5789_v41  ;;  %vm1116_vm5 = vcmp.eq.s32.totalorder %v859_v39, %v6059_v30 }
 0x136   : > { %4994 = vmatprep.subr.msk.bf16.mxu1 %vm4993_vm8, %v5789_v41  ;;  %vm1125_vm8 = vcmp.eq.s32.totalorder %v863_v34, %v6071_v36  ;;  %vm4855_vm9 = vmpackc.low %vm1116_vm5, %vm1112_vm4  ;;  %vm1129_vm5 = vcmp.eq.s32.totalorder %v879_v45, %v5998_v15 }
 0x137   : > { %vm4857_vm10 = vmpackc.low %vm1125_vm8, %vm1121_vm7 }
 0x138   : > { %4852 = vmatpush1.bf16.xpose.msk.msra.mxu0 %vm4851_vm11, %v5789_v41  ;;  %vm1240_vm11 = vcmp.eq.s32.totalorder %v987_v42, %v5998_v15  ;;  %vm5001_vm4 = vmpackc.low %vm1253_vm0, %vm1249_vm15  ;;  %vm1128_vm0 = vcmp.eq.s32.totalorder %v875_v48, %v5998_v15 }
 0x139   : > { %4854 = vmatprep.subr.msk.bf16.mxu0 %vm4853_vm14, %v5789_v41  ;;  %vm1244_vm14 = vcmp.eq.s32.totalorder %v987_v42, %v6059_v30 }
 0x13a   : > { %vm4999_vm1 = vmpackc.low %vm1244_vm14, %vm1240_vm11  ;;  %vm1257_vm11 = vcmp.eq.s32.totalorder %v1007_v47, %v5998_v15  ;;  %vm1261_vm14 = vcmp.eq.s32.totalorder %v1007_v47, %v6059_v30 }
 0x13d   : > { %4996 = vmatpush1.bf16.xpose.msk.msra.mxu1 %vm4995_vm3, %v5789_v41  ;;  %vm1124_vm3 = vcmp.eq.s32.totalorder %v859_v39, %v6071_v36 }
 0x13e   : > { %4998 = vmatprep.subr.msk.bf16.mxu1 %vm4997_vm6, %v5789_v41  ;;  %vm1133_vm6 = vcmp.eq.s32.totalorder %v879_v45, %v6059_v30  ;;  %vm4859_vm7 = vmpackc.low %vm1124_vm3, %vm1120_vm2  ;;  %vm1137_vm3 = vcmp.eq.s32.totalorder %v879_v45, %v6068_v35 }
 0x13f   : > { %vm4861_vm8 = vmpackc.low %vm1133_vm6, %vm1129_vm5 }
 0x140   : > { %4856 = vmatpush1.bf16.xpose.msk.msra.mxu0 %vm4855_vm9, %v5789_v41  ;;  %vm1248_vm9 = vcmp.eq.s32.totalorder %v987_v42, %v6068_v35  ;;  %vm5005_vm2 = vmpackc.low %vm1261_vm14, %vm1257_vm11  ;;  %vm1136_vm14 = vcmp.eq.s32.totalorder %v875_v48, %v6068_v35 }
 0x141   : > { %4858 = vmatprep.subr.msk.bf16.mxu0 %vm4857_vm10, %v5789_v41  ;;  %vm1252_vm10 = vcmp.eq.s32.totalorder %v987_v42, %v6071_v36 }
 0x142   : > { %vm5003_vm15 = vmpackc.low %vm1252_vm10, %vm1248_vm9  ;;  %vm1265_vm9 = vcmp.eq.s32.totalorder %v1007_v47, %v6068_v35  ;;  %vm1269_vm10 = vcmp.eq.s32.totalorder %v1007_v47, %v6071_v36 }
 0x145   : > { %5000 = vmatpush1.bf16.xpose.msk.msra.mxu1 %vm4999_vm1, %v5789_v41  ;;  %vm1132_vm1 = vcmp.eq.s32.totalorder %v875_v48, %v6059_v30 }
 0x146   : > { %5002 = vmatprep.subr.msk.bf16.mxu1 %vm5001_vm4, %v5789_v41  ;;  %vm1141_vm4 = vcmp.eq.s32.totalorder %v879_v45, %v6071_v36  ;;  %vm4863_vm5 = vmpackc.low %vm1132_vm1, %vm1128_vm0  ;;  %vm1145_vm1 = vcmp.eq.s32.totalorder %v895_v53, %v5998_v15 }
 0x147   : > { %vm4865_vm6 = vmpackc.low %vm1141_vm4, %vm1137_vm3 }
 0x148   : > { %4860 = vmatpush1.bf16.xpose.msk.msra.mxu0 %vm4859_vm7, %v5789_v41  ;;  %vm1256_vm7 = vcmp.eq.s32.totalorder %v1003_v50, %v5998_v15  ;;  %vm5009_vm0 = vmpackc.low %vm1269_vm10, %vm1265_vm9  ;;  %vm1144_vm10 = vcmp.eq.s32.totalorder %v891_v61, %v5998_v15 }
 0x149   : > { %4862 = vmatprep.subr.msk.bf16.mxu0 %vm4861_vm8, %v5789_v41  ;;  %vm1260_vm8 = vcmp.eq.s32.totalorder %v1003_v50, %v6059_v30 }
 0x14a   : > { %vm5007_vm11 = vmpackc.low %vm1260_vm8, %vm1256_vm7  ;;  %vm1273_vm7 = vcmp.eq.s32.totalorder %v1023_v60, %v5998_v15  ;;  %vm1277_vm8 = vcmp.eq.s32.totalorder %v1023_v60, %v6059_v30 }
 0x14d   : > { %5004 = vmatpush1.bf16.xpose.msk.msra.mxu1 %vm5003_vm15, %v5789_v41  ;;  %vm1140_vm15 = vcmp.eq.s32.totalorder %v875_v48, %v6071_v36  ;;  %v405_v48 = vand.u32 2147483647, %v404_v29  ;;  %v851_v29 = vrot.slane %v6245_v11, %v6444_v62 }
 0x14e   : > { %5006 = vmatprep.subr.msk.bf16.mxu1 %vm5005_vm2, %v5789_v41  ;;  %vm1149_vm2 = vcmp.eq.s32.totalorder %v895_v53, %v6059_v30  ;;  %vm4867_vm3 = vmpackc.low %vm1140_vm15, %vm1136_vm14  ;;  %vm1153_vm15 = vcmp.eq.s32.totalorder %v895_v53, %v6068_v35 }
 0x14f   : > { %vm4869_vm4 = vmpackc.low %vm1149_vm2, %vm1145_vm1 }
 0x150   : > { %4864 = vmatpush1.bf16.xpose.msk.msra.mxu0 %vm4863_vm5, %v5789_v41  ;;  %vm1264_vm5 = vcmp.eq.s32.totalorder %v1003_v50, %v6068_v35  ;;  %vm5013_vm14 = vmpackc.low %vm1277_vm8, %vm1273_vm7  ;;  %vm1152_vm8 = vcmp.eq.s32.totalorder %v891_v61, %v6068_v35 }
 0x151   : > { %4866 = vmatprep.subr.msk.bf16.mxu0 %vm4865_vm6, %v5789_v41  ;;  %vm1268_vm6 = vcmp.eq.s32.totalorder %v1003_v50, %v6071_v36 }
 0x152   : > { %vm5011_vm9 = vmpackc.low %vm1268_vm6, %vm1264_vm5  ;;  %vm1281_vm5 = vcmp.eq.s32.totalorder %v1023_v60, %v6068_v35  ;;  %vm1285_vm6 = vcmp.eq.s32.totalorder %v1023_v60, %v6071_v36  ;;  %v823_v60 = vrot.slane %v6129_v49, %v6432_v58 }
 0x155   : > { %5008 = vmatpush1.bf16.xpose.msk.msra.mxu1 %vm5007_vm11, %v5789_v41  ;;  %vm1148_vm11 = vcmp.eq.s32.totalorder %v891_v61, %v6059_v30 }
 0x156   : > { %5010 = vmatprep.subr.msk.bf16.mxu1 %vm5009_vm0, %v5789_v41  ;;  %vm1157_vm0 = vcmp.eq.s32.totalorder %v895_v53, %v6071_v36  ;;  %vm4871_vm1 = vmpackc.low %vm1148_vm11, %vm1144_vm10  ;;  %vm1035_vm11 = vcmp.eq.s32.totalorder %v791_v59, %v5998_v15 }
 0x157   : > { %vm4873_vm2 = vmpackc.low %vm1157_vm0, %vm1153_vm15  ;;  %vm1280_vm0 = vcmp.eq.s32.totalorder %v1019_v56, %v6068_v35 }
 0x158   : > { %4868 = vmatpush1.bf16.xpose.msk.msra.mxu0 %vm4867_vm3, %v5789_v41  ;;  %vm1272_vm3 = vcmp.eq.s32.totalorder %v1019_v56, %v5998_v15  ;;  %vm5017_vm10 = vmpackc.low %vm1285_vm6, %vm1281_vm5  ;;  %vm479_vm5 = vcmp.eq.s32.totalorder %v6455_v0, %v5998_v15  ;;  %vm8623_vm6 = vcmp.eq.s32.totalorder %v6455_v0, %v6059_v30 }
 0x159   : > { %4870 = vmatprep.subr.msk.bf16.mxu0 %vm4869_vm4, %v5789_v41  ;;  %vm1276_vm4 = vcmp.eq.s32.totalorder %v1019_v56, %v6059_v30  ;;  %v4541_v17 = vsel %vm479_vm5, 1.0, %v5790_v16 }
 0x15a   : > { %vm5015_vm7 = vmpackc.low %vm1276_vm4, %vm1272_vm3  ;;  %vm1163_vm3 = vcmp.eq.s32.totalorder %v919_v63, %v5998_v15  ;;  %vm1167_vm4 = vcmp.eq.s32.totalorder %v919_v63, %v6059_v30 }
 0x15d   : > { %5012 = vmatpush1.bf16.xpose.msk.msra.mxu1 %vm5011_vm9, %v5789_v41  ;;  %vm1156_vm9 = vcmp.eq.s32.totalorder %v891_v61, %v6071_v36 }
 0x15e   : > { %5014 = vmatprep.subr.msk.bf16.mxu1 %vm5013_vm14, %v5789_v41  ;;  %vm1039_vm14 = vcmp.eq.s32.totalorder %v791_v59, %v6059_v30  ;;  %vm4875_vm15 = vmpackc.low %vm1156_vm9, %vm1152_vm8  ;;  %vm1034_vm8 = vcmp.eq.s32.totalorder %v6460_v2, %v5998_v15  ;;  %vm1038_vm9 = vcmp.eq.s32.totalorder %v6460_v2, %v6059_v30 }
 0x160   : > { %4872 = vmatpush1.bf16.xpose.msk.msra.mxu0 %vm4871_vm1, %v5789_v41  ;;  %vm1284_vm1 = vcmp.eq.s32.totalorder %v1019_v56, %v6071_v36  ;;  %v410_v56 = vrot.slane %v405_v48, %v6045_v24 }
 0x161   : > { %4874 = vmatprep.subr.msk.bf16.mxu0 %vm4873_vm2, %v5789_v41  ;;  %vm4885_vm2 = vmpackc.low %vm1039_vm14, %vm1035_vm11  ;;  %vm8625_vm11 = vcmp.eq.s32.totalorder %v6288_v27, %v6068_v35  ;;  %vm8632_vm14 = vcmp.eq.s32.totalorder %v6288_v27, %v6071_v36 }
 0x165   : > { %5016 = vmatpush1.bf16.xpose.msk.msra.mxu1 %vm5015_vm7, %v5789_v41  ;;  %vm5019_vm7 = vmpackc.low %vm1284_vm1, %vm1280_vm0  ;;  %vm1043_vm0 = vcmp.eq.s32.totalorder %v791_v59, %v6068_v35  ;;  %vm1047_vm1 = vcmp.eq.s32.totalorder %v791_v59, %v6071_v36  ;;  %v414_v59 = vrot.slane %v405_v48, %v6042_v23 }
 0x166   : > { %5018 = vmatprep.subr.msk.bf16.mxu1 %vm5017_vm10, %v5789_v41  ;;  %vm5029_vm10 = vmpackc.low %vm1167_vm4, %vm1163_vm3  ;;  %vm1162_vm3 = vcmp.eq.s32.totalorder %v6474_v28, %v5998_v15  ;;  %vm1166_vm4 = vcmp.eq.s32.totalorder %v6474_v28, %v6059_v30 }
 0x167   : > { %vm6530_vm12 = vmpackc.low %vm1166_vm4, %vm1162_vm3  ;;  %vm8630_vm3 = vcmp.eq.s32.totalorder %v6503_v3, %v6059_v30  ;;  %vm1042_vm4 = vcmp.eq.s32.totalorder %v6460_v2, %v6068_v35 }
 0x168   : > { %4876 = vmatpush1.bf16.xpose.msk.msra.mxu0 %vm4875_vm15, %v5789_v41  ;;  %vm6490_vm15 = vmpackc.low %vm8623_vm6, %vm479_vm5  ;;  %vm8629_vm6 = vcmp.eq.s32.totalorder %v6455_v0, %v6071_v36 }
 0x169   : > { %4886 = vmatprep.subr.msk.bf16.mxu0 %vm4885_vm2, %v5789_v41  ;;  %vm4887_vm2 = vmpackc.low %vm1038_vm9, %vm1034_vm8 }
 0x16a   : > { %vm6518_vm8 = vmpackc.low %vm8632_vm14, %vm8625_vm11  ;;  %vm8628_vm11 = vcmp.eq.s32.totalorder %v6507_v4, %v5998_v15 }
 0x16b   : > { %vm4889_vm9 = vmpackc.low %vm1047_vm1, %vm1043_vm0  ;;  %vm8627_vm0 = vcmp.eq.s32.totalorder %v6507_v4, %v6059_v30 }
 0x16d   : > { %5020 = vmatpush1.bf16.xpose.msk.msra.mxu1 %vm5019_vm7, %v5789_v41  ;;  %vm1175_vm7 = vcmp.eq.s32.totalorder %v919_v63, %v6071_v36  ;;  %v418_v63 = vrot.slane %v405_v48, %v6444_v62 }
 0x16e   : > { %5030 = vmatprep.subr.msk.bf16.mxu1 %vm5029_vm10, %v5789_v41  ;;  %vm8626_vm10 = vcmp.eq.s32.totalorder %v6455_v0, %v6068_v35  ;;  %vm6542_vm1 = vmpackc.low %vm1175_vm7, %vm1171_vm13  ;;  %vm1046_vm7 = vcmp.eq.s32.totalorder %v6460_v2, %v6071_v36  ;;  %v422_v2 = vrot.slane %v405_v48, %v6432_v58  ;;  %v899_v48 = vrot.slane %v6393_v52, %v6444_v62 }
 0x16f   : > { %4880 = vmatmul.mubr.msk.bf16.vlgmr.msra.gmra.mrb[0].mxu0 %vm6490_vm15, %v5789_v41  ;;  %vm6560_vm13 = vmpackc.low %vm8629_vm6, %vm8626_vm10  ;;  %vm8634_vm6 = vcmp.eq.s32.totalorder %v6507_v4, %v6068_v35 }
 0x170   : > { %4888 = vmatpush1.bf16.xpose.msk.msra.mxu0 %vm4887_vm2, %v5789_v41  ;;  %4882 = vmatprep.mubr.msk.bf16.mxu0 %vm6518_vm8, %v5789_v41  ;;  %vm8631_vm2 = vcmp.eq.s32.totalorder %v6503_v3, %v5998_v15 }
 0x171   : > { %4890 = vmatprep.subr.msk.bf16.mxu0 %vm4889_vm9, %v5789_v41  ;;  %vm6574_vm9 = vmpackc.low %vm8627_vm0, %vm8628_vm11  ;;  %vm8633_vm0 = vcmp.eq.s32.totalorder %v6503_v3, %v6068_v35  ;;  %vm8635_vm11 = vcmp.eq.s32.totalorder %v6503_v3, %v6071_v36 }
 0x172   : > { %vm6587_vm10 = vmpackc.low %vm8630_vm3, %vm8631_vm2  ;;  %vm1051_vm3 = vcmp.eq.s32.totalorder %v6548_v9, %v5998_v15  ;;  %vm1055_vm2 = vcmp.eq.s32.totalorder %v6548_v9, %v6059_v30 }
 0x173   : > { %vm6615_vm14 = vmpackc.low %vm8635_vm11, %vm8633_vm0  ;;  %vm8741_vm0 = vcmp.eq.s32.totalorder %v6288_v27, %v6071_v36  ;;  %vm1054_vm11 = vcmp.eq.s32.totalorder %v6652_v22, %v6059_v30 }
 0x174   : > { %5024 = vmatmul.mubr.msk.bf16.vlgmr.msra.gmra.mrb[0].mxu1 %vm6490_vm15, %v5789_v41  ;;  %vm493_vm15 = vcmp.eq.s32.totalorder %v6507_v4, %v6071_v36  ;;  %v4554_v26 = vsel %vm8741_vm0, 1.0, %v5790_v16  ;;  %vm8744_vm0 = vcmp.eq.s32.totalorder %v6503_v3, %v5998_v15 }
 0x175   : > { %5032 = vmatpush1.bf16.xpose.msk.msra.mxu1 %vm6530_vm12, %v5789_v41  ;;  %5026 = vmatprep.mubr.msk.bf16.mxu1 %vm6518_vm8, %v5789_v41  ;;  %vm8738_vm12 = vcmp.eq.s32.totalorder %v6288_v27, %v5998_v15  ;;  %vm6640_vm5 = vmpackc.low %vm493_vm15, %vm8634_vm6  ;;  %vm8742_vm6 = vcmp.eq.s32.totalorder %v6455_v0, %v6071_v36  ;;  %v4544_v34 = vsel %vm8744_vm0, 1.0, %v5790_v16  ;;  %v4555_v45 = vsel %vm493_vm15, 1.0, %v5790_v16 }
 0x176   : > { %v4542_v18 = vsel %vm8738_vm12, 1.0, %v5790_v16  ;;  %5034 = vmatprep.subr.msk.bf16.mxu1 %vm6542_vm1, %v5789_v41  ;;  %v8740_v21 = vsel %vm6640_vm5, 4294967295, %v8739_v21  ;;  %vm4891_vm8 = vmpackc.low %vm1046_vm7, %vm1042_vm4  ;;  %vm1170_vm4 = vcmp.eq.s32.totalorder %v6474_v28, %v6068_v35  ;;  %vm1174_vm7 = vcmp.eq.s32.totalorder %v6474_v28, %v6071_v36 }
 0x177   : > { %4884 = vmatmul.mubr.msk.bf16.gmra.mrb[4].mxu0 %vm6560_vm13, %v5789_v41  ;;  %vm4893_vm1 = vmpackc.low %vm1055_vm2, %vm1051_vm3  ;;  %v539_v25 = vadd.f32 %v4542_v18, %v4541_v17  ;;  %vm1179_vm12 = vcmp.eq.s32.totalorder %v6632_v20, %v5998_v15  ;;  %vm1183_vm2 = vcmp.eq.s32.totalorder %v6632_v20, %v6059_v30  ;;  %v4553_v32 = vsel %vm8742_vm6, 1.0, %v5790_v16 }
 0x178   : > { %4892 = vmatpush1.bf16.xpose.msk.msra.mxu0 %vm4891_vm8, %v5789_v41  ;;  %4950 = vmatprep.mubr.msk.bf16.mxu0 %vm6587_vm10, %v5789_v41  ;;  %vm5035_vm3 = vmpackc.low %vm1174_vm7, %vm1170_vm4  ;;  %vm1187_vm8 = vcmp.eq.s32.totalorder %v6632_v20, %v6068_v35  ;;  %vm8743_vm6 = vcmp.eq.s32.totalorder %v6507_v4, %v5998_v15  ;;  %vm1191_vm4 = vcmp.eq.s32.totalorder %v6632_v20, %v6071_v36 }
 0x179   : > { %4894 = vmatprep.subr.msk.bf16.mxu0 %vm4893_vm1, %v5789_v41  ;;  %vm1063_vm1 = vcmp.eq.s32.totalorder %v6548_v9, %v6071_v36  ;;  %v4543_v33 = vsel %vm8743_vm6, 1.0, %v5790_v16  ;;  %vm8745_vm7 = vcmp.eq.s32.totalorder %v6455_v0, %v6059_v30  ;;  %v554_v47 = vadd.f32 %v4554_v26, %v4553_v32 }
 0x17a   : > { %v540_v39 = vadd.f32 %v4543_v33, %v539_v25  ;;  %v4545_v42 = vsel %vm8745_vm7, 1.0, %v5790_v16  ;;  %vm8748_vm6 = vcmp.eq.s32.totalorder %v6503_v3, %v6071_v36  ;;  %vm8749_vm15 = vcmp.eq.s32.totalorder %v6548_v9, %v6068_v35 }
 0x17b   : > { %v4556_v53 = vsel %vm8748_vm6, 1.0, %v5790_v16  ;;  %vm4897_vm0 = vmpackc.low %vm1063_vm1, %vm8749_vm15  ;;  %v555_v61 = vadd.f32 %v4555_v45, %v554_v47  ;;  %vm8750_vm1 = vcmp.eq.s32.totalorder %v6288_v27, %v6068_v35  ;;  %vm8751_vm7 = vcmp.eq.s32.totalorder %v6455_v0, %v6068_v35 }
 0x17c   : > { %5028 = vmatmul.mubr.msk.bf16.gmra.mrb[4].mxu1 %vm6560_vm13, %v5789_v41  ;;  %vm5037_vm13 = vmpackc.low %vm1183_vm2, %vm1179_vm12  ;;  %vm1178_vm12 = vcmp.eq.s32.totalorder %v6674_v37, %v5998_v15  ;;  %vm8747_vm2 = vcmp.eq.s32.totalorder %v6652_v22, %v5998_v15  ;;  %v541_v50 = vadd.f32 %v4544_v34, %v540_v39  ;;  %v4550_v40 = vsel %vm8750_vm1, 1.0, %v5790_v16 }
 0x17d   : > { %5036 = vmatpush1.bf16.xpose.msk.msra.mxu1 %vm5035_vm3, %v5789_v41  ;;  %5094 = vmatprep.mubr.msk.bf16.mxu1 %vm6587_vm10, %v5789_v41  ;;  %vm8746_vm10 = vcmp.eq.s32.totalorder %v6288_v27, %v6059_v30  ;;  %vm4895_vm3 = vmpackc.low %vm1054_vm11, %vm8747_vm2  ;;  %vm427_vm11 = vcmask 1040384   ;;  %v4549_v5 = vsel %vm8751_vm7, 1.0, %v5790_v16  ;;  %v556_v6 = vadd.f32 %v4556_v53, %v555_v61  ;;  %v535_v61 = vld [vmem:[#allocation3] sm:$0xff] }
 0x17e   : > { %5038 = vmatprep.subr.msk.bf16.mxu1 %vm5037_vm13, %v5789_v41  ;;  %v4546_v1 = vsel %vm8746_vm10, 1.0, %v5790_v16  ;;  %vm1182_vm13 = vcmp.eq.s32.totalorder %v6674_v37, %v6059_v30  ;;  %542 = vadd.xlane.f32.xlu1 %v541_v50  ;;  %v428_v7 = vsel %vm427_vm11, %v410_v56, 0.0  ;;  %v429_v23 = vsel %vm427_vm11, %v414_v59, 0.0  ;;  %vm5041_vm15 = vmpackc.low %vm1191_vm4, %vm1187_vm8  ;;  %v536_v56 = vld [vmem:[#allocation3 + $0x8] sm:$0xff] }
 0x17f   : > { %v544_v28 = vadd.f32 %v4546_v1, %v4545_v42  ;;  %v431_v9 = vsel %vm427_vm11, %v418_v63, 0.0  ;;  %vm8752_vm10 = vcmp.eq.s32.totalorder %v6507_v4, %v6059_v30  ;;  %vm5039_vm2 = vmpackc.low %vm1182_vm13, %vm1178_vm12  ;;  %vm1062_vm6 = vcmp.eq.s32.totalorder %v6652_v22, %v6071_v36 }
 0x180   : > { %4896 = vmatpush1.bf16.xpose.msk.msra.mxu0 %vm4895_vm3, %v5789_v41  ;;  %v4547_v10 = vsel %vm8752_vm10, 1.0, %v5790_v16  ;;  %vm1058_vm3 = vcmp.eq.s32.totalorder %v6652_v22, %v6068_v35  ;;  %v430_v27 = vadd.f32 %v429_v23, %v428_v7  ;;  %vm1071_vm12 = vcmp.eq.s32.totalorder %v823_v60, %v6059_v30 }
 0x181   : > { %4898 = vmatprep.subr.msk.bf16.mxu0 %vm4897_vm0, %v5789_v41  ;;  %vm1067_vm0 = vcmp.eq.s32.totalorder %v823_v60, %v5998_v15  ;;  %v951_v0 = vrot.slane %v6142_v51, %v6432_v58  ;;  %v433_v13 = vsel %vm427_vm11, %v422_v2, 0.0  ;;  %v545_v18 = vadd.f32 %v4547_v10, %v544_v28  ;;  %vm4899_vm13 = vmpackc.low %vm1062_vm6, %vm1058_vm3  ;;  %v1928_v10 = vld [vmem:[#allocation2] sm:$0xff] }
 0x182   : > { %v432_v17 = vadd.f32 %v431_v9, %v430_v27  ;;  %557 = vadd.xlane.f32.xlu1 %v556_v6  ;;  %v549_v22 = vadd.f32 %v4550_v40, %v4549_v5  ;;  %vm8753_vm8 = vcmp.eq.s32.totalorder %v6503_v3, %v6059_v30  ;;  %vm8754_vm4 = vcmp.eq.s32.totalorder %v6507_v4, %v6068_v35  ;;  %vm4901_vm11 = vmpackc.low %vm1071_vm12, %vm1067_vm0  ;;  %v537_v40 = vld [vmem:[#allocation3 + $0x10] sm:$0xff]  ;;  %v1929_v27 = vld [vmem:[#allocation2 + $0x8] sm:$0xff] }
 0x183   : > { %v4548_v20 = vsel %vm8753_vm8, 1.0, %v5790_v16  ;;  %v4551_v25 = vsel %vm8754_vm4, 1.0, %v5790_v16  ;;  %v819_v26 = vrot.slane %v6129_v49, %v6444_v62  ;;  %vm1186_vm1 = vcmp.eq.s32.totalorder %v6674_v37, %v6068_v35 }
 0x184   : > { %v434_v32 = vadd.f32 %v433_v13, %v432_v17  ;;  %vm1190_vm7 = vcmp.eq.s32.totalorder %v6674_v37, %v6071_v36  ;;  %vm1195_vm10 = vcmp.eq.s32.totalorder %v951_v0, %v5998_v15  ;;  %v546_v4 = vadd.f32 %v4548_v20, %v545_v18  ;;  %v1932_v13 = vld [vmem:[#allocation2 + $0x20] sm:$0xff] }
 0x185   : > { %5040 = vmatpush1.bf16.xpose.msk.msra.mxu1 %vm5039_vm2, %v5789_v41  ;;  %vm1199_vm2 = vcmp.eq.s32.totalorder %v951_v0, %v6059_v30  ;;  %v550_v44 = vadd.f32 %v4551_v25, %v549_v22  ;;  %vm8755_vm3 = vcmp.eq.s32.totalorder %v6503_v3, %v6068_v35  ;;  %vm5043_vm6 = vmpackc.low %vm1190_vm7, %vm1186_vm1  ;;  %vm1070_vm0 = vcmp.eq.s32.totalorder %v819_v26, %v6059_v30  ;;  %v1933_v22 = vld [vmem:[#allocation2 + $0x28] sm:$0xff] }
 0x186   : > { %5042 = vmatprep.subr.msk.bf16.mxu1 %vm5041_vm15, %v5789_v41  ;;  %435 = vadd.xlane.f32.xlu0 %v434_v32  ;;  %v4552_v49 = vsel %vm8755_vm3, 1.0, %v5790_v16  ;;  %vm1066_vm15 = vcmp.eq.s32.totalorder %v819_v26, %v5998_v15  ;;  %vm5045_vm12 = vmpackc.low %vm1199_vm2, %vm1195_vm10  ;;  %vm1079_vm8 = vcmp.eq.s32.totalorder %v823_v60, %v6071_v36  ;;  %v947_v37 = vrot.slane %v6142_v51, %v6444_v62 }
 0x187   : > { %v551_v3 = vadd.f32 %v4552_v49, %v550_v44  ;;  %vm4903_vm4 = vmpackc.low %vm1070_vm0, %vm1066_vm15  ;;  %v839_v16 = vrot.slane %v6169_v55, %v6432_v58  ;;  %vm1203_vm10 = vcmp.eq.s32.totalorder %v951_v0, %v6068_v35  ;;  %vm1207_vm2 = vcmp.eq.s32.totalorder %v951_v0, %v6071_v36  ;;  %v1931_v49 = vld [vmem:[#allocation2 + $0x18] sm:$0xff] }
 0x188   : > { %4900 = vmatpush1.bf16.xpose.msk.msra.mxu0 %vm4899_vm13, %v5789_v41  ;;  %vm1075_vm13 = vcmp.eq.s32.totalorder %v823_v60, %v6068_v35  ;;  %vm1194_vm1 = vcmp.eq.s32.totalorder %v947_v37, %v5998_v15  ;;  %vm1198_vm7 = vcmp.eq.s32.totalorder %v947_v37, %v6059_v30  ;;  %vm1078_vm15 = vcmp.eq.s32.totalorder %v819_v26, %v6071_v36  ;;  %vm5049_vm0 = vmpackc.low %vm1207_vm2, %vm1203_vm10 }
 0x189   : > { %4902 = vmatprep.subr.msk.bf16.mxu0 %vm4901_vm11, %v5789_v41  ;;  %vm4905_vm11 = vmpackc.low %vm1079_vm8, %vm1075_vm13  ;;  %vm1087_vm13 = vcmp.eq.s32.totalorder %v839_v16, %v6059_v30  ;;  %v967_v51 = vrot.slane %v6194_v57, %v6432_v58  ;;  %v835_v33 = vrot.slane %v6169_v55, %v6444_v62  ;;  %v963_v55 = vrot.slane %v6194_v57, %v6444_v62 }
 0x18a   : > { %547 = vadd.xlane.f32.xlu0 %v546_v4  ;;  %vm5047_vm3 = vmpackc.low %vm1198_vm7, %vm1194_vm1  ;;  %vm1206_vm1 = vcmp.eq.s32.totalorder %v947_v37, %v6071_v36  ;;  %v855_v34 = vrot.slane %v6245_v11, %v6432_v58  ;;  %v983_v57 = vrot.slane %v6264_v19, %v6432_v58  ;;  %v979_v11 = vrot.slane %v6264_v19, %v6444_v62  ;;  %v1930_v4 = vld [vmem:[#allocation2 + $0x10] sm:$0xff] }
 0x18b   : > { %vm1211_vm7 = vcmp.eq.s32.totalorder %v967_v51, %v5998_v15  ;;  %vm1215_vm10 = vcmp.eq.s32.totalorder %v967_v51, %v6059_v30  ;;  %v871_v39 = vrot.slane %v6297_v31, %v6432_v58  ;;  %v999_v19 = vrot.slane %v6323_v38, %v6432_v58 }
 0x18c   : > { %v867_v42 = vrot.slane %v6297_v31, %v6444_v62  ;;  %v995_v31 = vrot.slane %v6323_v38, %v6444_v62  ;;  %v887_v45 = vrot.slane %v6353_v43, %v6432_v58  ;;  %v1015_v38 = vrot.slane %v6366_v46, %v6432_v58 }
 0x18d   : > { %5044 = vmatpush1.bf16.xpose.msk.msra.mxu1 %vm5043_vm6, %v5789_v41  ;;  %vm1074_vm6 = vcmp.eq.s32.totalorder %v819_v26, %v6068_v35  ;;  %v883_v47 = vrot.slane %v6353_v43, %v6444_v62  ;;  %v1011_v43 = vrot.slane %v6366_v46, %v6444_v62  ;;  %v903_v1 = vrot.slane %v6393_v52, %v6432_v58 }
 0x18e   : > { %5046 = vmatprep.subr.msk.bf16.mxu1 %vm5045_vm12, %v5789_v41  ;;  %552 = vadd.xlane.f32.xlu0 %v551_v3  ;;  %vm1083_vm12 = vcmp.eq.s32.totalorder %v839_v16, %v5998_v15  ;;  %vm4907_vm8 = vmpackc.low %vm1078_vm15, %vm1074_vm6  ;;  %vm1086_vm6 = vcmp.eq.s32.totalorder %v835_v33, %v6059_v30  ;;  %v1031_v46 = vrot.slane %v6406_v54, %v6432_v58  ;;  %v1934_v3 = vld [vmem:[#allocation2 + $0x30] sm:$0xff] }
 0x18f   : > { %vm5053_vm15 = vmpackc.low %vm1215_vm10, %vm1211_vm7  ;;  %vm1223_vm7 = vcmp.eq.s32.totalorder %v967_v51, %v6071_v36  ;;  %v1027_v52 = vrot.slane %v6406_v54, %v6444_v62  ;;  %vm1158_vm5 = vcmp.eq.s32.totalorder %v899_v48, %v6071_v36 }
 0x190   : > { %4904 = vmatpush1.bf16.xpose.msk.msra.mxu0 %vm4903_vm4, %v5789_v41  ;;  %vm4909_vm4 = vmpackc.low %vm1087_vm13, %vm1083_vm12  ;;  %vm1095_vm12 = vcmp.eq.s32.totalorder %v839_v16, %v6071_v36 }
 0x191   : > { %4906 = vmatprep.subr.msk.bf16.mxu0 %vm4905_vm11, %v5789_v41  ;;  %vm1202_vm11 = vcmp.eq.s32.totalorder %v947_v37, %v6068_v35 }
 0x192   : > { %vm5051_vm2 = vmpackc.low %vm1206_vm1, %vm1202_vm11  ;;  %vm1214_vm11 = vcmp.eq.s32.totalorder %v963_v55, %v6059_v30  ;;  %vm1219_vm1 = vcmp.eq.s32.totalorder %v967_v51, %v6068_v35 }
 0x195   : > { %5048 = vmatpush1.bf16.xpose.msk.msra.mxu1 %vm5047_vm3, %v5789_v41  ;;  %vm1082_vm3 = vcmp.eq.s32.totalorder %v835_v33, %v5998_v15 }
 0x196   : > { %5050 = vmatprep.subr.msk.bf16.mxu1 %vm5049_vm0, %v5789_v41  ;;  %vm1091_vm0 = vcmp.eq.s32.totalorder %v839_v16, %v6068_v35  ;;  %vm4911_vm13 = vmpackc.low %vm1086_vm6, %vm1082_vm3  ;;  %vm1094_vm3 = vcmp.eq.s32.totalorder %v835_v33, %v6071_v36 }
 0x197   : > { %vm5057_vm6 = vmpackc.low %vm1223_vm7, %vm1219_vm1  ;;  %vm1231_vm1 = vcmp.eq.s32.totalorder %v983_v57, %v6059_v30 }
 0x198   : > { %4908 = vmatpush1.bf16.xpose.msk.msra.mxu0 %vm4907_vm8, %v5789_v41  ;;  %vm4913_vm8 = vmpackc.low %vm1095_vm12, %vm1091_vm0  ;;  %vm1103_vm0 = vcmp.eq.s32.totalorder %v855_v34, %v6059_v30 }
 0x199   : > { %4910 = vmatprep.subr.msk.bf16.mxu0 %vm4909_vm4, %v5789_v41  ;;  %vm1210_vm4 = vcmp.eq.s32.totalorder %v963_v55, %v5998_v15 }
 0x19a   : > { %vm5055_vm10 = vmpackc.low %vm1214_vm11, %vm1210_vm4  ;;  %vm1222_vm4 = vcmp.eq.s32.totalorder %v963_v55, %v6071_v36  ;;  %vm1227_vm11 = vcmp.eq.s32.totalorder %v983_v57, %v5998_v15 }
 0x19d   : > { %5052 = vmatpush1.bf16.xpose.msk.msra.mxu1 %vm5051_vm2, %v5789_v41  ;;  %vm1090_vm2 = vcmp.eq.s32.totalorder %v835_v33, %v6068_v35  ;;  %v1935_v33 = vld [vmem:[#allocation2 + $0x38] sm:$0xff] }
 0x19e   : > { %5054 = vmatprep.subr.msk.bf16.mxu1 %vm5053_vm15, %v5789_v41  ;;  %vm1099_vm15 = vcmp.eq.s32.totalorder %v855_v34, %v5998_v15  ;;  %vm4915_vm12 = vmpackc.low %vm1094_vm3, %vm1090_vm2  ;;  %vm1102_vm2 = vcmp.eq.s32.totalorder %v851_v29, %v6059_v30 }
 0x19f   : > { %vm5061_vm3 = vmpackc.low %vm1231_vm1, %vm1227_vm11  ;;  %vm1239_vm11 = vcmp.eq.s32.totalorder %v983_v57, %v6071_v36 }
 0x1a0   : > { %4912 = vmatpush1.bf16.xpose.msk.msra.mxu0 %vm4911_vm13, %v5789_v41  ;;  %vm4917_vm13 = vmpackc.low %vm1103_vm0, %vm1099_vm15  ;;  %vm1111_vm15 = vcmp.eq.s32.totalorder %v855_v34, %v6071_v36 }
 0x1a1   : > { %4914 = vmatprep.subr.msk.bf16.mxu0 %vm4913_vm8, %v5789_v41  ;;  %vm1218_vm8 = vcmp.eq.s32.totalorder %v963_v55, %v6068_v35  ;;  %v1936_v55 = vld [vmem:[#allocation2 + $0x40] sm:$0xff] }
 0x1a2   : > { %vm5059_vm7 = vmpackc.low %vm1222_vm4, %vm1218_vm8  ;;  %vm1230_vm8 = vcmp.eq.s32.totalorder %v979_v11, %v6059_v30  ;;  %vm1235_vm4 = vcmp.eq.s32.totalorder %v983_v57, %v6068_v35 }
 0x1a5   : > { %5056 = vmatpush1.bf16.xpose.msk.msra.mxu1 %vm5055_vm10, %v5789_v41  ;;  %vm1098_vm10 = vcmp.eq.s32.totalorder %v851_v29, %v5998_v15 }
 0x1a6   : > { %5058 = vmatprep.subr.msk.bf16.mxu1 %vm5057_vm6, %v5789_v41  ;;  %vm1107_vm6 = vcmp.eq.s32.totalorder %v855_v34, %v6068_v35  ;;  %vm4919_vm0 = vmpackc.low %vm1102_vm2, %vm1098_vm10  ;;  %vm1110_vm10 = vcmp.eq.s32.totalorder %v851_v29, %v6071_v36 }
 0x1a7   : > { %vm5065_vm2 = vmpackc.low %vm1239_vm11, %vm1235_vm4  ;;  %vm1247_vm4 = vcmp.eq.s32.totalorder %v999_v19, %v6059_v30 }
 0x1a8   : > { %4916 = vmatpush1.bf16.xpose.msk.msra.mxu0 %vm4915_vm12, %v5789_v41  ;;  %vm4921_vm12 = vmpackc.low %vm1111_vm15, %vm1107_vm6  ;;  %vm1119_vm6 = vcmp.eq.s32.totalorder %v871_v39, %v6059_v30 }
 0x1a9   : > { %4918 = vmatprep.subr.msk.bf16.mxu0 %vm4917_vm13, %v5789_v41  ;;  %vm1226_vm13 = vcmp.eq.s32.totalorder %v979_v11, %v5998_v15 }
 0x1aa   : > { %vm5063_vm1 = vmpackc.low %vm1230_vm8, %vm1226_vm13  ;;  %vm1238_vm13 = vcmp.eq.s32.totalorder %v979_v11, %v6071_v36  ;;  %vm1243_vm8 = vcmp.eq.s32.totalorder %v999_v19, %v5998_v15 }
 0x1ad   : > { %5060 = vmatpush1.bf16.xpose.msk.msra.mxu1 %vm5059_vm7, %v5789_v41  ;;  %vm1106_vm7 = vcmp.eq.s32.totalorder %v851_v29, %v6068_v35  ;;  %v1937_v29 = vld [vmem:[#allocation2 + $0x48] sm:$0xff] }
 0x1ae   : > { %5062 = vmatprep.subr.msk.bf16.mxu1 %vm5061_vm3, %v5789_v41  ;;  %vm1115_vm3 = vcmp.eq.s32.totalorder %v871_v39, %v5998_v15  ;;  %vm4923_vm15 = vmpackc.low %vm1110_vm10, %vm1106_vm7  ;;  %vm1118_vm7 = vcmp.eq.s32.totalorder %v867_v42, %v6059_v30 }
 0x1af   : > { %vm5069_vm10 = vmpackc.low %vm1247_vm4, %vm1243_vm8  ;;  %vm1255_vm8 = vcmp.eq.s32.totalorder %v999_v19, %v6071_v36 }
 0x1b0   : > { %4920 = vmatpush1.bf16.xpose.msk.msra.mxu0 %vm4919_vm0, %v5789_v41  ;;  %vm4925_vm0 = vmpackc.low %vm1119_vm6, %vm1115_vm3  ;;  %vm1127_vm3 = vcmp.eq.s32.totalorder %v871_v39, %v6071_v36 }
 0x1b1   : > { %4922 = vmatprep.subr.msk.bf16.mxu0 %vm4921_vm12, %v5789_v41  ;;  %vm1234_vm12 = vcmp.eq.s32.totalorder %v979_v11, %v6068_v35 }
 0x1b2   : > { %vm5067_vm11 = vmpackc.low %vm1238_vm13, %vm1234_vm12  ;;  %vm1246_vm12 = vcmp.eq.s32.totalorder %v995_v31, %v6059_v30  ;;  %vm1251_vm13 = vcmp.eq.s32.totalorder %v999_v19, %v6068_v35 }
 0x1b5   : > { %5064 = vmatpush1.bf16.xpose.msk.msra.mxu1 %vm5063_vm1, %v5789_v41  ;;  %vm1114_vm1 = vcmp.eq.s32.totalorder %v867_v42, %v5998_v15 }
 0x1b6   : > { %5066 = vmatprep.subr.msk.bf16.mxu1 %vm5065_vm2, %v5789_v41  ;;  %vm1123_vm2 = vcmp.eq.s32.totalorder %v871_v39, %v6068_v35  ;;  %vm4927_vm6 = vmpackc.low %vm1118_vm7, %vm1114_vm1  ;;  %vm1126_vm1 = vcmp.eq.s32.totalorder %v867_v42, %v6071_v36 }
 0x1b7   : > { %vm5073_vm7 = vmpackc.low %vm1255_vm8, %vm1251_vm13  ;;  %vm1263_vm13 = vcmp.eq.s32.totalorder %v1015_v38, %v6059_v30 }
 0x1b8   : > { %4924 = vmatpush1.bf16.xpose.msk.msra.mxu0 %vm4923_vm15, %v5789_v41  ;;  %vm4929_vm15 = vmpackc.low %vm1127_vm3, %vm1123_vm2  ;;  %vm1135_vm2 = vcmp.eq.s32.totalorder %v887_v45, %v6059_v30 }
 0x1b9   : > { %4926 = vmatprep.subr.msk.bf16.mxu0 %vm4925_vm0, %v5789_v41  ;;  %vm1242_vm0 = vcmp.eq.s32.totalorder %v995_v31, %v5998_v15 }
 0x1ba   : > { %vm5071_vm4 = vmpackc.low %vm1246_vm12, %vm1242_vm0  ;;  %vm1254_vm0 = vcmp.eq.s32.totalorder %v995_v31, %v6071_v36  ;;  %vm1259_vm12 = vcmp.eq.s32.totalorder %v1015_v38, %v5998_v15 }
 0x1bd   : > { %5068 = vmatpush1.bf16.xpose.msk.msra.mxu1 %vm5067_vm11, %v5789_v41  ;;  %vm1122_vm11 = vcmp.eq.s32.totalorder %v867_v42, %v6068_v35  ;;  %v1940_v42 = vld [vmem:[#allocation2 + $0x60] sm:$0xff] }
 0x1be   : > { %5070 = vmatprep.subr.msk.bf16.mxu1 %vm5069_vm10, %v5789_v41  ;;  %vm1131_vm10 = vcmp.eq.s32.totalorder %v887_v45, %v5998_v15  ;;  %vm4931_vm3 = vmpackc.low %vm1126_vm1, %vm1122_vm11  ;;  %vm1134_vm11 = vcmp.eq.s32.totalorder %v883_v47, %v6059_v30 }
 0x1bf   : > { %vm5077_vm1 = vmpackc.low %vm1263_vm13, %vm1259_vm12  ;;  %vm1271_vm12 = vcmp.eq.s32.totalorder %v1015_v38, %v6071_v36 }
 0x1c0   : > { %4928 = vmatpush1.bf16.xpose.msk.msra.mxu0 %vm4927_vm6, %v5789_v41  ;;  %vm4933_vm6 = vmpackc.low %vm1135_vm2, %vm1131_vm10  ;;  %vm1143_vm10 = vcmp.eq.s32.totalorder %v887_v45, %v6071_v36 }
 0x1c1   : > { %4930 = vmatprep.subr.msk.bf16.mxu0 %vm4929_vm15, %v5789_v41  ;;  %vm1250_vm15 = vcmp.eq.s32.totalorder %v995_v31, %v6068_v35 }
 0x1c2   : > { %vm5075_vm8 = vmpackc.low %vm1254_vm0, %vm1250_vm15  ;;  %vm1262_vm15 = vcmp.eq.s32.totalorder %v1011_v43, %v6059_v30  ;;  %vm1267_vm0 = vcmp.eq.s32.totalorder %v1015_v38, %v6068_v35 }
 0x1c5   : > { %5072 = vmatpush1.bf16.xpose.msk.msra.mxu1 %vm5071_vm4, %v5789_v41  ;;  %vm1130_vm4 = vcmp.eq.s32.totalorder %v883_v47, %v5998_v15 }
 0x1c6   : > { %5074 = vmatprep.subr.msk.bf16.mxu1 %vm5073_vm7, %v5789_v41  ;;  %vm1139_vm7 = vcmp.eq.s32.totalorder %v887_v45, %v6068_v35  ;;  %vm4935_vm2 = vmpackc.low %vm1134_vm11, %vm1130_vm4  ;;  %vm1142_vm4 = vcmp.eq.s32.totalorder %v883_v47, %v6071_v36 }
 0x1c7   : > { %vm5081_vm11 = vmpackc.low %vm1271_vm12, %vm1267_vm0  ;;  %vm1279_vm0 = vcmp.eq.s32.totalorder %v1031_v46, %v6059_v30 }
 0x1c8   : > { %4932 = vmatpush1.bf16.xpose.msk.msra.mxu0 %vm4931_vm3, %v5789_v41  ;;  %vm4937_vm3 = vmpackc.low %vm1143_vm10, %vm1139_vm7  ;;  %vm1151_vm7 = vcmp.eq.s32.totalorder %v903_v1, %v6059_v30 }
 0x1c9   : > { %4934 = vmatprep.subr.msk.bf16.mxu0 %vm4933_vm6, %v5789_v41  ;;  %vm1258_vm6 = vcmp.eq.s32.totalorder %v1011_v43, %v5998_v15 }
 0x1ca   : > { %vm5079_vm13 = vmpackc.low %vm1262_vm15, %vm1258_vm6  ;;  %vm1270_vm6 = vcmp.eq.s32.totalorder %v1011_v43, %v6071_v36  ;;  %vm1275_vm15 = vcmp.eq.s32.totalorder %v1031_v46, %v5998_v15 }
 0x1cd   : > { %5076 = vmatpush1.bf16.xpose.msk.msra.mxu1 %vm5075_vm8, %v5789_v41  ;;  %vm1138_vm8 = vcmp.eq.s32.totalorder %v883_v47, %v6068_v35  ;;  %v1941_v47 = vld [vmem:[#allocation2 + $0x68] sm:$0xff] }
 0x1ce   : > { %5078 = vmatprep.subr.msk.bf16.mxu1 %vm5077_vm1, %v5789_v41  ;;  %vm1147_vm1 = vcmp.eq.s32.totalorder %v903_v1, %v5998_v15  ;;  %vm4939_vm10 = vmpackc.low %vm1142_vm4, %vm1138_vm8  ;;  %vm1150_vm8 = vcmp.eq.s32.totalorder %v899_v48, %v6059_v30 }
 0x1cf   : > { %vm5085_vm4 = vmpackc.low %vm1279_vm0, %vm1275_vm15  ;;  %vm1287_vm15 = vcmp.eq.s32.totalorder %v1031_v46, %v6071_v36 }
 0x1d0   : > { %4936 = vmatpush1.bf16.xpose.msk.msra.mxu0 %vm4935_vm2, %v5789_v41  ;;  %vm4941_vm2 = vmpackc.low %vm1151_vm7, %vm1147_vm1  ;;  %vm1159_vm1 = vcmp.eq.s32.totalorder %v903_v1, %v6071_v36 }
 0x1d1   : > { %4938 = vmatprep.subr.msk.bf16.mxu0 %vm4937_vm3, %v5789_v41  ;;  %vm1266_vm3 = vcmp.eq.s32.totalorder %v1011_v43, %v6068_v35 }
 0x1d2   : > { %vm5083_vm12 = vmpackc.low %vm1270_vm6, %vm1266_vm3  ;;  %vm1278_vm3 = vcmp.eq.s32.totalorder %v1027_v52, %v6059_v30  ;;  %vm1283_vm6 = vcmp.eq.s32.totalorder %v1031_v46, %v6068_v35 }
 0x1d5   : > { %5080 = vmatpush1.bf16.xpose.msk.msra.mxu1 %vm5079_vm13, %v5789_v41  ;;  %vm1146_vm13 = vcmp.eq.s32.totalorder %v899_v48, %v5998_v15 }
 0x1d6   : > { %5082 = vmatprep.subr.msk.bf16.mxu1 %vm5081_vm11, %v5789_v41  ;;  %vm1155_vm11 = vcmp.eq.s32.totalorder %v903_v1, %v6068_v35  ;;  %vm4943_vm7 = vmpackc.low %vm1150_vm8, %vm1146_vm13 }
 0x1d7   : > { %vm5089_vm13 = vmpackc.low %vm1287_vm15, %vm1283_vm6 }
 0x1d8   : > { %4940 = vmatpush1.bf16.xpose.msk.msra.mxu0 %vm4939_vm10, %v5789_v41  ;;  %vm4945_vm10 = vmpackc.low %vm1159_vm1, %vm1155_vm11  ;;  %vm1286_vm11 = vcmp.eq.s32.totalorder %v1027_v52, %v6071_v36 }
 0x1d9   : > { %4942 = vmatprep.subr.msk.bf16.mxu0 %vm4941_vm2, %v5789_v41  ;;  %vm1274_vm2 = vcmp.eq.s32.totalorder %v1027_v52, %v5998_v15 }
 0x1da   : > { %vm5087_vm0 = vmpackc.low %vm1278_vm3, %vm1274_vm2 }
 0x1dd   : > { %5084 = vmatpush1.bf16.xpose.msk.msra.mxu1 %vm5083_vm12, %v5789_v41  ;;  %vm1154_vm12 = vcmp.eq.s32.totalorder %v899_v48, %v6068_v35 }
 0x1de   : > { %5086 = vmatprep.subr.msk.bf16.mxu1 %vm5085_vm4, %v5789_v41  ;;  %vm4947_vm8 = vmpackc.low %vm1158_vm5, %vm1154_vm12  ;;  %vm1282_vm4 = vcmp.eq.s32.totalorder %v1027_v52, %v6068_v35  ;;  %vm8756_vm5 = vnez %v8740_v21  ;;  %v538_v21 = vld [vmem:[#allocation3 + $0x18] sm:$0xff]  ;;  %v1938_v52 = vld [vmem:[#allocation2 + $0x50] sm:$0xff] }
 0x1df   : > { %vm5091_vm1 = vmpackc.low %vm1286_vm11, %vm1282_vm4 }
 0x1e0   : > { %4944 = vmatpush1.bf16.xpose.msk.msra.mxu0 %vm4943_vm7, %v5789_v41 }
 0x1e1   : > { %4946 = vmatprep.subr.msk.bf16.mxu0 %vm4945_vm10, %v5789_v41 }
 0x1e5   : > { %5088 = vmatpush1.bf16.xpose.msk.msra.mxu1 %vm5087_vm0, %v5789_v41 }
 0x1e6   : > { %5090 = vmatprep.subr.msk.bf16.mxu1 %vm5089_vm13, %v5789_v41 }
 0x1e8   : > { %4948 = vmatpush1.bf16.xpose.msk.msra.mxu0 %vm4947_vm8, %v5789_v41 }
 0x1ed   : > { %5092 = vmatpush1.bf16.xpose.msk.msra.mxu1 %vm5091_vm1, %v5789_v41 }
 0x1ef   : > { %4952 = vmatmul.mubr.msk.bf16.vlgmr.msra.gmra.mrb[0].mxu0 %vm6574_vm9, %v5789_v41 }
 0x1f0   : > { %4954 = vmatprep.mubr.msk.bf16.mxu0 %vm6615_vm14, %v5789_v41 }
 0x1f4   : > { %5096 = vmatmul.mubr.msk.bf16.vlgmr.msra.gmra.mrb[0].mxu1 %vm6574_vm9, %v5789_v41  ;;  %vm563_vm9 = vcmask 7168  }
 0x1f5   : > { %5098 = vmatprep.mubr.msk.bf16.mxu1 %vm6615_vm14, %v5789_v41  ;;  %vm8648_vm14 = vcmask 0  }
 0x1f7   : > { %4956 = vmatmul.mubr.msk.bf16.gmra.mrb[4].mxu0 %vm8756_vm5, %v5789_v41 }
 0x1fc   : > { %5100 = vmatmul.mubr.msk.bf16.gmra.mrb[4].mxu1 %vm8756_vm5, %v5789_v41  ;;  %v403_v41 = vld [vmem:[#allocation4] sm:$0x1] }
 0x20b   : > { %v543_v14 = vpop.xlane.xlu1 %542 }
 0x20c   : > { %v559_v63 = vadd.f32 %v543_v14, %v535_v61 }
 0x20e   : > { %564 = vst.msk [vmem:[#allocation3] sm:$0xff] %vm563_vm9, %v559_v63 }
 0x20f   : > { %v558_v28 = vpop.xlane.xlu1 %557 }
 0x210   : > { %v562_v7 = vadd.f32 %v558_v28, %v538_v21 }
 0x212   : > { %567 = vst.msk [vmem:[#allocation3 + $0x18] sm:$0xff] %vm563_vm9, %v562_v7 }
 0x213   : > { %v436_v54 = vpop.xlane.xlu0 %435 }
 0x214   : > { %v437_v58 = vrot.slane %v436_v54, 4 }
 0x216   : > { %v438_v62 = vadd.f32 %v437_v58, %v436_v54  ;;  %v1939_v58 = vld [vmem:[#allocation2 + $0x58] sm:$0xff] }
 0x217   : > { %v548_v59 = vpop.xlane.xlu0 %547 }
 0x218   : > { %v439_v50 = vrot.slane %v438_v62, 2  ;;  %v560_v2 = vadd.f32 %v548_v59, %v536_v56 }
 0x21a   : > { %v440_v53 = vadd.f32 %v439_v50, %v438_v62  ;;  %565 = vst.msk [vmem:[#allocation3 + $0x8] sm:$0xff] %vm563_vm9, %v560_v2  ;;  %v1942_v50 = vld [vmem:[#allocation2 + $0x70] sm:$0xff] }
 0x21b   : > { %v553_v5 = vpop.xlane.xlu0 %552 }
 0x21c   : > { %v441_v60 = vrot.slane %v440_v53, 1  ;;  %v561_v23 = vadd.f32 %v553_v5, %v537_v40 }
 0x21e   : > { %v442_v12 = vadd.f32 %v441_v60, %v440_v53  ;;  %566 = vst.msk [vmem:[#allocation3 + $0x10] sm:$0xff] %vm563_vm9, %v561_v23 }
 0x220   : > { %5315 = vpush %v442_v12  ;;  %v1943_v12 = vld [vmem:[#allocation2 + $0x78] sm:$0xff] }
 0x251   : > { %s5316_s16 = spop %5315 }
 0x252   : > { %v444_v6 = vstv %s5316_s16 }
 0x253   : > { %v445_v9 = vadd.f32 %v444_v6, %v403_v41 }
 0x255   : > { %447 = vst.msk [vmem:[#allocation4] sm:$0x1] %vm8648_vm14, %v445_v9 }
 0x2c2   : > { %v2031_v0 = vpop.f32.mrb[0].mxu0 }
 0x2c3   : > { %v2156_v17 = vadd.f32 %v2031_v0, %v1928_v10  ;;  %v2033_v18 = vpop.f32.mrb[1].mxu0 }
 0x2c4   : > { %v2157_v20 = vadd.f32 %v2033_v18, %v1929_v27  ;;  %v2035_v25 = vpop.f32.mrb[2].mxu0 }
 0x2c5   : > { %2172 = vst [vmem:[#allocation2] sm:$0xff] %v2156_v17  ;;  %v2160_v26 = vadd.f32 %v2035_v25, %v1932_v13  ;;  %v2037_v32 = vpop.f32.mrb[3].mxu0 }
 0x2c6   : > { %2173 = vst [vmem:[#allocation2 + $0x8] sm:$0xff] %v2157_v20  ;;  %v2161_v44 = vadd.f32 %v2037_v32, %v1933_v22 }
 0x2c7   : > { %2176 = vst [vmem:[#allocation2 + $0x20] sm:$0xff] %v2160_v26  ;;  %v2137_v37 = vpop.f32.mrb[0].mxu1 }
 0x2c8   : > { %2177 = vst [vmem:[#allocation2 + $0x28] sm:$0xff] %v2161_v44  ;;  %v2158_v16 = vadd.f32 %v2137_v37, %v1930_v4  ;;  %v2139_v51 = vpop.f32.mrb[1].mxu1 }
 0x2c9   : > { %v2159_v34 = vadd.f32 %v2139_v51, %v1931_v49  ;;  %v2141_v57 = vpop.f32.mrb[2].mxu1 }
 0x2ca   : > { %2174 = vst [vmem:[#allocation2 + $0x10] sm:$0xff] %v2158_v16  ;;  %v2162_v11 = vadd.f32 %v2141_v57, %v1934_v3  ;;  %v2143_v39 = vpop.f32.mrb[3].mxu1  ;;  %v2041_v19 = vpop.f32.mrb[4].mxu0 }
 0x2cb   : > { %2175 = vst [vmem:[#allocation2 + $0x18] sm:$0xff] %v2159_v34  ;;  %v2163_v31 = vadd.f32 %v2143_v39, %v1935_v33  ;;  %v2164_v45 = vadd.f32 %v2041_v19, %v1936_v55  ;;  %v2043_v38 = vpop.f32.mrb[5].mxu0 }
 0x2cc   : > { %2178 = vst [vmem:[#allocation2 + $0x30] sm:$0xff] %v2162_v11  ;;  %v2165_v43 = vadd.f32 %v2043_v38, %v1937_v29  ;;  %v2045_v1 = vpop.f32.mrb[6].mxu0 }
 0x2cd   : > { %2179 = vst [vmem:[#allocation2 + $0x38] sm:$0xff] %v2163_v31  ;;  %2180 = vst [vmem:[#allocation2 + $0x40] sm:$0xff] %v2164_v45  ;;  %v2168_v46 = vadd.f32 %v2045_v1, %v1940_v42  ;;  %v2047_v48 = vpop.f32.mrb[7].mxu0 }
 0x2ce   : > { %2181 = vst [vmem:[#allocation2 + $0x48] sm:$0xff] %v2165_v43  ;;  %v2169_v54 = vadd.f32 %v2047_v48, %v1941_v47 }
 0x2cf   : > { %2184 = vst [vmem:[#allocation2 + $0x60] sm:$0xff] %v2168_v46  ;;  %v2147_v62 = vpop.f32.mrb[4].mxu1  ;;  %2191 = sbr.rel (%p5101_p3) target bundleno = 1808 (0x710), region = 68 }
 0x2d0   : > { %2185 = vst [vmem:[#allocation2 + $0x68] sm:$0xff] %v2169_v54  ;;  %v2166_v53 = vadd.f32 %v2147_v62, %v1938_v52  ;;  %v2149_v60 = vpop.f32.mrb[5].mxu1 }
 0x2d1   : > { %v2167_v61 = vadd.f32 %v2149_v60, %v1939_v58  ;;  %v2151_v14 = vpop.f32.mrb[6].mxu1 }
 0x2d2   : > { %2182 = vst [vmem:[#allocation2 + $0x50] sm:$0xff] %v2166_v53  ;;  %v2170_v56 = vadd.f32 %v2151_v14, %v1942_v50  ;;  %v2153_v59 = vpop.f32.mrb[7].mxu1 }
 0x2d3   : > { %2183 = vst [vmem:[#allocation2 + $0x58] sm:$0xff] %v2167_v61  ;;  %v2171_v63 = vadd.f32 %v2153_v59, %v1943_v12 }
 0x2d4   : > { %2186 = vst [vmem:[#allocation2 + $0x70] sm:$0xff] %v2170_v56 }
 0x2d5   : > { %2187 = vst [vmem:[#allocation2 + $0x78] sm:$0xff] %v2171_v63 }
 0x2d6   : > { %v7031_v2 = vld [vmem:[%s8618_s7 + $0x1] sm:$0x1]  ;;  %vm2525_vm7 = vcmask 57344   ;;  %v7036_v41 = vld [vmem:[%s8618_s7] sm:$0x1]  ;;  %vm3086_vm4 = vcmask 64512  }
 0x2d7   : > { %v2665_v21 = vsel %vm2525_vm7, %v7031_v2, inf  ;;  %v2662_v28 = vsel %vm2525_vm7, %v7036_v41, inf  ;;  %v2689_v40 = vsel %vm2525_vm7, %v7031_v2, -inf  ;;  %v2686_v5 = vsel %vm2525_vm7, %v7036_v41, -inf  ;;  %v7049_v6 = vld [vmem:[%s8617_s6] sm:$0x1] }
 0x2d8   : > { %2666 = vmin.xlane.f32.xlu1 %v2665_v21  ;;  %2663 = vmin.xlane.f32.xlu0 %v2662_v28  ;;  %v2550_v7 = vsel %vm2525_vm7, %v7049_v6, -inf  ;;  %v2526_v23 = vsel %vm2525_vm7, %v7049_v6, inf  ;;  %v7058_v9 = vld [vmem:[%s8618_s7 + $0x2] sm:$0x1]  ;;  %v7067_v0 = vld [vmem:[%s8617_s6 + $0x1] sm:$0x1] }
 0x2d9   : > { %v2692_v10 = vsel %vm2525_vm7, %v7058_v9, -inf  ;;  %v2668_v27 = vsel %vm2525_vm7, %v7058_v9, inf  ;;  %v2553_v13 = vsel %vm2525_vm7, %v7067_v0, -inf  ;;  %v2529_v17 = vsel %vm2525_vm7, %v7067_v0, inf  ;;  %v7076_v18 = vld [vmem:[%s8618_s7 + $0x3] sm:$0x1] }
 0x2da   : > { %v2695_v22 = vsel %vm2525_vm7, %v7076_v18, -inf  ;;  %v2671_v20 = vsel %vm2525_vm7, %v7076_v18, inf  ;;  %v7085_v25 = vld [vmem:[%s8617_s6 + $0x2] sm:$0x1]  ;;  %v7094_v4 = vld [vmem:[%s8618_s7 + $0x4] sm:$0x1] }
 0x2db   : > { %v2556_v26 = vsel %vm2525_vm7, %v7085_v25, -inf  ;;  %v2532_v32 = vsel %vm2525_vm7, %v7085_v25, inf  ;;  %v2698_v44 = vsel %vm2525_vm7, %v7094_v4, -inf  ;;  %v2674_v49 = vsel %vm2525_vm7, %v7094_v4, inf  ;;  %v7103_v37 = vld [vmem:[%s8617_s6 + $0x3] sm:$0x1] }
 0x2dc   : > { %2690 = vmax.xlane.f32.xlu1 %v2689_v40  ;;  %2687 = vmax.xlane.f32.xlu0 %v2686_v5  ;;  %v2559_v3 = vsel %vm2525_vm7, %v7103_v37, -inf  ;;  %v2535_v16 = vsel %vm2525_vm7, %v7103_v37, inf  ;;  %v7112_v51 = vld [vmem:[%s8618_s7 + $0x5] sm:$0x1]  ;;  %v7121_v34 = vld [vmem:[%s8617_s6 + $0x4] sm:$0x1] }
 0x2dd   : > { %v2701_v33 = vsel %vm2525_vm7, %v7112_v51, -inf  ;;  %v2677_v55 = vsel %vm2525_vm7, %v7112_v51, inf  ;;  %v2562_v57 = vsel %vm2525_vm7, %v7121_v34, -inf  ;;  %v2538_v29 = vsel %vm2525_vm7, %v7121_v34, inf  ;;  %v7130_v11 = vld [vmem:[%s8618_s7 + $0x6] sm:$0x1] }
 0x2de   : > { %v2704_v39 = vsel %vm2525_vm7, %v7130_v11, -inf  ;;  %v2680_v19 = vsel %vm2525_vm7, %v7130_v11, inf  ;;  %v7139_v42 = vld [vmem:[%s8617_s6 + $0x5] sm:$0x1]  ;;  %v7148_v38 = vld [vmem:[%s8618_s7 + $0x7] sm:$0x1] }
 0x2df   : > { %v2565_v31 = vsel %vm2525_vm7, %v7139_v42, -inf  ;;  %v2541_v45 = vsel %vm2525_vm7, %v7139_v42, inf  ;;  %v2707_v47 = vsel %vm2525_vm7, %v7148_v38, -inf  ;;  %v2683_v43 = vsel %vm2525_vm7, %v7148_v38, inf  ;;  %v7157_v1 = vld [vmem:[%s8617_s6 + $0x6] sm:$0x1] }
 0x2e0   : > { %2551 = vmax.xlane.f32.xlu1 %v2550_v7  ;;  %2527 = vmin.xlane.f32.xlu0 %v2526_v23  ;;  %v2568_v46 = vsel %vm2525_vm7, %v7157_v1, -inf  ;;  %v2544_v48 = vsel %vm2525_vm7, %v7157_v1, inf  ;;  %v7166_v52 = vld [vmem:[%s8617_s6 + $0x7] sm:$0x1] }
 0x2e1   : > { %v2571_v54 = vsel %vm2525_vm7, %v7166_v52, -inf  ;;  %v2547_v58 = vsel %vm2525_vm7, %v7166_v52, inf }
 0x2e4   : > { %2693 = vmax.xlane.f32.xlu1 %v2692_v10  ;;  %2669 = vmin.xlane.f32.xlu0 %v2668_v27 }
 0x2e8   : > { %2554 = vmax.xlane.f32.xlu1 %v2553_v13  ;;  %2530 = vmin.xlane.f32.xlu0 %v2529_v17 }
 0x2ec   : > { %2696 = vmax.xlane.f32.xlu1 %v2695_v22  ;;  %2672 = vmin.xlane.f32.xlu0 %v2671_v20 }
 0x2f0   : > { %2557 = vmax.xlane.f32.xlu1 %v2556_v26  ;;  %2533 = vmin.xlane.f32.xlu0 %v2532_v32 }
 0x2f4   : > { %2699 = vmax.xlane.f32.xlu1 %v2698_v44  ;;  %2675 = vmin.xlane.f32.xlu0 %v2674_v49 }
 0x2f8   : > { %2560 = vmax.xlane.f32.xlu1 %v2559_v3  ;;  %2536 = vmin.xlane.f32.xlu0 %v2535_v16 }
 0x2fc   : > { %2702 = vmax.xlane.f32.xlu1 %v2701_v33  ;;  %2678 = vmin.xlane.f32.xlu0 %v2677_v55 }
 0x300   : > { %2563 = vmax.xlane.f32.xlu1 %v2562_v57  ;;  %2539 = vmin.xlane.f32.xlu0 %v2538_v29 }
 0x304   : > { %2705 = vmax.xlane.f32.xlu1 %v2704_v39  ;;  %2681 = vmin.xlane.f32.xlu0 %v2680_v19 }
 0x308   : > { %2566 = vmax.xlane.f32.xlu1 %v2565_v31  ;;  %2542 = vmin.xlane.f32.xlu0 %v2541_v45 }
 0x30c   : > { %2708 = vmax.xlane.f32.xlu1 %v2707_v47  ;;  %2684 = vmin.xlane.f32.xlu0 %v2683_v43 }
 0x310   : > { %2569 = vmax.xlane.f32.xlu1 %v2568_v46  ;;  %2545 = vmin.xlane.f32.xlu0 %v2544_v48 }
 0x314   : > { %2572 = vmax.xlane.f32.xlu1 %v2571_v54  ;;  %2548 = vmin.xlane.f32.xlu0 %v2547_v58 }
 0x365   : > { %v2667_v62 = vpop.xlane.xlu1 %2666  ;;  %v2664_v50 = vpop.xlane.xlu0 %2663 }
 0x366   : > { %v2735_v20 = vsub.f32 %v7031_v2, %v2667_v62  ;;  %v2734_v44 = vsub.f32 %v7036_v41, %v2664_v50 }
 0x369   : > { %v2691_v53 = vpop.xlane.xlu1 %2690  ;;  %v2688_v60 = vpop.xlane.xlu0 %2687 }
 0x36a   : > { %vm2711_vm10 = vcmp.gt.f32.partialorder %v2691_v53, %v2667_v62  ;;  %v2719_v12 = vsub.f32 %v2691_v53, %v2667_v62  ;;  %vm2710_vm2 = vcmp.gt.f32.partialorder %v2688_v60, %v2664_v50  ;;  %v2718_v61 = vsub.f32 %v2688_v60, %v2664_v50 }
 0x36c   : > { %v2727_v14 = vsel %vm2711_vm10, %v2719_v12, 1.0  ;;  %v2726_v56 = vsel %vm2710_vm2, %v2718_v61, 1.0 }
 0x36d   : > { %5442 = vrcp.f32 %v2727_v14  ;;  %v2552_v59 = vpop.xlane.xlu1 %2551  ;;  %v2528_v63 = vpop.xlane.xlu0 %2527 }
 0x36e   : > { %5444 = vrcp.f32 %v2726_v56  ;;  %vm2574_vm3 = vcmp.gt.f32.partialorder %v2552_v59, %v2528_v63  ;;  %v2582_v21 = vsub.f32 %v2552_v59, %v2528_v63  ;;  %v2598_v19 = vsub.f32 %v7049_v6, %v2528_v63 }
 0x370   : > { %v2590_v28 = vsel %vm2574_vm3, %v2582_v21, 1.0 }
 0x371   : > { %5446 = vrcp.f32 %v2590_v28  ;;  %v2694_v40 = vpop.xlane.xlu1 %2693  ;;  %v2670_v5 = vpop.xlane.xlu0 %2669 }
 0x372   : > { %vm2712_vm6 = vcmp.gt.f32.partialorder %v2694_v40, %v2670_v5  ;;  %v2720_v7 = vsub.f32 %v2694_v40, %v2670_v5  ;;  %v2736_v62 = vsub.f32 %v7058_v9, %v2670_v5 }
 0x374   : > { %v2728_v23 = vsel %vm2712_vm6, %v2720_v7, 1.0 }
 0x375   : > { %5448 = vrcp.f32 %v2728_v23  ;;  %v2555_v10 = vpop.xlane.xlu1 %2554  ;;  %v7172_v27 = vpop.xlane.xlu0 %2530 }
 0x376   : > { %vm2575_vm15 = vcmp.gt.f32.partialorder %v2555_v10, %v7172_v27  ;;  %v2583_v13 = vsub.f32 %v2555_v10, %v7172_v27  ;;  %v2599_v40 = vsub.f32 %v7067_v0, %v7172_v27 }
 0x377   : > { %v5443_v17 = vpop.eup %5442 }
 0x378   : > { %v5445_v22 = vpop.eup %5444  ;;  %v2745_v26 = vmul.f32 29.0, %v5443_v17  ;;  %v2591_v32 = vsel %vm2575_vm15, %v2583_v13, 1.0 }
 0x379   : > { %v2743_v49 = vmul.f32 29.0, %v5445_v22  ;;  %5450 = vrcp.f32 %v2591_v32  ;;  %v2697_v3 = vpop.xlane.xlu1 %2696  ;;  %v7178_v16 = vpop.xlane.xlu0 %2672 }
 0x37a   : > { %v2759_v33 = vmul.f32 %v2745_v26, %v2735_v20  ;;  %vm2713_vm0 = vcmp.gt.f32.partialorder %v2697_v3, %v7178_v16  ;;  %v2721_v55 = vsub.f32 %v2697_v3, %v7178_v16  ;;  %v2737_v9 = vsub.f32 %v7076_v18, %v7178_v16 }
 0x37b   : > { %v5447_v57 = vpop.eup %5446  ;;  %v2758_v29 = vmul.f32 %v2743_v49, %v2734_v44 }
 0x37c   : > { %v2767_v39 = vfloor.f32 %v2759_v33  ;;  %v2607_v2 = vmul.f32 29.0, %v5447_v57  ;;  %v2729_v31 = vsel %vm2713_vm0, %v2721_v55, 1.0 }
 0x37d   : > { %v2766_v45 = vfloor.f32 %v2758_v29  ;;  %5452 = vrcp.f32 %v2729_v31  ;;  %v2558_v41 = vpop.xlane.xlu1 %2557  ;;  %v7183_v47 = vpop.xlane.xlu0 %2533 }
 0x37e   : > { %v2775_v43 = vmax.f32 %v2767_v39, 0.0  ;;  %v2622_v46 = vmul.f32 %v2607_v2, %v2598_v19  ;;  %vm2576_vm12 = vcmp.gt.f32.partialorder %v2558_v41, %v7183_v47  ;;  %v2584_v48 = vsub.f32 %v2558_v41, %v7183_v47 }
 0x37f   : > { %v5449_v54 = vpop.eup %5448  ;;  %v2774_v58 = vmax.f32 %v2766_v45, 0.0  ;;  %v2600_v17 = vsub.f32 %v7085_v25, %v7183_v47 }
 0x380   : > { %v2783_v50 = vmin.f32 %v2775_v43, 29.0  ;;  %v2630_v53 = vfloor.f32 %v2622_v46  ;;  %v2747_v6 = vmul.f32 29.0, %v5449_v54  ;;  %v2592_v60 = vsel %vm2576_vm12, %v2584_v48, 1.0 }
 0x381   : > { %v2782_v12 = vmin.f32 %v2774_v58, 29.0  ;;  %5454 = vrcp.f32 %v2592_v60  ;;  %v2700_v61 = vpop.xlane.xlu1 %2699  ;;  %v7188_v14 = vpop.xlane.xlu0 %2675  ;;  %v5791_v60 = vmov 0.0  }
 0x382   : > { %v5355_v56 = vtrunc.f32 %v2783_v50  ;;  %v2638_v59 = vmax.f32 %v2630_v53, 0.0  ;;  %v2760_v63 = vmul.f32 %v2747_v6, %v2736_v62  ;;  %vm2714_vm13 = vcmp.gt.f32.partialorder %v2700_v61, %v7188_v14 }
 0x383   : > { %v5451_v21 = vpop.eup %5450  ;;  %v5353_v28 = vtrunc.f32 %v2782_v12  ;;  %v2722_v5 = vsub.f32 %v2700_v61, %v7188_v14  ;;  %v2738_v20 = vsub.f32 %v7094_v4, %v7188_v14 }
 0x384   : > { %v5356_v7 = vcvt.f32.s32 %v5355_v56  ;;  %v2646_v23 = vmin.f32 %v2638_v59, 29.0  ;;  %v2768_v10 = vfloor.f32 %v2760_v63  ;;  %v2609_v13 = vmul.f32 29.0, %v5451_v21 }
 0x385   : > { %v2730_v22 = vsel %vm2714_vm13, %v2722_v5, 1.0  ;;  %v2561_v26 = vpop.xlane.xlu1 %2560  ;;  %v7200_v32 = vpop.xlane.xlu0 %2536  ;;  %v5354_v0 = vcvt.f32.s32 %v5353_v28 }
 0x386   : > { %v7203_v27 = vrot.slane %v5356_v7, %v6045_v24  ;;  %v5337_v18 = vtrunc.f32 %v2646_v23  ;;  %v2776_v44 = vmax.f32 %v2768_v10, 0.0  ;;  %v2623_v49 = vmul.f32 %v2609_v13, %v2599_v40 }
 0x387   : > { %v5453_v3 = vpop.eup %5452  ;;  %5456 = vrcp.f32 %v2730_v22  ;;  %vm2577_vm8 = vcmp.gt.f32.partialorder %v2561_v26, %v7200_v32  ;;  %v2585_v25 = vsub.f32 %v2561_v26, %v7200_v32  ;;  %v2601_v16 = vsub.f32 %v7103_v37, %v7200_v32 }
 0x388   : > { %v5338_v33 = vcvt.f32.s32 %v5337_v18  ;;  %v2784_v55 = vmin.f32 %v2776_v44, 29.0  ;;  %v2631_v57 = vfloor.f32 %v2623_v49  ;;  %v2749_v29 = vmul.f32 29.0, %v5453_v3 }
 0x389   : > { %v2593_v39 = vsel %vm2577_vm8, %v2585_v25, 1.0  ;;  %v2703_v19 = vpop.xlane.xlu1 %2702  ;;  %v7209_v2 = vpop.xlane.xlu0 %2678  ;;  %v7212_v31 = vrot.slane %v5354_v0, %v6045_v24  ;;  %vm2978_vm11 = vcmp.eq.s32.totalorder %v7203_v27, %v5998_v15  ;;  %vm2979_vm1 = vcmp.eq.s32.totalorder %v7203_v27, %v6059_v30 }
 0x38a   : > { %v7219_v45 = vrot.slane %v5338_v33, %v6045_v24  ;;  %v5357_v41 = vtrunc.f32 %v2784_v55  ;;  %v2639_v47 = vmax.f32 %v2631_v57, 0.0  ;;  %v2761_v43 = vmul.f32 %v2749_v29, %v2737_v9 }
 0x38b   : > { %v5455_v46 = vpop.eup %5454  ;;  %5458 = vrcp.f32 %v2593_v39  ;;  %vm2715_vm5 = vcmp.gt.f32.partialorder %v2703_v19, %v7209_v2  ;;  %v2723_v48 = vsub.f32 %v2703_v19, %v7209_v2  ;;  %v2739_v54 = vsub.f32 %v7112_v51, %v7209_v2 }
 0x38c   : > { %v5358_v58 = vcvt.f32.s32 %v5357_v41  ;;  %v2647_v62 = vmin.f32 %v2639_v47, 29.0  ;;  %v2769_v50 = vfloor.f32 %v2761_v43  ;;  %v2611_v53 = vmul.f32 29.0, %v5455_v46 }
 0x38d   : > { %v2731_v6 = vsel %vm2715_vm5, %v2723_v48, 1.0  ;;  %vm2974_vm9 = vcmp.eq.s32.totalorder %v7212_v31, %v5998_v15  ;;  %vm2975_vm7 = vcmp.eq.s32.totalorder %v7212_v31, %v6059_v30  ;;  %v5138_v12 = vsel %vm2978_vm11, 1.0, %v5791_v60  ;;  %v2564_v21 = vpop.xlane.xlu1 %2563  ;;  %v7236_v28 = vpop.xlane.xlu0 %2539 }
 0x38e   : > { %v7234_v61 = vrot.slane %v5358_v58, %v6045_v24  ;;  %v5339_v56 = vtrunc.f32 %v2647_v62  ;;  %v2777_v59 = vmax.f32 %v2769_v50, 0.0  ;;  %v2624_v63 = vmul.f32 %v2611_v53, %v2600_v17 }
 0x38f   : > { %5460 = vrcp.f32 %v2731_v6  ;;  %v5134_v40 = vsel %vm2974_vm9, 1.0, %v5791_v60  ;;  %v5135_v9 = vsel %vm2975_vm7, 1.0, %v5791_v60  ;;  %v5139_v5 = vsel %vm2979_vm1, 1.0, %v5791_v60 }
 0x390   : > { %v5340_v7 = vcvt.f32.s32 %v5339_v56  ;;  %v2785_v23 = vmin.f32 %v2777_v59, 29.0  ;;  %v2632_v10 = vfloor.f32 %v2624_v63  ;;  %v3070_v13 = vpack.c.bf16 %v5135_v9, %v5134_v40 }
 0x391   : > { %v5457_v22 = vpop.eup %5456  ;;  %v3072_v26 = vpack.c.bf16 %v5139_v5, %v5138_v12  ;;  %vm2578_vm10 = vcmp.gt.f32.partialorder %v2564_v21, %v7236_v28  ;;  %v2586_v17 = vsub.f32 %v2564_v21, %v7236_v28  ;;  %v2602_v0 = vsub.f32 %v7121_v34, %v7236_v28  ;;  %v2706_v19 = vpop.xlane.xlu1 %2705 }
 0x392   : > { %v7249_v18 = vrot.slane %v5340_v7, %v6045_v24  ;;  %v5359_v44 = vtrunc.f32 %v2785_v23  ;;  %v2640_v49 = vmax.f32 %v2632_v10, 0.0  ;;  %v2751_v3 = vmul.f32 29.0, %v5457_v22  ;;  %5299 = vmatprep.subr.msk.bf16.mxu0 %vm3086_vm4, %v3070_v13  ;;  %v7260_v41 = vpop.xlane.xlu0 %2681 }
 0x393   : > { %5301 = vmatprep.subr.msk.bf16.mxu1 %vm3086_vm4, %v3072_v26  ;;  %v3094_v25 = vsel %vm3086_vm4, %v3070_v13, 0  ;;  %v3155_v33 = vsel %vm3086_vm4, %v3072_v26, 0  ;;  %v2594_v55 = vsel %vm2578_vm10, %v2586_v17, 1.0  ;;  %vm2976_vm2 = vcmp.eq.s32.totalorder %v7212_v31, %v6068_v35 }
 0x394   : > { %v5360_v57 = vcvt.f32.s32 %v5359_v44  ;;  %v2648_v29 = vmin.f32 %v2640_v49, 29.0  ;;  %v2762_v39 = vmul.f32 %v2751_v3, %v2738_v20  ;;  %5220 = vmatpush3.bf16.xpose.msra.mxu0 %v3094_v25  ;;  %5228 = vmatpush3.bf16.xpose.msra.mxu1 %v3155_v33  ;;  %5462 = vrcp.f32 %v2594_v55 }
 0x395   : > { %v5459_v47 = vpop.eup %5458  ;;  %vm2977_vm3 = vcmp.eq.s32.totalorder %v7212_v31, %v6071_v36  ;;  %v5136_v43 = vsel %vm2976_vm2, 1.0, %v5791_v60  ;;  %vm2980_vm6 = vcmp.eq.s32.totalorder %v7203_v27, %v6068_v35  ;;  %vm2981_vm15 = vcmp.eq.s32.totalorder %v7203_v27, %v6071_v36  ;;  %v2567_v37 = vpop.xlane.xlu1 %2566 }
 0x396   : > { %v7270_v4 = vrot.slane %v5360_v57, %v6045_v24  ;;  %v5341_v14 = vtrunc.f32 %v2648_v29  ;;  %v2770_v20 = vfloor.f32 %v2762_v39  ;;  %v2613_v46 = vmul.f32 29.0, %v5459_v47  ;;  %v7288_v32 = vpop.xlane.xlu0 %2542 }
 0x397   : > { %v5137_v48 = vsel %vm2977_vm3, 1.0, %v5791_v60  ;;  %v5140_v58 = vsel %vm2980_vm6, 1.0, %v5791_v60  ;;  %v5141_v31 = vsel %vm2981_vm15, 1.0, %v5791_v60  ;;  %vm2830_vm0 = vcmp.eq.s32.totalorder %v7219_v45, %v5998_v15 }
 0x398   : > { %v5342_v62 = vcvt.f32.s32 %v5341_v14  ;;  %v2778_v50 = vmax.f32 %v2770_v20, 0.0  ;;  %v2625_v27 = vmul.f32 %v2613_v46, %v2601_v16  ;;  %v3071_v53 = vpack.c.bf16 %v5137_v48, %v5136_v43 }
 0x399   : > { %v5461_v6 = vpop.eup %5460  ;;  %v3073_v12 = vpack.c.bf16 %v5141_v31, %v5140_v58  ;;  %vm2831_vm12 = vcmp.eq.s32.totalorder %v7219_v45, %v6059_v30  ;;  %v5102_v56 = vsel %vm2830_vm0, 1.0, %v5791_v60  ;;  %vm2716_vm13 = vcmp.gt.f32.partialorder %v2706_v19, %v7260_v41  ;;  %v2709_v47 = vpop.xlane.xlu1 %2708 }
 0x39a   : > { %v7285_v59 = vrot.slane %v5342_v62, %v6045_v24  ;;  %v2786_v63 = vmin.f32 %v2778_v50, 29.0  ;;  %v2633_v21 = vfloor.f32 %v2625_v27  ;;  %v2753_v40 = vmul.f32 29.0, %v5461_v6  ;;  %5300 = vmatprep.subr.msk.bf16.mxu0 %vm3086_vm4, %v3071_v53  ;;  %v7320_v43 = vpop.xlane.xlu0 %2684 }
 0x39b   : > { %5302 = vmatprep.subr.msk.bf16.mxu1 %vm3086_vm4, %v3073_v12  ;;  %v5103_v16 = vsel %vm2831_vm12, 1.0, %v5791_v60  ;;  %v2724_v9 = vsub.f32 %v2706_v19, %v7260_v41  ;;  %v2740_v5 = vsub.f32 %v7130_v11, %v7260_v41  ;;  %v3097_v7 = vsel %vm3086_vm4, %v3071_v53, 0 }
 0x39c   : > { %v5361_v23 = vtrunc.f32 %v2786_v63  ;;  %v2641_v10 = vmax.f32 %v2633_v21, 0.0  ;;  %v2763_v13 = vmul.f32 %v2753_v40, %v2739_v54  ;;  %v2926_v22 = vpack.c.bf16 %v5103_v16, %v5102_v56  ;;  %5222 = vmatpush3.bf16.xpose.msra.mxu0 %v3097_v7 }
 0x39d   : > { %v2732_v26 = vsel %vm2716_vm13, %v2724_v9, 1.0  ;;  %v3158_v17 = vsel %vm3086_vm4, %v3073_v12, 0  ;;  %vm2579_vm8 = vcmp.gt.f32.partialorder %v2567_v37, %v7288_v32  ;;  %v2587_v44 = vsub.f32 %v2567_v37, %v7288_v32 }
 0x39e   : > { %v5463_v49 = vpop.eup %5462  ;;  %v5362_v3 = vcvt.f32.s32 %v5361_v23  ;;  %v2649_v25 = vmin.f32 %v2641_v10, 29.0  ;;  %v2771_v33 = vfloor.f32 %v2763_v13  ;;  %5223 = vmatprep.mubr.msk.bf16.mxu0 %vm3086_vm4, %v2926_v22  ;;  %5464 = vrcp.f32 %v2732_v26  ;;  %5230 = vmatpush3.bf16.xpose.msra.mxu1 %v3158_v17 }
 0x39f   : > { %v2615_v51 = vmul.f32 29.0, %v5463_v49  ;;  %v2595_v2 = vsel %vm2579_vm8, %v2587_v44, 1.0  ;;  %v2603_v54 = vsub.f32 %v7139_v42, %v7288_v32  ;;  %vm2982_vm11 = vcmp.eq.s32.totalorder %v7234_v61, %v5998_v15  ;;  %v2570_v32 = vpop.xlane.xlu1 %2569 }
 0x3a0   : > { %v7310_v55 = vrot.slane %v5362_v3, %v6045_v24  ;;  %v5343_v57 = vtrunc.f32 %v2649_v25  ;;  %v2779_v29 = vmax.f32 %v2771_v33, 0.0  ;;  %5466 = vrcp.f32 %v2595_v2 }
 0x3a1   : > { %v2626_v39 = vmul.f32 %v2615_v51, %v2602_v0  ;;  %vm2983_vm1 = vcmp.eq.s32.totalorder %v7234_v61, %v6059_v30  ;;  %v5142_v19 = vsel %vm2982_vm11, 1.0, %v5791_v60  ;;  %vm2834_vm5 = vcmp.eq.s32.totalorder %v7249_v18, %v5998_v15 }
 0x3a2   : > { %v5344_v14 = vcvt.f32.s32 %v5343_v57  ;;  %v2787_v20 = vmin.f32 %v2779_v29, 29.0  ;;  %v5143_v46 = vsel %vm2983_vm1, 1.0, %v5791_v60  ;;  %vm2835_vm9 = vcmp.eq.s32.totalorder %v7249_v18, %v6059_v30 }
 0x3a3   : > { %v2634_v34 = vfloor.f32 %v2626_v39  ;;  %v3074_v28 = vpack.c.bf16 %v5143_v46, %v5142_v19  ;;  %v5106_v0 = vsel %vm2834_vm5, 1.0, %v5791_v60  ;;  %v5107_v48 = vsel %vm2835_vm9, 1.0, %v5791_v60 }
 0x3a4   : > { %v7328_v58 = vrot.slane %v5344_v14, %v6045_v24  ;;  %v5363_v31 = vtrunc.f32 %v2787_v20  ;;  %v2928_v62 = vpack.c.bf16 %v5107_v48, %v5106_v0  ;;  %vm2717_vm7 = vcmp.gt.f32.partialorder %v2709_v47, %v7320_v43 }
 0x3a5   : > { %v2642_v50 = vmax.f32 %v2634_v34, 0.0  ;;  %5303 = vmatprep.subr.msk.bf16.mxu0 %vm3086_vm4, %v3074_v28  ;;  %v2725_v27 = vsub.f32 %v2709_v47, %v7320_v43  ;;  %v2741_v53 = vsub.f32 %v7148_v38, %v7320_v43  ;;  %vm2832_vm10 = vcmp.eq.s32.totalorder %v7219_v45, %v6068_v35 }
 0x3a6   : > { %v5364_v6 = vcvt.f32.s32 %v5363_v31  ;;  %5231 = vmatprep.mubr.msk.bf16.mxu1 %vm3086_vm4, %v2928_v62  ;;  %vm2833_vm2 = vcmp.eq.s32.totalorder %v7219_v45, %v6071_v36  ;;  %v5104_v12 = vsel %vm2832_vm10, 1.0, %v5791_v60  ;;  %vm2836_vm3 = vcmp.eq.s32.totalorder %v7249_v18, %v6068_v35 }
 0x3a7   : > { %v2650_v56 = vmin.f32 %v2642_v50, 29.0  ;;  %v2733_v63 = vsel %vm2717_vm7, %v2725_v27, 1.0  ;;  %v5105_v21 = vsel %vm2833_vm2, 1.0, %v5791_v60  ;;  %vm2837_vm6 = vcmp.eq.s32.totalorder %v7249_v18, %v6071_v36 }
 0x3a8   : > { %v5465_v40 = vpop.eup %5464  ;;  %v7347_v37 = vrot.slane %v5364_v6, %v6045_v24  ;;  %5468 = vrcp.f32 %v2733_v63  ;;  %v2927_v16 = vpack.c.bf16 %v5105_v21, %v5104_v12  ;;  %v5108_v45 = vsel %vm2836_vm3, 1.0, %v5791_v60  ;;  %v2573_v63 = vpop.xlane.xlu1 %2572 }
 0x3a9   : > { %v5345_v9 = vtrunc.f32 %v2650_v56  ;;  %v2755_v7 = vmul.f32 29.0, %v5465_v40  ;;  %v5109_v23 = vsel %vm2837_vm6, 1.0, %v5791_v60  ;;  %vm2986_vm15 = vcmp.eq.s32.totalorder %v7270_v4, %v5998_v15 }
 0x3aa   : > { %v5467_v10 = vpop.eup %5466  ;;  %5224 = vmatmul.mubr.msk.bf16.vlgmr.msra.gmra.mrb[0].mxu0 %vm3086_vm4, %v2927_v16  ;;  %v2929_v13 = vpack.c.bf16 %v5109_v23, %v5108_v45  ;;  %vm2987_vm0 = vcmp.eq.s32.totalorder %v7270_v4, %v6059_v30  ;;  %v5146_v18 = vsel %vm2986_vm15, 1.0, %v5791_v60  ;;  %v3216_v22 = vsel %vm3086_vm4, %v3074_v28, 0 }
 0x3ab   : > { %v5346_v26 = vcvt.f32.s32 %v5345_v9  ;;  %v2764_v17 = vmul.f32 %v2755_v7, %v2740_v5  ;;  %v2617_v44 = vmul.f32 29.0, %v5467_v10  ;;  %v5147_v49 = vsel %vm2987_vm0, 1.0, %v5791_v60  ;;  %5236 = vmatpush3.bf16.xpose.msra.mxu0 %v3216_v22 }
 0x3ac   : > { %5232 = vmatmul.mubr.msk.bf16.vlgmr.msra.gmra.mrb[0].mxu1 %vm3086_vm4, %v2929_v13  ;;  %v3076_v3 = vpack.c.bf16 %v5147_v49, %v5146_v18  ;;  %vm2984_vm12 = vcmp.eq.s32.totalorder %v7234_v61, %v6068_v35  ;;  %vm2985_vm13 = vcmp.eq.s32.totalorder %v7234_v61, %v6071_v36  ;;  %vm2988_vm8 = vcmp.eq.s32.totalorder %v7270_v4, %v6068_v35 }
 0x3ad   : > { %v7370_v25 = vrot.slane %v5346_v26, %v6045_v24  ;;  %v2772_v11 = vfloor.f32 %v2764_v17  ;;  %v2627_v41 = vmul.f32 %v2617_v44, %v2603_v54  ;;  %v5144_v5 = vsel %vm2984_vm12, 1.0, %v5791_v60  ;;  %v7383_v54 = vpop.xlane.xlu0 %2545 }
 0x3ae   : > { %5305 = vmatprep.subr.msk.bf16.mxu1 %vm3086_vm4, %v3076_v3  ;;  %v3277_v33 = vsel %vm3086_vm4, %v3076_v3, 0  ;;  %v5145_v51 = vsel %vm2985_vm13, 1.0, %v5791_v60  ;;  %vm2989_vm11 = vcmp.eq.s32.totalorder %v7270_v4, %v6071_v36  ;;  %v5148_v61 = vsel %vm2988_vm8, 1.0, %v5791_v60 }
 0x3af   : > { %v2780_v2 = vmax.f32 %v2772_v11, 0.0  ;;  %v2635_v57 = vfloor.f32 %v2627_v41  ;;  %5244 = vmatpush3.bf16.xpose.msra.mxu1 %v3277_v33  ;;  %v3075_v29 = vpack.c.bf16 %v5145_v51, %v5144_v5  ;;  %v5149_v42 = vsel %vm2989_vm11, 1.0, %v5791_v60 }
 0x3b0   : > { %v3077_v39 = vpack.c.bf16 %v5149_v42, %v5148_v61  ;;  %vm2838_vm1 = vcmp.eq.s32.totalorder %v7285_v59, %v5998_v15  ;;  %vm2839_vm5 = vcmp.eq.s32.totalorder %v7285_v59, %v6059_v30  ;;  %vm2580_vm9 = vcmp.gt.f32.partialorder %v2570_v32, %v7383_v54 }
 0x3b1   : > { %v2788_v4 = vmin.f32 %v2780_v2, 29.0  ;;  %v2643_v19 = vmax.f32 %v2635_v57, 0.0  ;;  %5304 = vmatprep.subr.msk.bf16.mxu0 %vm3086_vm4, %v3075_v29  ;;  %v5110_v47 = vsel %vm2838_vm1, 1.0, %v5791_v60  ;;  %v5111_v14 = vsel %vm2839_vm5, 1.0, %v5791_v60  ;;  %v7411_v21 = vpop.xlane.xlu0 %2548 }
 0x3b2   : > { %v5469_v20 = vpop.eup %5468  ;;  %5306 = vmatprep.subr.msk.bf16.mxu1 %vm3086_vm4, %v3077_v39  ;;  %v2930_v46 = vpack.c.bf16 %v5111_v14, %v5110_v47  ;;  %v2588_v34 = vsub.f32 %v2570_v32, %v7383_v54  ;;  %v2604_v28 = vsub.f32 %v7157_v1, %v7383_v54  ;;  %v3219_v0 = vsel %vm3086_vm4, %v3075_v29, 0 }
 0x3b3   : > { %v5365_v48 = vtrunc.f32 %v2788_v4  ;;  %v2651_v31 = vmin.f32 %v2643_v19, 29.0  ;;  %v2757_v62 = vmul.f32 29.0, %v5469_v20  ;;  %5238 = vmatpush3.bf16.xpose.msra.mxu0 %v3219_v0  ;;  %v3280_v50 = vsel %vm3086_vm4, %v3077_v39, 0 }
 0x3b4   : > { %5239 = vmatprep.mubr.msk.bf16.mxu0 %vm3086_vm4, %v2930_v46  ;;  %v2596_v27 = vsel %vm2580_vm9, %v2588_v34, 1.0  ;;  %vm2990_vm7 = vcmp.eq.s32.totalorder %v7310_v55, %v5998_v15  ;;  %vm2991_vm10 = vcmp.eq.s32.totalorder %v7310_v55, %v6059_v30  ;;  %vm2842_vm2 = vcmp.eq.s32.totalorder %v7328_v58, %v5998_v15 }
 0x3b5   : > { %v5366_v6 = vcvt.f32.s32 %v5365_v48  ;;  %v5347_v12 = vtrunc.f32 %v2651_v31  ;;  %v2765_v56 = vmul.f32 %v2757_v62, %v2741_v53  ;;  %5470 = vrcp.f32 %v2596_v27 }
 0x3b6   : > { %v5150_v40 = vsel %vm2990_vm7, 1.0, %v5791_v60  ;;  %v5151_v16 = vsel %vm2991_vm10, 1.0, %v5791_v60  ;;  %vm2843_vm3 = vcmp.eq.s32.totalorder %v7328_v58, %v6059_v30  ;;  %v5114_v45 = vsel %vm2842_vm2, 1.0, %v5791_v60 }
 0x3b7   : > { %v7419_v9 = vrot.slane %v5366_v6, %v6045_v24  ;;  %v5348_v7 = vcvt.f32.s32 %v5347_v12  ;;  %v2773_v23 = vfloor.f32 %v2765_v56  ;;  %5246 = vmatpush3.bf16.xpose.msra.mxu1 %v3280_v50  ;;  %v3078_v38 = vpack.c.bf16 %v5151_v16, %v5150_v40 }
 0x3b8   : > { %v5115_v43 = vsel %vm2843_vm3, 1.0, %v5791_v60  ;;  %vm2581_vm6 = vcmp.gt.f32.partialorder %v2573_v63, %v7411_v21  ;;  %v2589_v53 = vsub.f32 %v2573_v63, %v7411_v21  ;;  %v2605_v10 = vsub.f32 %v7166_v52, %v7411_v21 }
 0x3b9   : > { %v7427_v13 = vrot.slane %v5348_v7, %v6045_v24  ;;  %v2781_v18 = vmax.f32 %v2773_v23, 0.0  ;;  %5307 = vmatprep.subr.msk.bf16.mxu0 %vm3086_vm4, %v3078_v38  ;;  %v2932_v22 = vpack.c.bf16 %v5115_v43, %v5114_v45  ;;  %vm2840_vm15 = vcmp.eq.s32.totalorder %v7285_v59, %v6068_v35 }
 0x3ba   : > { %v2597_v26 = vsel %vm2581_vm6, %v2589_v53, 1.0  ;;  %vm2841_vm0 = vcmp.eq.s32.totalorder %v7285_v59, %v6071_v36  ;;  %v5112_v17 = vsel %vm2840_vm15, 1.0, %v5791_v60  ;;  %vm2844_vm12 = vcmp.eq.s32.totalorder %v7328_v58, %v6068_v35 }
 0x3bb   : > { %v2789_v44 = vmin.f32 %v2781_v18, 29.0  ;;  %5247 = vmatprep.mubr.msk.bf16.mxu1 %vm3086_vm4, %v2932_v22  ;;  %5472 = vrcp.f32 %v2597_v26  ;;  %v5113_v49 = vsel %vm2841_vm0, 1.0, %v5791_v60  ;;  %vm2845_vm13 = vcmp.eq.s32.totalorder %v7328_v58, %v6071_v36 }
 0x3bc   : > { %v2931_v3 = vpack.c.bf16 %v5113_v49, %v5112_v17  ;;  %v5116_v11 = vsel %vm2844_vm12, 1.0, %v5791_v60  ;;  %v5117_v41 = vsel %vm2845_vm13, 1.0, %v5791_v60  ;;  %vm2994_vm8 = vcmp.eq.s32.totalorder %v7347_v37, %v5998_v15 }
 0x3bd   : > { %v5367_v59 = vtrunc.f32 %v2789_v44  ;;  %v2933_v5 = vpack.c.bf16 %v5117_v41, %v5116_v11  ;;  %vm2995_vm11 = vcmp.eq.s32.totalorder %v7347_v37, %v6059_v30  ;;  %v5154_v33 = vsel %vm2994_vm8, 1.0, %v5791_v60 }
 0x3be   : > { %5240 = vmatmul.mubr.msk.bf16.vlgmr.msra.gmra.mrb[4].mxu0 %vm3086_vm4, %v2931_v3  ;;  %v5155_v51 = vsel %vm2995_vm11, 1.0, %v5791_v60  ;;  %v3338_v58 = vsel %vm3086_vm4, %v3078_v38, 0  ;;  %vm2992_vm1 = vcmp.eq.s32.totalorder %v7310_v55, %v6068_v35  ;;  %vm2993_vm5 = vcmp.eq.s32.totalorder %v7310_v55, %v6071_v36 }
 0x3bf   : > { %v5471_v61 = vpop.eup %5470  ;;  %v5368_v2 = vcvt.f32.s32 %v5367_v59  ;;  %5248 = vmatmul.mubr.msk.bf16.vlgmr.msra.gmra.mrb[4].mxu1 %vm3086_vm4, %v2933_v5  ;;  %v3080_v57 = vpack.c.bf16 %v5155_v51, %v5154_v33  ;;  %5252 = vmatpush3.bf16.xpose.msra.mxu0 %v3338_v58  ;;  %v5152_v29 = vsel %vm2992_vm1, 1.0, %v5791_v60  ;;  %v5153_v42 = vsel %vm2993_vm5, 1.0, %v5791_v60 }
 0x3c0   : > { %v2619_v32 = vmul.f32 29.0, %v5471_v61  ;;  %v3079_v39 = vpack.c.bf16 %v5153_v42, %v5152_v29  ;;  %vm2996_vm9 = vcmp.eq.s32.totalorder %v7347_v37, %v6068_v35  ;;  %vm2997_vm7 = vcmp.eq.s32.totalorder %v7347_v37, %v6071_v36 }
 0x3c1   : > { %v7463_v55 = vrot.slane %v5368_v2, %v6045_v24  ;;  %5309 = vmatprep.subr.msk.bf16.mxu1 %vm3086_vm4, %v3080_v57  ;;  %v3399_v4 = vsel %vm3086_vm4, %v3080_v57, 0  ;;  %v5156_v19 = vsel %vm2996_vm9, 1.0, %v5791_v60  ;;  %v5157_v47 = vsel %vm2997_vm7, 1.0, %v5791_v60 }
 0x3c2   : > { %v2628_v14 = vmul.f32 %v2619_v32, %v2604_v28  ;;  %5260 = vmatpush3.bf16.xpose.msra.mxu1 %v3399_v4  ;;  %5308 = vmatprep.subr.msk.bf16.mxu0 %vm3086_vm4, %v3079_v39  ;;  %v3081_v20 = vpack.c.bf16 %v5157_v47, %v5156_v19  ;;  %vm2846_vm10 = vcmp.eq.s32.totalorder %v7370_v25, %v5998_v15  ;;  %v3341_v37 = vsel %vm3086_vm4, %v3079_v39, 0 }
 0x3c3   : > { %vm2847_vm2 = vcmp.eq.s32.totalorder %v7370_v25, %v6059_v30  ;;  %v5118_v46 = vsel %vm2846_vm10, 1.0, %v5791_v60  ;;  %vm2998_vm3 = vcmp.eq.s32.totalorder %v7419_v9, %v5998_v15  ;;  %vm2999_vm6 = vcmp.eq.s32.totalorder %v7419_v9, %v6059_v30 }
 0x3c4   : > { %v2636_v1 = vfloor.f32 %v2628_v14  ;;  %5310 = vmatprep.subr.msk.bf16.mxu1 %vm3086_vm4, %v3081_v20  ;;  %v5119_v54 = vsel %vm2847_vm2, 1.0, %v5791_v60  ;;  %v3402_v34 = vsel %vm3086_vm4, %v3081_v20, 0  ;;  %v5158_v28 = vsel %vm2998_vm3, 1.0, %v5791_v60 }
 0x3c5   : > { %v5473_v0 = vpop.eup %5472  ;;  %v2934_v48 = vpack.c.bf16 %v5119_v54, %v5118_v46  ;;  %v5159_v31 = vsel %vm2999_vm6, 1.0, %v5791_v60  ;;  %vm2850_vm15 = vcmp.eq.s32.totalorder %v7427_v13, %v5998_v15  ;;  %vm2851_vm0 = vcmp.eq.s32.totalorder %v7427_v13, %v6059_v30 }
 0x3c6   : > { %v2644_v62 = vmax.f32 %v2636_v1, 0.0  ;;  %v2621_v50 = vmul.f32 29.0, %v5473_v0  ;;  %v3082_v27 = vpack.c.bf16 %v5159_v31, %v5158_v28  ;;  %v5122_v6 = vsel %vm2850_vm15, 1.0, %v5791_v60 }
 0x3c7   : > { %5255 = vmatprep.mubr.msk.bf16.mxu0 %vm3086_vm4, %v2934_v48  ;;  %5254 = vmatpush3.bf16.xpose.msra.mxu0 %v3341_v37  ;;  %v5123_v12 = vsel %vm2851_vm0, 1.0, %v5791_v60  ;;  %vm2848_vm12 = vcmp.eq.s32.totalorder %v7370_v25, %v6068_v35  ;;  %vm2849_vm13 = vcmp.eq.s32.totalorder %v7370_v25, %v6071_v36  ;;  %vm2852_vm8 = vcmp.eq.s32.totalorder %v7427_v13, %v6068_v35 }
 0x3c8   : > { %v2652_v56 = vmin.f32 %v2644_v62, 29.0  ;;  %v2629_v63 = vmul.f32 %v2621_v50, %v2605_v10  ;;  %5311 = vmatprep.subr.msk.bf16.mxu0 %vm3086_vm4, %v3082_v27  ;;  %v2936_v40 = vpack.c.bf16 %v5123_v12, %v5122_v6  ;;  %v5120_v16 = vsel %vm2848_vm12, 1.0, %v5791_v60 }
 0x3c9   : > { %v5121_v45 = vsel %vm2849_vm13, 1.0, %v5791_v60  ;;  %vm2853_vm11 = vcmp.eq.s32.totalorder %v7427_v13, %v6071_v36  ;;  %v5124_v25 = vsel %vm2852_vm8, 1.0, %v5791_v60  ;;  %vm3002_vm1 = vcmp.eq.s32.totalorder %v7463_v55, %v5998_v15 }
 0x3ca   : > { %v5349_v7 = vtrunc.f32 %v2652_v56  ;;  %v2637_v23 = vfloor.f32 %v2629_v63  ;;  %5262 = vmatpush3.bf16.xpose.msra.mxu1 %v3402_v34  ;;  %5263 = vmatprep.mubr.msk.bf16.mxu1 %vm3086_vm4, %v2936_v40  ;;  %v2935_v52 = vpack.c.bf16 %v5121_v45, %v5120_v16  ;;  %v5125_v21 = vsel %vm2853_vm11, 1.0, %v5791_v60 }
 0x3cb   : > { %v2937_v38 = vpack.c.bf16 %v5125_v21, %v5124_v25  ;;  %vm3003_vm5 = vcmp.eq.s32.totalorder %v7463_v55, %v6059_v30  ;;  %v5162_v43 = vsel %vm3002_vm1, 1.0, %v5791_v60  ;;  %v3460_v53 = vsel %vm3086_vm4, %v3082_v27, 0 }
 0x3cc   : > { %v5350_v10 = vcvt.f32.s32 %v5349_v7  ;;  %v2645_v13 = vmax.f32 %v2637_v23, 0.0  ;;  %v5163_v18 = vsel %vm3003_vm5, 1.0, %v5791_v60  ;;  %vm3000_vm9 = vcmp.eq.s32.totalorder %v7419_v9, %v6068_v35 }
 0x3cd   : > { %v3084_v22 = vpack.c.bf16 %v5163_v18, %v5162_v43  ;;  %vm3001_vm7 = vcmp.eq.s32.totalorder %v7419_v9, %v6071_v36  ;;  %v5160_v26 = vsel %vm3000_vm9, 1.0, %v5791_v60  ;;  %vm3004_vm10 = vcmp.eq.s32.totalorder %v7463_v55, %v6068_v35 }
 0x3ce   : > { %v2825_v17 = vrot.slane %v5350_v10, %v6045_v24  ;;  %v2653_v44 = vmin.f32 %v2645_v13, 29.0  ;;  %5256 = vmatmul.mubr.msk.bf16.vlgmr.msra.gmra.mrb[8].mxu0 %vm3086_vm4, %v2935_v52  ;;  %v5161_v49 = vsel %vm3001_vm7, 1.0, %v5791_v60  ;;  %vm3005_vm2 = vcmp.eq.s32.totalorder %v7463_v55, %v6071_v36 }
 0x3cf   : > { %5313 = vmatprep.subr.msk.bf16.mxu1 %vm3086_vm4, %v3084_v22  ;;  %5268 = vmatpush3.bf16.xpose.msra.mxu0 %v3460_v53  ;;  %v3521_v9 = vsel %vm3086_vm4, %v3084_v22, 0  ;;  %v3083_v3 = vpack.c.bf16 %v5161_v49, %v5160_v26  ;;  %v5164_v11 = vsel %vm3004_vm10, 1.0, %v5791_v60  ;;  %v5165_v41 = vsel %vm3005_vm2, 1.0, %v5791_v60 }
 0x3d0   : > { %v5351_v59 = vtrunc.f32 %v2653_v44  ;;  %v3085_v5 = vpack.c.bf16 %v5165_v41, %v5164_v11  ;;  %vm2854_vm3 = vcmp.eq.s32.totalorder %v2825_v17, %v5998_v15  ;;  %vm2855_vm6 = vcmp.eq.s32.totalorder %v2825_v17, %v6059_v30 }
 0x3d1   : > { %5264 = vmatmul.mubr.msk.bf16.vlgmr.msra.gmra.mrb[8].mxu1 %vm3086_vm4, %v2937_v38  ;;  %5312 = vmatprep.subr.msk.bf16.mxu0 %vm3086_vm4, %v3083_v3  ;;  %v5126_v33 = vsel %vm2854_vm3, 1.0, %v5791_v60  ;;  %v5127_v51 = vsel %vm2855_vm6, 1.0, %v5791_v60  ;;  %v3463_v57 = vsel %vm3086_vm4, %v3083_v3, 0  ;;  %vm2856_vm12 = vcmp.eq.s32.totalorder %v2825_v17, %v6068_v35 }
 0x3d2   : > { %v5352_v58 = vcvt.f32.s32 %v5351_v59  ;;  %5276 = vmatpush3.bf16.xpose.msra.mxu1 %v3521_v9  ;;  %v2938_v61 = vpack.c.bf16 %v5127_v51, %v5126_v33  ;;  %vm2857_vm13 = vcmp.eq.s32.totalorder %v2825_v17, %v6071_v36  ;;  %v3524_v32 = vsel %vm3086_vm4, %v3085_v5, 0 }
 0x3d3   : > { %5314 = vmatprep.subr.msk.bf16.mxu1 %vm3086_vm4, %v3085_v5  ;;  %vm3575_vm1 = vcmask 261120  }
 0x3d4   : > { %v2829_v2 = vrot.slane %v5352_v58, %v6045_v24  ;;  %5271 = vmatprep.mubr.msk.bf16.mxu0 %vm3086_vm4, %v2938_v61 }
 0x3d6   : > { %vm2858_vm15 = vcmp.eq.s32.totalorder %v2829_v2, %v5998_v15  ;;  %vm2859_vm0 = vcmp.eq.s32.totalorder %v2829_v2, %v6059_v30  ;;  %vm2860_vm8 = vcmp.eq.s32.totalorder %v2829_v2, %v6068_v35  ;;  %vm2861_vm11 = vcmp.eq.s32.totalorder %v2829_v2, %v6071_v36 }
 0x3d7   : > { %5270 = vmatpush3.bf16.xpose.msra.mxu0 %v3463_v57  ;;  %v5130_v29 = vsel %vm2858_vm15, 1.0, %v5791_v60  ;;  %v5131_v42 = vsel %vm2859_vm0, 1.0, %v5791_v60  ;;  %v5128_v15 = vsel %vm2856_vm12, 1.0, %v5791_v60  ;;  %v5129_v30 = vsel %vm2857_vm13, 1.0, %v5791_v60 }
 0x3d8   : > { %v2940_v24 = vpack.c.bf16 %v5131_v42, %v5130_v29  ;;  %v5132_v39 = vsel %vm2860_vm8, 1.0, %v5791_v60  ;;  %v5133_v55 = vsel %vm2861_vm11, 1.0, %v5791_v60  ;;  %v2939_v4 = vpack.c.bf16 %v5129_v30, %v5128_v15 }
 0x3d9   : > { %v2941_v19 = vpack.c.bf16 %v5133_v55, %v5132_v39  ;;  %v5792_v35 = vmov 0  }
 0x3da   : > { %5278 = vmatpush3.bf16.xpose.msra.mxu1 %v3524_v32  ;;  %5279 = vmatprep.mubr.msk.bf16.mxu1 %vm3086_vm4, %v2940_v24 }
 0x3db   : > { %5440 = vset.pattern.permute.xlu1 %v5792_v35  ;;  %5441 = vset.pattern.permute.xlu0 %v5792_v35 }
 0x3de   : > { %5272 = vmatmul.mubr.msk.bf16.vlgmr.msra.gmra.mrb[12].mxu0 %vm3086_vm4, %v2939_v4 }
 0x3e1   : > { %5280 = vmatmul.mubr.msk.bf16.vlgmr.msra.gmra.mrb[12].mxu1 %vm3086_vm4, %v2941_v19 }
 0x47d   : > { %v7561_v47 = vpop.f32.mrb[0].mxu0 }
 0x47e   : > { %v7563_v14 = vpop.f32.mrb[1].mxu0  ;;  %v3582_v20 = vsel %vm3575_vm1, %v7561_v47, 0.0  ;;  %vm3818_vm5 = vcmp.gt.f32.partialorder %v7561_v47, 0.0 }
 0x47f   : > { %v7567_v37 = vpop.f32.mrb[0].mxu1  ;;  %3583 = vadd.xlane.f32.xlu0 %v3582_v20  ;;  %v7569_v60 = vpop.f32.mrb[2].mxu0  ;;  %v3576_v28 = vsel %vm3575_vm1, %v7563_v14, 0.0  ;;  %vm3816_vm7 = vcmp.gt.f32.partialorder %v7563_v14, 0.0 }
 0x480   : > { %v7571_v46 = vpop.f32.mrb[1].mxu1  ;;  %v3594_v1 = vsel %vm3575_vm1, %v7567_v37, 0.0  ;;  %v7575_v54 = vpop.f32.mrb[3].mxu0  ;;  %v3585_v56 = vsel %vm3575_vm1, %v7569_v60, 0.0  ;;  %vm3822_vm9 = vcmp.gt.f32.partialorder %v7567_v37, 0.0  ;;  %vm3819_vm6 = vcmp.gt.f32.partialorder %v7569_v60, 0.0 }
 0x481   : > { %3595 = vadd.xlane.f32.xlu1 %v3594_v1  ;;  %v7577_v34 = vpop.f32.mrb[2].mxu1  ;;  %v3579_v0 = vsel %vm3575_vm1, %v7575_v54, 0.0  ;;  %v3588_v62 = vsel %vm3575_vm1, %v7571_v46, 0.0  ;;  %vm3820_vm2 = vcmp.gt.f32.partialorder %v7571_v46, 0.0  ;;  %vm3817_vm3 = vcmp.gt.f32.partialorder %v7575_v54, 0.0 }
 0x482   : > { %v7583_v48 = vpop.f32.mrb[3].mxu1  ;;  %v3672_v31 = vadd.f32 %v3579_v0, %v3576_v28  ;;  %v3597_v27 = vsel %vm3575_vm1, %v7577_v34, 0.0  ;;  %vm3823_vm10 = vcmp.gt.f32.partialorder %v7577_v34, 0.0 }
 0x483   : > { %8757 = vst [vmem:[#allocation15_spill] sm:$0xff] %v7583_v48  ;;  %3577 = vadd.xlane.f32.xlu0 %v3576_v28  ;;  %v3591_v50 = vsel %vm3575_vm1, %v7583_v48, 0.0  ;;  %vm3821_vm15 = vcmp.gt.f32.partialorder %v7583_v48, 0.0 }
 0x484   : > { %v3673_v6 = vadd.f32 %v3672_v31, %v3582_v20  ;;  %v3681_v12 = vadd.f32 %v3591_v50, %v3588_v62 }
 0x485   : > { %3598 = vadd.xlane.f32.xlu1 %v3597_v27 }
 0x486   : > { %v7593_v63 = vadd.f32 %v3673_v6, %v3585_v56  ;;  %v3682_v40 = vadd.f32 %v3681_v12, %v3594_v1 }
 0x487   : > { %3589 = vadd.xlane.f32.xlu0 %v3588_v62 }
 0x488   : > { %v7595_v16 = vadd.f32 %v3682_v40, %v3597_v27 }
 0x489   : > { %3580 = vadd.xlane.f32.xlu1 %v3579_v0 }
 0x48b   : > { %3586 = vadd.xlane.f32.xlu0 %v3585_v56 }
 0x48d   : > { %3592 = vadd.xlane.f32.xlu1 %v3591_v50 }
 0x491   : > { %v7597_v45 = vpop.f32.mrb[4].mxu0 }
 0x492   : > { %8758 = vst [vmem:[#allocation16_spill] sm:$0xff] %v7597_v45  ;;  %v7599_v25 = vpop.f32.mrb[4].mxu1  ;;  %v7601_v7 = vpop.f32.mrb[5].mxu0  ;;  %v3606_v23 = vsel %vm3575_vm1, %v7597_v45, 0.0  ;;  %vm3826_vm13 = vcmp.gt.f32.partialorder %v7597_v45, 0.0 }
 0x493   : > { %8759 = vst [vmem:[#allocation17_spill] sm:$0xff] %v7599_v25  ;;  %8760 = vst [vmem:[#allocation18_spill] sm:$0xff] %v7601_v7  ;;  %v7605_v52 = vpop.f32.mrb[5].mxu1  ;;  %3607 = vadd.xlane.f32.xlu0 %v3606_v23  ;;  %v7607_v21 = vpop.f32.mrb[6].mxu0  ;;  %v3618_v13 = vsel %vm3575_vm1, %v7599_v25, 0.0  ;;  %v3600_v22 = vsel %vm3575_vm1, %v7601_v7, 0.0 }
 0x494   : > { %8761 = vst [vmem:[#allocation19_spill] sm:$0xff] %v7605_v52  ;;  %8762 = vst [vmem:[#allocation20_spill] sm:$0xff] %v7607_v21  ;;  %v7609_v38 = vpop.f32.mrb[6].mxu1  ;;  %v7611_v43 = vpop.f32.mrb[7].mxu0  ;;  %v3612_v53 = vsel %vm3575_vm1, %v7605_v52, 0.0  ;;  %v3609_v44 = vsel %vm3575_vm1, %v7607_v21, 0.0 }
 0x495   : > { %8763 = vst [vmem:[#allocation21_spill] sm:$0xff] %v7609_v38  ;;  %8764 = vst [vmem:[#allocation22_spill] sm:$0xff] %v7611_v43  ;;  %v7615_v10 = vpop.f32.mrb[7].mxu1  ;;  %3613 = vadd.xlane.f32.xlu1 %v3612_v53  ;;  %v3603_v17 = vsel %vm3575_vm1, %v7611_v43, 0.0  ;;  %v3621_v3 = vsel %vm3575_vm1, %v7609_v38, 0.0  ;;  %vm8668_vm8 = vcmp.gt.f32.partialorder %v7605_v52, 0.0 }
 0x496   : > { %8765 = vst [vmem:[#allocation23_spill] sm:$0xff] %v7615_v10  ;;  %v3615_v18 = vsel %vm3575_vm1, %v7615_v10, 0.0  ;;  %v3690_v49 = vadd.f32 %v3603_v17, %v3600_v22  ;;  %vm8652_vm11 = vcmp.gt.f32.partialorder %v7599_v25, 0.0  ;;  %vm8663_vm14 = vcmp.gt.f32.partialorder %v7611_v43, 0.0 }
 0x497   : > { %3619 = vadd.xlane.f32.xlu0 %v3618_v13  ;;  %v3699_v26 = vadd.f32 %v3615_v18, %v3612_v53 }
 0x498   : > { %v3691_v11 = vadd.f32 %v3690_v49, %v3606_v23 }
 0x499   : > { %3610 = vadd.xlane.f32.xlu1 %v3609_v44  ;;  %v3700_v9 = vadd.f32 %v3699_v26, %v3618_v13  ;;  %v2264_v13 = vld [vmem:[#allocation3] sm:$0xff] }
 0x49a   : > { %v7631_v59 = vadd.f32 %v3691_v11, %v3609_v44 }
 0x49b   : > { %3601 = vadd.xlane.f32.xlu0 %v3600_v22  ;;  %v7629_v41 = vadd.f32 %v3700_v9, %v3621_v3  ;;  %v2268_v22 = vmul.f32 0.0009765625, %v2264_v13 }
 0x49d   : > { %3622 = vadd.xlane.f32.xlu1 %v3621_v3  ;;  %vm2312_vm4 = vcmp.eq.f32.partialorder %v2268_v22, 0.0 }
 0x49f   : > { %3616 = vadd.xlane.f32.xlu0 %v3615_v18 }
 0x4a1   : > { %v7633_v5 = vpop.f32.mrb[8].mxu0  ;;  %3604 = vadd.xlane.f32.xlu1 %v3603_v17 }
 0x4a2   : > { %8766 = vst [vmem:[#allocation24_spill] sm:$0xff] %v7633_v5  ;;  %v7635_v33 = vpop.f32.mrb[9].mxu0  ;;  %v3630_v51 = vsel %vm3575_vm1, %v7633_v5, 0.0 }
 0x4a3   : > { %8767 = vst [vmem:[#allocation25_spill] sm:$0xff] %v7635_v33  ;;  %3631 = vadd.xlane.f32.xlu0 %v3630_v51  ;;  %v7639_v58 = vpop.f32.mrb[10].mxu0  ;;  %v3624_v61 = vsel %vm3575_vm1, %v7635_v33, 0.0 }
 0x4a4   : > { %8768 = vst [vmem:[#allocation26_spill] sm:$0xff] %v7639_v58  ;;  %v7643_v2 = vpop.f32.mrb[8].mxu1  ;;  %v7645_v57 = vpop.f32.mrb[11].mxu0  ;;  %v3633_v35 = vsel %vm3575_vm1, %v7639_v58, 0.0 }
 0x4a5   : > { %8769 = vst [vmem:[#allocation27_spill] sm:$0xff] %v7643_v2  ;;  %8770 = vst [vmem:[#allocation28_spill] sm:$0xff] %v7645_v57  ;;  %v7647_v29 = vpop.f32.mrb[9].mxu1  ;;  %3625 = vadd.xlane.f32.xlu1 %v3624_v61  ;;  %v3642_v24 = vsel %vm3575_vm1, %v7643_v2, 0.0  ;;  %v3627_v32 = vsel %vm3575_vm1, %v7645_v57, 0.0 }
 0x4a6   : > { %8771 = vst [vmem:[#allocation29_spill] sm:$0xff] %v7647_v29  ;;  %v7649_v42 = vpop.f32.mrb[10].mxu1  ;;  %v3708_v30 = vadd.f32 %v3627_v32, %v3624_v61  ;;  %v3636_v39 = vsel %vm3575_vm1, %v7647_v29, 0.0 }
 0x4a7   : > { %8772 = vst [vmem:[#allocation30_spill] sm:$0xff] %v7649_v42  ;;  %v7655_v15 = vpop.f32.mrb[11].mxu1  ;;  %3643 = vadd.xlane.f32.xlu0 %v3642_v24  ;;  %v3645_v28 = vsel %vm3575_vm1, %v7649_v42, 0.0 }
 0x4a8   : > { %8773 = vst [vmem:[#allocation31_spill] sm:$0xff] %v7655_v15  ;;  %v3639_v55 = vsel %vm3575_vm1, %v7655_v15, 0.0  ;;  %v3709_v4 = vadd.f32 %v3708_v30, %v3630_v51  ;;  %v2316_v30 = vsel %vm2312_vm4, 1e-10, %v2268_v22  ;;  %vm8650_vm4 = vcmp.gt.f32.partialorder %v7607_v21, 0.0 }
 0x4a9   : > { %v3717_v19 = vadd.f32 %v3639_v55, %v3636_v39  ;;  %3637 = vadd.xlane.f32.xlu1 %v3636_v39  ;;  %5474 = vlog2.f32 %v2316_v30  ;;  %v3675_v39 = vrot.slane %v7593_v63, 4 }
 0x4aa   : > { %v7663_v20 = vadd.f32 %v3709_v4, %v3633_v35 }
 0x4ab   : > { %3628 = vadd.xlane.f32.xlu0 %v3627_v32  ;;  %v3718_v1 = vadd.f32 %v3717_v19, %v3642_v24  ;;  %v3676_v4 = vadd.f32 %v3675_v39, %v7593_v63  ;;  %v3684_v19 = vrot.slane %v7595_v16, 4  ;;  %v7718_v63 = vmul.f32 0.125, %v7563_v14 }
 0x4ad   : > { %v7667_v0 = vadd.f32 %v3718_v1, %v3645_v28  ;;  %3634 = vadd.xlane.f32.xlu1 %v3633_v35  ;;  %v3677_v1 = vrot.slane %v3676_v4, 2 }
 0x4af   : > { %3640 = vadd.xlane.f32.xlu0 %v3639_v55 }
 0x4b1   : > { %v7669_v31 = vpop.f32.mrb[12].mxu0  ;;  %3646 = vadd.xlane.f32.xlu1 %v3645_v28  ;;  %v3685_v28 = vadd.f32 %v3684_v19, %v7595_v16 }
 0x4b2   : > { %8774 = vst [vmem:[#allocation32_spill] sm:$0xff] %v7669_v31  ;;  %v7671_v62 = vpop.f32.mrb[13].mxu0  ;;  %v3654_v50 = vsel %vm3575_vm1, %v7669_v31, 0.0 }
 0x4b3   : > { %8775 = vst [vmem:[#allocation33_spill] sm:$0xff] %v7671_v62  ;;  %3655 = vadd.xlane.f32.xlu0 %v3654_v50  ;;  %v7675_v27 = vpop.f32.mrb[14].mxu0  ;;  %v3648_v6 = vsel %vm3575_vm1, %v7671_v62, 0.0  ;;  %v5475_v55 = vpop.eup %5474  ;;  %v3686_v13 = vrot.slane %v3685_v28, 2 }
 0x4b4   : > { %8776 = vst [vmem:[#allocation34_spill] sm:$0xff] %v7675_v27  ;;  %v7679_v12 = vpop.f32.mrb[12].mxu1  ;;  %v7681_v56 = vpop.f32.mrb[15].mxu0  ;;  %v3657_v3 = vsel %vm3575_vm1, %v7675_v27, 0.0  ;;  %v2410_v35 = vmul.f32 0.6931472, %v5475_v55 }
 0x4b5   : > { %8777 = vst [vmem:[#allocation35_spill] sm:$0xff] %v7679_v12  ;;  %8778 = vst [vmem:[#allocation36_spill] sm:$0xff] %v7681_v56  ;;  %v7683_v40 = vpop.f32.mrb[13].mxu1  ;;  %3649 = vadd.xlane.f32.xlu1 %v3648_v6  ;;  %v3666_v53 = vsel %vm3575_vm1, %v7679_v12, 0.0  ;;  %v3651_v17 = vsel %vm3575_vm1, %v7681_v56, 0.0 }
 0x4b6   : > { %8779 = vst [vmem:[#allocation37_spill] sm:$0xff] %v7683_v40  ;;  %v7685_v23 = vpop.f32.mrb[14].mxu1  ;;  %v3660_v26 = vsel %vm3575_vm1, %v7683_v40, 0.0  ;;  %v3726_v49 = vadd.f32 %v3651_v17, %v3648_v6  ;;  %v7714_v6 = vmul.f32 0.125, %v7567_v37 }
 0x4b7   : > { %8780 = vst [vmem:[#allocation38_spill] sm:$0xff] %v7685_v23  ;;  %v7689_v18 = vpop.f32.mrb[15].mxu1  ;;  %3667 = vadd.xlane.f32.xlu0 %v3666_v53  ;;  %v3669_v61 = vsel %vm3575_vm1, %v7685_v23, 0.0 }
 0x4b8   : > { %8781 = vst [vmem:[#allocation39_spill] sm:$0xff] %v7689_v18  ;;  %v3663_v44 = vsel %vm3575_vm1, %v7689_v18, 0.0  ;;  %v3727_v11 = vadd.f32 %v3726_v49, %v3654_v50  ;;  %v7710_v50 = vmul.f32 0.125, %v7561_v47  ;;  %v3693_v49 = vrot.slane %v7631_v59, 4 }
 0x4b9   : > { %3661 = vadd.xlane.f32.xlu1 %v3660_v26  ;;  %v3735_v9 = vadd.f32 %v3663_v44, %v3660_v26  ;;  %v3687_v26 = vadd.f32 %v3686_v13, %v3685_v28 }
 0x4ba   : > { %v7701_v24 = vadd.f32 %v3727_v11, %v3657_v3  ;;  %v3850_v16 = vsel %vm3818_vm5, %v7710_v50, 1.0  ;;  %v3848_v11 = vsel %vm3816_vm7, %v7718_v63, 1.0  ;;  %v3694_v55 = vadd.f32 %v3693_v49, %v7631_v59 }
 0x4bb   : > { %3652 = vadd.xlane.f32.xlu0 %v3651_v17  ;;  %v3736_v51 = vadd.f32 %v3735_v9, %v3666_v53  ;;  %v3678_v53 = vadd.f32 %v3677_v1, %v3676_v4  ;;  %v3702_v17 = vrot.slane %v7629_v41, 4  ;;  %5476 = vlog2.f32 %v3850_v16 }
 0x4bc   : > { %v7730_v9 = vmul.f32 0.125, %v7571_v46  ;;  %v3688_v30 = vrot.slane %v3687_v26, 1  ;;  %v7747_v4 = vmul.f32 0.125, %v7569_v60  ;;  %v3695_v13 = vrot.slane %v3694_v55, 2 }
 0x4bd   : > { %3658 = vadd.xlane.f32.xlu1 %v3657_v3  ;;  %v7703_v32 = vadd.f32 %v3736_v51, %v3669_v61  ;;  %v3679_v22 = vrot.slane %v3678_v53, 1  ;;  %v7733_v3 = vmul.f32 0.125, %v7577_v34  ;;  %v7739_v51 = vmul.f32 0.125, %v7575_v54 }
 0x4be   : > { %v3703_v39 = vadd.f32 %v3702_v17, %v7629_v41  ;;  %v3852_v1 = vsel %vm3820_vm2, %v7730_v9, 1.0  ;;  %v3689_v28 = vadd.f32 %v3688_v30, %v3687_v26  ;;  %v3851_v16 = vsel %vm3819_vm6, %v7747_v4, 1.0 }
 0x4bf   : > { %3664 = vadd.xlane.f32.xlu0 %v3663_v44  ;;  %v3854_v44 = vsel %vm3822_vm9, %v7714_v6, 1.0  ;;  %v3855_v19 = vsel %vm3823_vm10, %v7733_v3, 1.0  ;;  %v3849_v41 = vsel %vm3817_vm3, %v7739_v51, 1.0 }
 0x4c0   : > { %5478 = vlog2.f32 %v3854_v44  ;;  %v3809_v49 = vmul.f32 0.125, %v3689_v28  ;;  %vm4073_vm12 = vcmp.gt.f32.partialorder %v3689_v28, 0.0 }
 0x4c1   : > { %3670 = vadd.xlane.f32.xlu1 %v3669_v61  ;;  %v3680_v61 = vadd.f32 %v3679_v22, %v3678_v53  ;;  %5480 = vlog2.f32 %v3848_v11  ;;  %v3704_v53 = vrot.slane %v3703_v39, 2  ;;  %v3711_v11 = vrot.slane %v7663_v20, 4 }
 0x4c2   : > { %5482 = vlog2.f32 %v3855_v19  ;;  %v3720_v19 = vrot.slane %v7667_v0, 4 }
 0x4c3   : > { %v3808_v59 = vmul.f32 0.125, %v3680_v61  ;;  %vm4072_vm0 = vcmp.gt.f32.partialorder %v3680_v61, 0.0  ;;  %5484 = vlog2.f32 %v3852_v1  ;;  %v3705_v26 = vadd.f32 %v3704_v53, %v3703_v39 }
 0x4c4   : > { %5486 = vlog2.f32 %v3849_v41  ;;  %v3696_v61 = vadd.f32 %v3695_v13, %v3694_v55  ;;  %v7772_v1 = vmul.f32 0.125, %v7597_v45  ;;  %v7780_v39 = vmul.f32 0.125, %v7605_v52 }
 0x4c5   : > { %v5477_v22 = vpop.eup %5476  ;;  %v4080_v44 = vsel %vm4072_vm0, %v3808_v59, 1.0  ;;  %5488 = vlog2.f32 %v3851_v16  ;;  %v7777_v59 = vmul.f32 0.125, %v7599_v25  ;;  %v4081_v55 = vsel %vm4073_vm12, %v3809_v49, 1.0 }
 0x4c6   : > { %8783 = vst [vmem:[#allocation41_spill] sm:$0xff] %v7772_v1  ;;  %v7774_v8 = vmul.f32 0.6931472, %v5477_v22  ;;  %8785 = vst [vmem:[#allocation43_spill] sm:$0xff] %v7780_v39  ;;  %v3706_v28 = vrot.slane %v3705_v26, 1  ;;  %v3712_v53 = vadd.f32 %v3711_v11, %v7663_v20  ;;  %v3697_v13 = vrot.slane %v3696_v61, 1 }
 0x4c7   : > { %8784 = vst [vmem:[#allocation42_spill] sm:$0xff] %v7777_v59  ;;  %v3721_v16 = vadd.f32 %v3720_v19, %v7667_v0  ;;  %v3858_v20 = vsel %vm3826_vm13, %v7772_v1, 1.0  ;;  %v7801_v0 = vmul.f32 0.125, %v7609_v38  ;;  %v3860_v11 = vsel %vm8668_vm8, %v7780_v39, 1.0 }
 0x4c8   : > { %v3707_v19 = vadd.f32 %v3706_v28, %v3705_v26  ;;  %vm8655_vm0 = vcmp.gt.f32.partialorder %v7601_v7, 0.0  ;;  %vm8654_vm12 = vcmp.gt.f32.partialorder %v7609_v38, 0.0  ;;  %v7813_v52 = vmul.f32 0.125, %v7611_v43 }
 0x4c9   : > { %8787 = vst [vmem:[#allocation45_spill] sm:$0xff] %v7801_v0  ;;  %v3722_v1 = vrot.slane %v3721_v16, 2  ;;  %v7816_v39 = vmul.f32 0.125, %v7615_v10 }
 0x4ca   : > { %v5479_v30 = vpop.eup %5478  ;;  %8788 = vst [vmem:[#allocation46_spill] sm:$0xff] %v7813_v52 }
 0x4cb   : > { %v5481_v41 = vpop.eup %5480  ;;  %v7786_v22 = vmul.f32 0.6931472, %v5479_v30  ;;  %8789 = vst [vmem:[#allocation47_spill] sm:$0xff] %v7816_v39 }
 0x4cc   : > { %v7795_v36 = vmul.f32 0.6931472, %v5481_v41  ;;  %v5483_v49 = vpop.eup %5482  ;;  %v3862_v41 = vsel %vm8652_vm11, %v7777_v59, 1.0 }
 0x4cd   : > { %v5485_v30 = vpop.eup %5484  ;;  %v7821_v25 = vmul.f32 0.6931472, %v5483_v49 }
 0x4ce   : > { %v5487_v45 = vpop.eup %5486  ;;  %v7823_v59 = vmul.f32 0.6931472, %v5485_v30 }
 0x4cf   : > { %v5489_v28 = vpop.eup %5488  ;;  %v7832_v30 = vmul.f32 0.6931472, %v5487_v45 }
 0x4d2   : > { %2419 = vperm.xlu1 %5440, %v2410_v35   ;;  %v7753_v35 = vmul.f32 0.125, %v7583_v48  ;;  %v3713_v48 = vrot.slane %v3712_v53, 2 }
 0x4d4   : > { %8782 = vst [vmem:[#allocation40_spill] sm:$0xff] %v7753_v35  ;;  %v3853_v17 = vsel %vm3821_vm15, %v7753_v35, 1.0  ;;  %v3714_v35 = vadd.f32 %v3713_v48, %v3712_v53  ;;  %v3857_v48 = vsel %vm8663_vm14, %v7813_v52, 1.0  ;;  %vm8677_vm14 = vcmp.gt.f32.partialorder %v7683_v40, 0.0 }
 0x4d5   : > { %5490 = vlog2.f32 %v3853_v17  ;;  %v7790_v17 = vmul.f32 0.125, %v7601_v7 }
 0x4d6   : > { %5492 = vlog2.f32 %v4080_v44  ;;  %v7793_v44 = vmul.f32 0.125, %v7607_v21  ;;  %v3715_v45 = vrot.slane %v3714_v35, 1 }
 0x4d7   : > { %5494 = vlog2.f32 %v4081_v55  ;;  %v3698_v55 = vadd.f32 %v3697_v13, %v3696_v61  ;;  %v3856_v61 = vsel %vm8655_vm0, %v7790_v17, 1.0  ;;  %vm8662_vm0 = vcmp.gt.f32.partialorder %v7635_v33, 0.0 }
 0x4d8   : > { %8786 = vst [vmem:[#allocation44_spill] sm:$0xff] %v7793_v44  ;;  %5496 = vlog2.f32 %v3858_v20  ;;  %v3859_v26 = vsel %vm8650_vm4, %v7793_v44, 1.0  ;;  %v3811_v20 = vmul.f32 0.125, %v3707_v19  ;;  %vm4075_vm4 = vcmp.gt.f32.partialorder %v3707_v19, 0.0 }
 0x4d9   : > { %5498 = vlog2.f32 %v3860_v11  ;;  %v3863_v11 = vsel %vm8654_vm12, %v7801_v0, 1.0  ;;  %v3810_v49 = vmul.f32 0.125, %v3698_v55  ;;  %v3723_v44 = vadd.f32 %v3722_v1, %v3721_v16 }
 0x4da   : > { %5500 = vlog2.f32 %v3862_v41  ;;  %vm4074_vm11 = vcmp.gt.f32.partialorder %v3698_v55, 0.0  ;;  %v7834_v41 = vmul.f32 0.6931472, %v5489_v28  ;;  %vm8661_vm12 = vcmp.gt.f32.partialorder %v7615_v10, 0.0 }
 0x4db   : > { %5502 = vlog2.f32 %v3859_v26  ;;  %v4083_v53 = vsel %vm4075_vm4, %v3811_v20, 1.0  ;;  %v7843_v19 = vmul.f32 0.125, %v7633_v5  ;;  %v7846_v1 = vmul.f32 0.125, %v7635_v33 }
 0x4dc   : > { %5504 = vlog2.f32 %v3856_v61  ;;  %v4082_v55 = vsel %vm4074_vm11, %v3810_v49, 1.0  ;;  %v3724_v26 = vrot.slane %v3723_v44, 1  ;;  %v7854_v61 = vmul.f32 0.125, %v7643_v2 }
 0x4dd   : > { %5506 = vlog2.f32 %v3863_v11  ;;  %8790 = vst [vmem:[#allocation48_spill] sm:$0xff] %v7843_v19  ;;  %8791 = vst [vmem:[#allocation49_spill] sm:$0xff] %v7846_v1  ;;  %vm8666_vm4 = vcmp.gt.f32.partialorder %v7633_v5, 0.0  ;;  %v7863_v11 = vmul.f32 0.125, %v7647_v29  ;;  %v3861_v49 = vsel %vm8661_vm12, %v7816_v39, 1.0 }
 0x4de   : > { %8792 = vst [vmem:[#allocation50_spill] sm:$0xff] %v7854_v61  ;;  %5508 = vlog2.f32 %v3857_v48  ;;  %v3716_v38 = vadd.f32 %v3715_v45, %v3714_v35  ;;  %v3864_v48 = vsel %vm8662_vm0, %v7846_v1, 1.0  ;;  %vm8671_vm11 = vcmp.gt.f32.partialorder %v7643_v2, 0.0 }
 0x4df   : > { %v5491_v13 = vpop.eup %5490  ;;  %5510 = vlog2.f32 %v4083_v53  ;;  %8794 = vst [vmem:[#allocation52_spill] sm:$0xff] %v7863_v11  ;;  %v3725_v52 = vadd.f32 %v3724_v26, %v3723_v44  ;;  %v7880_v0 = vmul.f32 0.125, %v7681_v56  ;;  %v3866_v10 = vsel %vm8666_vm4, %v7843_v19, 1.0 }
 0x4e0   : > { %v5493_v21 = vpop.eup %5492  ;;  %v7836_v7 = vmul.f32 0.6931472, %v5491_v13  ;;  %v7857_v13 = vmul.f32 0.125, %v7639_v58  ;;  %5512 = vlog2.f32 %v4082_v55  ;;  %vm8680_vm12 = vcmp.gt.f32.partialorder %v7639_v58, 0.0 }
 0x4e1   : > { %v7848_v16 = vpop.eup %5494  ;;  %v7850_v28 = vmul.f32 0.6931472, %v5493_v21  ;;  %v7866_v21 = vmul.f32 0.125, %v7645_v57  ;;  %8796 = vst [vmem:[#allocation54_spill] sm:$0xff] %v7880_v0  ;;  %v7887_v35 = vmul.f32 0.125, %v7649_v42  ;;  %v7890_v45 = vmul.f32 0.125, %v7683_v40 }
 0x4e2   : > { %8793 = vst [vmem:[#allocation51_spill] sm:$0xff] %v7857_v13  ;;  %v7860_v20 = vpop.eup %5496  ;;  %vm8674_vm0 = vcmp.gt.f32.partialorder %v7681_v56, 0.0  ;;  %5514 = vlog2.f32 %v3861_v49  ;;  %v7895_v44 = vmul.f32 0.125, %v7689_v18  ;;  %v3870_v26 = vsel %vm8671_vm11, %v7854_v61, 1.0 }
 0x4e3   : > { %8795 = vst [vmem:[#allocation53_spill] sm:$0xff] %v7866_v21  ;;  %v7871_v43 = vpop.eup %5498  ;;  %8797 = vst [vmem:[#allocation55_spill] sm:$0xff] %v7887_v35  ;;  %5516 = vlog2.f32 %v3864_v48  ;;  %v3812_v19 = vmul.f32 0.125, %v3716_v38  ;;  %vm8682_vm4 = vcmp.gt.f32.partialorder %v7689_v18, 0.0  ;;  %v3867_v49 = vsel %vm8680_vm12, %v7857_v13, 1.0 }
 0x4e4   : > { %v7877_v53 = vpop.eup %5500  ;;  %8798 = vst [vmem:[#allocation56_spill] sm:$0xff] %v7890_v45  ;;  %8799 = vst [vmem:[#allocation57_spill] sm:$0xff] %v7895_v44  ;;  %5518 = vlog2.f32 %v3866_v10  ;;  %vm4076_vm8 = vcmp.gt.f32.partialorder %v3716_v38, 0.0  ;;  %v3813_v1 = vmul.f32 0.125, %v3725_v52  ;;  %v3873_v48 = vsel %vm8674_vm0, %v7880_v0, 1.0 }
 0x4e5   : > { %v5503_v55 = vpop.eup %5502  ;;  %v3729_v2 = vrot.slane %v7701_v24, 4  ;;  %vm4077_vm11 = vcmp.gt.f32.partialorder %v3725_v52, 0.0  ;;  %v3876_v61 = vsel %vm8677_vm14, %v7890_v45, 1.0  ;;  %v3738_v10 = vrot.slane %v7703_v32, 4 }
 0x4e6   : > { %v5505_v5 = vpop.eup %5504  ;;  %5520 = vlog2.f32 %v3870_v26  ;;  %v7915_v58 = vmul.f32 0.125, %v7655_v15  ;;  %v3877_v38 = vsel %vm8682_vm4, %v7895_v44, 1.0  ;;  %vm3836_vm0 = vcmp.gt.f32.partialorder %v7647_v29, 0.0 }
 0x4e7   : > { %v7904_v33 = vpop.eup %5506  ;;  %5522 = vlog2.f32 %v3867_v49  ;;  %v4084_v0 = vsel %vm4076_vm8, %v3812_v19, 1.0  ;;  %v7922_v52 = vmul.f32 0.125, %v7675_v27  ;;  %vm8702_vm14 = vcmp.gt.f32.partialorder %v7649_v42, 0.0 }
 0x4e8   : > { %8800 = vst [vmem:[#allocation58_spill] sm:$0xff] %v7915_v58  ;;  %v5509_v56 = vpop.eup %5508  ;;  %5524 = vlog2.f32 %v3873_v48  ;;  %v4085_v26 = vsel %vm4077_vm11, %v3813_v1, 1.0  ;;  %v3730_v45 = vadd.f32 %v3729_v2, %v7701_v24  ;;  %vm8684_vm12 = vcmp.gt.f32.partialorder %v7645_v57, 0.0 }
 0x4e9   : > { %8801 = vst [vmem:[#allocation59_spill] sm:$0xff] %v7922_v52  ;;  %v7925_v40 = vpop.eup %5510  ;;  %5526 = vlog2.f32 %v3876_v61  ;;  %v3739_v49 = vadd.f32 %v3738_v10, %v7703_v32  ;;  %v3868_v19 = vsel %vm3836_vm0, %v7863_v11, 1.0  ;;  %vm8693_vm8 = vcmp.gt.f32.partialorder %v7655_v15, 0.0 }
 0x4ea   : > { %v7929_v18 = vpop.eup %5512  ;;  %5528 = vlog2.f32 %v3877_v38  ;;  %v7937_v48 = vmul.f32 0.6931472, %v7848_v16  ;;  %v3871_v2 = vsel %vm8702_vm14, %v7887_v35, 1.0  ;;  %vm8692_vm11 = vcmp.gt.f32.partialorder %v7675_v27, 0.0 }
 0x4eb   : > { %5530 = vlog2.f32 %v4084_v0  ;;  %v7944_v32 = vmul.f32 0.125, %v7669_v31  ;;  %v7947_v1 = vmul.f32 0.125, %v7679_v12  ;;  %v3865_v0 = vsel %vm8684_vm12, %v7866_v21, 1.0 }
 0x4ec   : > { %v5515_v24 = vpop.eup %5514  ;;  %5532 = vlog2.f32 %v4085_v26  ;;  %v3731_v61 = vrot.slane %v3730_v45, 2  ;;  %v3869_v10 = vsel %vm8693_vm8, %v7915_v58, 1.0  ;;  %vm8700_vm4 = vcmp.gt.f32.partialorder %v7669_v31, 0.0 }
 0x4ed   : > { %8802 = vst [vmem:[#allocation60_spill] sm:$0xff] %v7944_v32  ;;  %8803 = vst [vmem:[#allocation61_spill] sm:$0xff] %v7947_v1  ;;  %v7952_v16 = vpop.eup %5516  ;;  %5534 = vlog2.f32 %v3868_v19  ;;  %v3740_v26 = vrot.slane %v3739_v49, 2  ;;  %v3875_v44 = vsel %vm8692_vm11, %v7922_v52, 1.0  ;;  %vm8697_vm12 = vcmp.gt.f32.partialorder %v7679_v12, 0.0 }
 0x4ee   : > { %v7958_v38 = vpop.eup %5518  ;;  %5536 = vlog2.f32 %v3871_v2  ;;  %v7965_v57 = vmul.f32 0.6931472, %v7860_v20  ;;  %v7968_v19 = vmul.f32 0.6931472, %v7871_v43  ;;  %v7971_v15 = vmul.f32 0.6931472, %v7877_v53 }
 0x4ef   : > { %5538 = vlog2.f32 %v3865_v0  ;;  %v7975_v42 = vmul.f32 0.6931472, %v5503_v55  ;;  %v7977_v2 = vmul.f32 0.6931472, %v5505_v5  ;;  %v3874_v27 = vsel %vm8700_vm4, %v7944_v32, 1.0 }
 0x4f0   : > { %v7973_v58 = vpop.eup %5520  ;;  %5540 = vlog2.f32 %v3869_v10  ;;  %v7983_v52 = vmul.f32 0.125, %v7671_v62  ;;  %v3732_v43 = vadd.f32 %v3731_v61, %v3730_v45  ;;  %v3878_v53 = vsel %vm8697_vm12, %v7947_v1, 1.0 }
 0x4f1   : > { %v5523_v20 = vpop.eup %5522  ;;  %5542 = vlog2.f32 %v3875_v44  ;;  %v3741_v0 = vadd.f32 %v3740_v26, %v3739_v49  ;;  %vm8711_vm8 = vcmp.gt.f32.partialorder %v7671_v62, 0.0  ;;  %v7992_v31 = vmul.f32 0.125, %v7685_v23 }
 0x4f2   : > { %8804 = vst [vmem:[#allocation62_spill] sm:$0xff] %v7983_v52  ;;  %v5525_v55 = vpop.eup %5524  ;;  %v7995_v45 = vmul.f32 0.6931472, %v7904_v33  ;;  %v7997_v44 = vmul.f32 0.6931472, %v5509_v56  ;;  %5544 = vlog2.f32 %v3874_v27  ;;  %v3733_v26 = vrot.slane %v3732_v43, 1 }
 0x4f3   : > { %v7989_v10 = vpop.eup %5526  ;;  %8805 = vst [vmem:[#allocation63_spill] sm:$0xff] %v7992_v31  ;;  %5546 = vlog2.f32 %v3878_v53  ;;  %v3872_v21 = vsel %vm8711_vm8, %v7983_v52, 1.0  ;;  %vm8709_vm4 = vcmp.gt.f32.partialorder %v7685_v23, 0.0  ;;  %v3742_v56 = vrot.slane %v3741_v0, 1 }
 0x4f4   : > { %8806 = vst [vmem:[#allocation64_spill] sm:$0xff] %v7995_v45  ;;  %8807 = vst [vmem:[#allocation65_spill] sm:$0xff] %v7997_v44  ;;  %v5529_v61 = vpop.eup %5528  ;;  %v8008_v53 = vmul.f32 0.6931472, %v7929_v18  ;;  %v3734_v39 = vadd.f32 %v3733_v26, %v3732_v43  ;;  %v3879_v18 = vsel %vm8709_vm4, %v7992_v31, 1.0 }
 0x4f5   : > { %v3743_v44 = vadd.f32 %v3742_v56, %v3741_v0  ;;  %v8029_v0 = vmul.f32 0.6931472, %v5525_v55  ;;  %v8034_v31 = vmul.f32 0.6931472, %v5529_v61 }
 0x4f7   : > { %8809 = vst [vmem:[#allocation67_spill] sm:$0xff] %v8029_v0  ;;  %8811 = vst [vmem:[#allocation69_spill] sm:$0xff] %v8034_v31 }
 0x50c   : > { %v3584_v29 = vpop.xlane.xlu0 %3583 }
 0x50d   : > { %v3778_v5 = vmul.f32 0.125, %v3584_v29  ;;  %vm3946_vm11 = vcmp.gt.f32.partialorder %v3584_v29, 0.0  ;;  %v7999_v29 = vpop.eup %5530 }
 0x50e   : > { %v3596_v32 = vpop.xlane.xlu1 %3595  ;;  %v5533_v33 = vpop.eup %5532 }
 0x50f   : > { %v3782_v12 = vmul.f32 0.125, %v3596_v32  ;;  %vm3950_vm12 = vcmp.gt.f32.partialorder %v3596_v32, 0.0  ;;  %v3978_v49 = vsel %vm3946_vm11, %v3778_v5, 1.0  ;;  %v8005_v11 = vpop.eup %5534  ;;  %v8011_v5 = vmul.f32 0.6931472, %v7925_v40 }
 0x510   : > { %5548 = vlog2.f32 %v3978_v49  ;;  %v3578_v1 = vpop.xlane.xlu0 %3577  ;;  %v8013_v49 = vmul.f32 0.6931472, %v5515_v24  ;;  %v5537_v62 = vpop.eup %5536 }
 0x511   : > { %v3982_v35 = vsel %vm3950_vm12, %v3782_v12, 1.0  ;;  %v3776_v27 = vmul.f32 0.125, %v3578_v1  ;;  %vm3944_vm14 = vcmp.gt.f32.partialorder %v3578_v1, 0.0  ;;  %v5539_v12 = vpop.eup %5538 }
 0x512   : > { %5550 = vlog2.f32 %v3982_v35  ;;  %v3599_v32 = vpop.xlane.xlu1 %3598  ;;  %8808 = vst [vmem:[#allocation66_spill] sm:$0xff] %v8013_v49  ;;  %v8016_v35 = vmul.f32 0.6931472, %v7952_v16  ;;  %v5541_v40 = vpop.eup %5540  ;;  %v8027_v16 = vmul.f32 0.6931472, %v5523_v20 }
 0x513   : > { %v3783_v52 = vmul.f32 0.125, %v3599_v32  ;;  %vm3951_vm11 = vcmp.gt.f32.partialorder %v3599_v32, 0.0  ;;  %v3976_v13 = vsel %vm3944_vm14, %v3776_v27, 1.0  ;;  %5552 = vlog2.f32 %v3872_v21  ;;  %v5543_v45 = vpop.eup %5542 }
 0x514   : > { %5554 = vlog2.f32 %v3976_v13  ;;  %v3590_v1 = vpop.xlane.xlu0 %3589  ;;  %v8022_v21 = vmul.f32 0.6931472, %v7958_v38  ;;  %v8025_v13 = vmul.f32 0.6931472, %v7973_v58  ;;  %v5545_v32 = vpop.eup %5544  ;;  %v8032_v20 = vmul.f32 0.6931472, %v7989_v10 }
 0x515   : > { %v3983_v24 = vsel %vm3951_vm11, %v3783_v52, 1.0  ;;  %v3780_v49 = vmul.f32 0.125, %v3590_v1  ;;  %vm3948_vm12 = vcmp.gt.f32.partialorder %v3590_v1, 0.0  ;;  %v3814_v52 = vmul.f32 0.125, %v3734_v39  ;;  %v5547_v1 = vpop.eup %5546 }
 0x516   : > { %5556 = vlog2.f32 %v3983_v24  ;;  %v3581_v27 = vpop.xlane.xlu1 %3580  ;;  %vm4078_vm11 = vcmp.gt.f32.partialorder %v3734_v39, 0.0  ;;  %v3815_v24 = vmul.f32 0.125, %v3743_v44  ;;  %8810 = vst [vmem:[#allocation68_spill] sm:$0xff] %v8032_v20  ;;  %v8048_v39 = vmul.f32 0.6931472, %v5539_v12 }
 0x517   : > { %v3777_v43 = vmul.f32 0.125, %v3581_v27  ;;  %vm3945_vm14 = vcmp.gt.f32.partialorder %v3581_v27, 0.0  ;;  %v3980_v26 = vsel %vm3948_vm12, %v3780_v49, 1.0  ;;  %5558 = vlog2.f32 %v3879_v18 }
 0x518   : > { %5560 = vlog2.f32 %v3980_v26  ;;  %v3587_v56 = vpop.xlane.xlu0 %3586  ;;  %vm4079_vm12 = vcmp.gt.f32.partialorder %v3743_v44, 0.0  ;;  %v4086_v0 = vsel %vm4078_vm11, %v3814_v52, 1.0 }
 0x519   : > { %v3977_v38 = vsel %vm3945_vm14, %v3777_v43, 1.0  ;;  %v3779_v23 = vmul.f32 0.125, %v3587_v56  ;;  %vm3947_vm4 = vcmp.gt.f32.partialorder %v3587_v56, 0.0  ;;  %v8038_v43 = vmul.f32 0.6931472, %v7999_v29 }
 0x51a   : > { %v5549_v58 = vpop.eup %5548  ;;  %5562 = vlog2.f32 %v3977_v38  ;;  %v3593_v49 = vpop.xlane.xlu1 %3592  ;;  %v8040_v56 = vmul.f32 0.6931472, %v5533_v33  ;;  %v4087_v20 = vsel %vm4079_vm12, %v3815_v24, 1.0 }
 0x51b   : > { %v4013_v55 = vmul.f32 0.6931472, %v5549_v58  ;;  %v3781_v18 = vmul.f32 0.125, %v3593_v49  ;;  %vm3949_vm8 = vcmp.gt.f32.partialorder %v3593_v49, 0.0  ;;  %v3979_v27 = vsel %vm3947_vm4, %v3779_v23, 1.0 }
 0x51c   : > { %v5551_v26 = vpop.eup %5550  ;;  %5564 = vlog2.f32 %v3979_v27  ;;  %v8044_v58 = vmul.f32 0.6931472, %v8005_v11  ;;  %v8046_v23 = vmul.f32 0.6931472, %v5537_v62 }
 0x51d   : > { %v5553_v10 = vpop.eup %5552  ;;  %v4021_v61 = vmul.f32 0.6931472, %v5551_v26  ;;  %v3981_v31 = vsel %vm3949_vm8, %v3781_v18, 1.0  ;;  %v4106_v44 = vsub.f32 %v7774_v8, %v4013_v55  ;;  %v8052_v18 = vmul.f32 0.6931472, %v5541_v40 }
 0x51e   : > { %v5555_v38 = vpop.eup %5554  ;;  %5566 = vlog2.f32 %v3981_v31  ;;  %v8054_v8 = vmul.f32 0.6931472, %v5543_v45  ;;  %v8056_v31 = vmul.f32 0.6931472, %v5545_v32  ;;  %v8065_v40 = vmul.f32 0.6931472, %v5553_v10 }
 0x51f   : > { %5568 = vlog2.f32 %v4086_v0  ;;  %v4009_v29 = vmul.f32 0.6931472, %v5555_v38  ;;  %v4138_v33 = vsub.f32 %v4106_v44, %v7850_v28  ;;  %v4110_v52 = vsub.f32 %v7786_v22, %v4021_v61 }
 0x520   : > { %v5557_v24 = vpop.eup %5556  ;;  %5570 = vlog2.f32 %v4087_v20  ;;  %v3608_v49 = vpop.xlane.xlu0 %3607  ;;  %v8063_v20 = vmul.f32 0.6931472, %v5547_v1 }
 0x521   : > { %v8058_v11 = vpop.eup %5558  ;;  %v4023_v62 = vmul.f32 0.6931472, %v5557_v24  ;;  %v3786_v12 = vmul.f32 0.125, %v3608_v49  ;;  %vm3954_vm4 = vcmp.gt.f32.partialorder %v3608_v49, 0.0  ;;  %v4170_v0 = vmul.f32 %v4138_v33, %v7710_v50 }
 0x522   : > { %v5561_v55 = vpop.eup %5560  ;;  %v4142_v27 = vsub.f32 %v4110_v52, %v7937_v48  ;;  %v4104_v22 = vsub.f32 %v7795_v36, %v4009_v29  ;;  %v3614_v32 = vpop.xlane.xlu1 %3613  ;;  %v8101_v34 = vmul.f32 0.6931472, %v8058_v11 }
 0x523   : > { %v4017_v45 = vmul.f32 0.6931472, %v5561_v55  ;;  %v3986_v26 = vsel %vm3954_vm4, %v3786_v12, 1.0  ;;  %v4202_v61 = vsel %vm3818_vm5, %v4170_v0, 0.0  ;;  %v4111_v44 = vsub.f32 %v7821_v25, %v4023_v62 }
 0x524   : > { %v5563_v38 = vpop.eup %5562  ;;  %5572 = vlog2.f32 %v3986_v26  ;;  %v3788_v50 = vmul.f32 0.125, %v3614_v32  ;;  %vm3956_vm8 = vcmp.gt.f32.partialorder %v3614_v32, 0.0  ;;  %v3620_v33 = vpop.xlane.xlu0 %3619  ;;  %v4238_v52 = vsel %vm3575_vm1, %v4202_v61, 0.0 }
 0x525   : > { %v4011_v36 = vmul.f32 0.6931472, %v5563_v38  ;;  %v3790_v1 = vmul.f32 0.125, %v3620_v33  ;;  %vm3958_vm14 = vcmp.gt.f32.partialorder %v3620_v33, 0.0  ;;  %4239 = vadd.xlane.f32.xlu0 %v4238_v52  ;;  %v4174_v10 = vmul.f32 %v4142_v27, %v7714_v6 }
 0x526   : > { %v5565_v29 = vpop.eup %5564  ;;  %v3988_v24 = vsel %vm3956_vm8, %v3788_v50, 1.0  ;;  %v4136_v47 = vsub.f32 %v4104_v22, %v7850_v28  ;;  %v4143_v49 = vsub.f32 %v4111_v44, %v7937_v48  ;;  %v4108_v25 = vsub.f32 %v7823_v59, %v4017_v45  ;;  %v3611_v0 = vpop.xlane.xlu1 %3610 }
 0x527   : > { %v4015_v62 = vmul.f32 0.6931472, %v5565_v29  ;;  %5574 = vlog2.f32 %v3988_v24  ;;  %v3990_v12 = vsel %vm3958_vm14, %v3790_v1, 1.0  ;;  %v4206_v55 = vsel %vm3822_vm9, %v4174_v10, 0.0 }
 0x528   : > { %v5567_v26 = vpop.eup %5566  ;;  %5576 = vlog2.f32 %v3990_v12  ;;  %v3787_v32 = vmul.f32 0.125, %v3611_v0  ;;  %vm3955_vm5 = vcmp.gt.f32.partialorder %v3611_v0, 0.0  ;;  %v3602_v6 = vpop.xlane.xlu0 %3601  ;;  %v4250_v27 = vsel %vm3575_vm1, %v4206_v55, 0.0 }
 0x529   : > { %v8078_v61 = vpop.eup %5568  ;;  %v8080_v22 = vmul.f32 0.6931472, %v5567_v26  ;;  %v3784_v44 = vmul.f32 0.125, %v3602_v6  ;;  %vm3952_vm11 = vcmp.gt.f32.partialorder %v3602_v6, 0.0  ;;  %4251 = vadd.xlane.f32.xlu1 %v4250_v27  ;;  %v4168_v59 = vmul.f32 %v4136_v47, %v7718_v63 }
 0x52a   : > { %v8083_v45 = vpop.eup %5570  ;;  %v3987_v37 = vsel %vm3955_vm5, %v3787_v32, 1.0  ;;  %v4175_v38 = vmul.f32 %v4143_v49, %v7733_v3  ;;  %v4140_v50 = vsub.f32 %v4108_v25, %v7937_v48  ;;  %v4105_v33 = vsub.f32 %v7832_v30, %v4011_v36  ;;  %v3623_v1 = vpop.xlane.xlu1 %3622 }
 0x52b   : > { %5578 = vlog2.f32 %v3987_v37  ;;  %v3984_v52 = vsel %vm3952_vm11, %v3784_v44, 1.0  ;;  %v4200_v10 = vsel %vm3816_vm7, %v4168_v59, 0.0  ;;  %v4107_v29 = vsub.f32 %v7834_v41, %v4015_v62 }
 0x52c   : > { %5580 = vlog2.f32 %v3984_v52  ;;  %v3791_v24 = vmul.f32 0.125, %v3623_v1  ;;  %vm3959_vm9 = vcmp.gt.f32.partialorder %v3623_v1, 0.0  ;;  %v3617_v63 = vpop.xlane.xlu0 %3616  ;;  %v4232_v47 = vsel %vm3575_vm1, %v4200_v10, 0.0 }
 0x52d   : > { %v3789_v12 = vmul.f32 0.125, %v3617_v63  ;;  %vm3957_vm12 = vcmp.gt.f32.partialorder %v3617_v63, 0.0  ;;  %4233 = vadd.xlane.f32.xlu0 %v4232_v47  ;;  %v4207_v3 = vsel %vm3823_vm10, %v4175_v38, 0.0  ;;  %v4172_v30 = vmul.f32 %v4140_v50, %v7730_v9 }
 0x52e   : > { %v5573_v36 = vpop.eup %5572  ;;  %v3991_v49 = vsel %vm3959_vm9, %v3791_v24, 1.0  ;;  %v4253_v14 = vsel %vm3575_vm1, %v4207_v3, 0.0  ;;  %v4137_v41 = vsub.f32 %v4105_v33, %v7850_v28  ;;  %v4139_v25 = vsub.f32 %v4107_v29, %v7850_v28  ;;  %v3605_v55 = vpop.xlane.xlu1 %3604 }
 0x52f   : > { %v4029_v62 = vmul.f32 0.6931472, %v5573_v36  ;;  %v3989_v0 = vsel %vm3957_vm12, %v3789_v12, 1.0  ;;  %4254 = vadd.xlane.f32.xlu1 %v4253_v14  ;;  %v4204_v26 = vsel %vm3820_vm2, %v4172_v30, 0.0  ;;  %5582 = vlog2.f32 %v3991_v49  ;;  %v8812_v14 = vld [vmem:[#allocation40_spill] sm:$0xff] }
 0x530   : > { %v3785_v9 = vmul.f32 0.125, %v3605_v55  ;;  %vm3953_vm7 = vcmp.gt.f32.partialorder %v3605_v55, 0.0  ;;  %v3632_v32 = vpop.xlane.xlu0 %3631  ;;  %v4244_v6 = vsel %vm3575_vm1, %v4204_v26, 0.0  ;;  %v4169_v28 = vmul.f32 %v4137_v41, %v7739_v51 }
 0x531   : > { %v5575_v27 = vpop.eup %5574  ;;  %v3794_v44 = vmul.f32 0.125, %v3632_v32  ;;  %vm3962_vm10 = vcmp.gt.f32.partialorder %v3632_v32, 0.0  ;;  %4245 = vadd.xlane.f32.xlu0 %v4244_v6  ;;  %v4171_v59 = vmul.f32 %v4139_v25, %v7747_v4  ;;  %5584 = vlog2.f32 %v3989_v0  ;;  %v8820_v0 = vld [vmem:[#allocation17_spill] sm:$0xff] }
 0x532   : > { %v5577_v37 = vpop.eup %5576  ;;  %v3985_v46 = vsel %vm3953_vm7, %v3785_v9, 1.0  ;;  %v4109_v11 = vsub.f32 %v7836_v7, %v8080_v22  ;;  %v4114_v38 = vsub.f32 %v7965_v57, %v4029_v62  ;;  %v4033_v50 = vmul.f32 0.6931472, %v5575_v27  ;;  %v3626_v52 = vpop.xlane.xlu1 %3625  ;;  %v8813_v62 = vld [vmem:[#allocation41_spill] sm:$0xff] }
 0x533   : > { %5586 = vlog2.f32 %v3985_v46  ;;  %v3994_v33 = vsel %vm3962_vm10, %v3794_v44, 1.0  ;;  %v4201_v1 = vsel %vm3817_vm3, %v4169_v28, 0.0  ;;  %v8111_v10 = vmul.f32 0.6931472, %v5577_v37 }
 0x534   : > { %v3792_v51 = vmul.f32 0.125, %v3626_v52  ;;  %vm3960_vm2 = vcmp.gt.f32.partialorder %v3626_v52, 0.0  ;;  %v4235_v4 = vsel %vm3575_vm1, %v4201_v1, 0.0  ;;  %v3644_v29 = vpop.xlane.xlu0 %3643  ;;  %v4203_v7 = vsel %vm3819_vm6, %v4171_v59, 0.0 }
 0x535   : > { %v5579_v24 = vpop.eup %5578  ;;  %4236 = vadd.xlane.f32.xlu1 %v4235_v4  ;;  %v3798_v63 = vmul.f32 0.125, %v3644_v29  ;;  %vm3966_vm4 = vcmp.gt.f32.partialorder %v3644_v29, 0.0  ;;  %v4141_v57 = vsub.f32 %v4109_v11, %v7937_v48  ;;  %5588 = vlog2.f32 %v3994_v33 }
 0x536   : > { %v5581_v22 = vpop.eup %5580  ;;  %v3992_v54 = vsel %vm3960_vm2, %v3792_v51, 1.0  ;;  %v4241_v47 = vsel %vm3575_vm1, %v4203_v7, 0.0  ;;  %v4146_v12 = vsub.f32 %v4114_v38, %v8008_v53  ;;  %v4031_v3 = vmul.f32 0.6931472, %v5579_v24  ;;  %v3638_v49 = vpop.xlane.xlu1 %3637  ;;  %v8816_v24 = vld [vmem:[#allocation43_spill] sm:$0xff] }
 0x537   : > { %v4025_v30 = vmul.f32 0.6931472, %v5581_v22  ;;  %v3998_v36 = vsel %vm3966_vm4, %v3798_v63, 1.0  ;;  %4242 = vadd.xlane.f32.xlu0 %v4241_v47  ;;  %v4173_v41 = vmul.f32 %v4141_v57, %v8812_v14  ;;  %5590 = vlog2.f32 %v3992_v54  ;;  %v8819_v14 = vld [vmem:[#allocation42_spill] sm:$0xff] }
 0x538   : > { %v3796_v25 = vmul.f32 0.125, %v3638_v49  ;;  %vm3964_vm3 = vcmp.gt.f32.partialorder %v3638_v49, 0.0  ;;  %v3629_v60 = vpop.xlane.xlu0 %3628  ;;  %v4178_v48 = vmul.f32 %v4146_v12, %v8813_v62  ;;  %v4116_v9 = vsub.f32 %v7968_v19, %v4033_v50  ;;  %v8817_v49 = vld [vmem:[#allocation19_spill] sm:$0xff] }
 0x539   : > { %v4205_v55 = vsel %vm3821_vm15, %v4173_v41, 0.0  ;;  %v3793_v26 = vmul.f32 0.125, %v3629_v60  ;;  %vm3961_vm6 = vcmp.gt.f32.partialorder %v3629_v60, 0.0  ;;  %v5583_v32 = vpop.eup %5582  ;;  %5592 = vlog2.f32 %v3998_v36 }
 0x53a   : > { %v3996_v6 = vsel %vm3964_vm3, %v3796_v25, 1.0  ;;  %v4247_v27 = vsel %vm3575_vm1, %v4205_v55, 0.0  ;;  %v4210_v28 = vsel %vm3826_vm13, %v4178_v48, 0.0  ;;  %v3635_v37 = vpop.xlane.xlu1 %3634  ;;  %v8129_v11 = vmul.f32 0.6931472, %v8078_v61 }
 0x53b   : > { %5594 = vlog2.f32 %v3996_v6  ;;  %4248 = vadd.xlane.f32.xlu1 %v4247_v27  ;;  %v3993_v59 = vsel %vm3961_vm6, %v3793_v26, 1.0  ;;  %v4262_v46 = vsel %vm3575_vm1, %v4210_v28, 0.0  ;;  %v5585_v38 = vpop.eup %5584  ;;  %v3795_v19 = vmul.f32 0.125, %v3635_v37  ;;  %v8822_v26 = vld [vmem:[#allocation44_spill] sm:$0xff] }
 0x53c   : > { %5596 = vlog2.f32 %v3993_v59  ;;  %vm3963_vm15 = vcmp.gt.f32.partialorder %v3635_v37, 0.0  ;;  %4263 = vadd.xlane.f32.xlu0 %v4262_v46  ;;  %v4148_v50 = vsub.f32 %v4116_v9, %v8011_v5  ;;  %v3641_v33 = vpop.xlane.xlu0 %3640  ;;  %v4118_v51 = vsub.f32 %v7971_v15, %v8111_v10  ;;  %v8823_v46 = vld [vmem:[#allocation20_spill] sm:$0xff] }
 0x53d   : > { %v5587_v52 = vpop.eup %5586  ;;  %v3797_v1 = vmul.f32 0.125, %v3641_v33  ;;  %vm3965_vm13 = vcmp.gt.f32.partialorder %v3641_v33, 0.0  ;;  %v4115_v4 = vsub.f32 %v7975_v42, %v4031_v3  ;;  %v8135_v29 = vmul.f32 0.6931472, %v5583_v32 }
 0x53e   : > { %v3995_v61 = vsel %vm3963_vm15, %v3795_v19, 1.0  ;;  %v4180_v63 = vmul.f32 %v4148_v50, %v8816_v24  ;;  %v4112_v7 = vsub.f32 %v7977_v2, %v4025_v30  ;;  %v8139_v57 = vmul.f32 0.6931472, %v5585_v38  ;;  %v3647_v47 = vpop.xlane.xlu1 %3646  ;;  %v8825_v24 = vld [vmem:[#allocation18_spill] sm:$0xff] }
 0x53f   : > { %v4027_v22 = vmul.f32 0.6931472, %v5587_v52  ;;  %v3997_v54 = vsel %vm3965_vm13, %v3797_v1, 1.0  ;;  %v4150_v12 = vsub.f32 %v4118_v51, %v8011_v5  ;;  %v5589_v36 = vpop.eup %5588  ;;  %5598 = vlog2.f32 %v3995_v61 }
 0x540   : > { %vm8818_vm8 = vcmp.gt.f32.partialorder %v8817_v49, 0.0  ;;  %v3799_v42 = vmul.f32 0.125, %v3647_v47  ;;  %vm3967_vm14 = vcmp.gt.f32.partialorder %v3647_v47, 0.0  ;;  %v3656_v10 = vpop.xlane.xlu0 %3655  ;;  %v4147_v2 = vsub.f32 %v4115_v4, %v8008_v53  ;;  %v8827_v47 = vld [vmem:[#allocation64_spill] sm:$0xff] }
 0x541   : > { %v4212_v15 = vsel %vm8818_vm8, %v4180_v63, 0.0  ;;  %v4182_v41 = vmul.f32 %v4150_v12, %v8819_v14  ;;  %v3802_v30 = vmul.f32 0.125, %v3656_v10  ;;  %v5591_v25 = vpop.eup %5590  ;;  %5600 = vlog2.f32 %v3997_v54 }
 0x542   : > { %v4268_v3 = vsel %vm3575_vm1, %v4212_v15, 0.0  ;;  %v3999_v60 = vsel %vm3967_vm14, %v3799_v42, 1.0  ;;  %vm3970_vm5 = vcmp.gt.f32.partialorder %v3656_v10, 0.0  ;;  %v4144_v62 = vsub.f32 %v4112_v7, %v8008_v53  ;;  %v3650_v32 = vpop.xlane.xlu1 %3649 }
 0x543   : > { %4269 = vadd.xlane.f32.xlu1 %v4268_v3  ;;  %v8148_v48 = vmul.f32 0.6931472, %v5589_v36  ;;  %5602 = vlog2.f32 %v3999_v60  ;;  %vm8821_vm11 = vcmp.gt.f32.partialorder %v8820_v0, 0.0  ;;  %v4179_v9 = vmul.f32 %v4147_v2, %v8822_v26  ;;  %v5593_v6 = vpop.eup %5592  ;;  %v8828_v36 = vld [vmem:[#allocation65_spill] sm:$0xff]  ;;  %v8831_v26 = vld [vmem:[#allocation46_spill] sm:$0xff] }
 0x544   : > { %v4214_v55 = vsel %vm8821_vm11, %v4182_v41, 0.0  ;;  %v4002_v44 = vsel %vm3970_vm5, %v3802_v30, 1.0  ;;  %v3800_v28 = vmul.f32 0.125, %v3650_v32  ;;  %vm3968_vm9 = vcmp.gt.f32.partialorder %v3650_v32, 0.0  ;;  %v3668_v59 = vpop.xlane.xlu0 %3667  ;;  %v8829_v30 = vld [vmem:[#allocation66_spill] sm:$0xff]  ;;  %v8830_v0 = vld [vmem:[#allocation45_spill] sm:$0xff] }
 0x545   : > { %v4274_v27 = vsel %vm3575_vm1, %v4214_v55, 0.0  ;;  %v5595_v37 = vpop.eup %5594  ;;  %vm8824_vm12 = vcmp.gt.f32.partialorder %v8823_v46, 0.0  ;;  %5604 = vlog2.f32 %v4002_v44  ;;  %v4176_v19 = vmul.f32 %v4144_v62, %v7790_v17 }
 0x546   : > { %4275 = vadd.xlane.f32.xlu0 %v4274_v27  ;;  %v4211_v38 = vsel %vm8824_vm12, %v4179_v9, 0.0  ;;  %v3806_v50 = vmul.f32 0.125, %v3668_v59  ;;  %v5597_v33 = vpop.eup %5596  ;;  %v4041_v52 = vmul.f32 0.6931472, %v5591_v25  ;;  %v4000_v51 = vsel %vm3968_vm9, %v3800_v28, 1.0  ;;  %v3662_v17 = vpop.xlane.xlu1 %3661 }
 0x547   : > { %v4265_v1 = vsel %vm3575_vm1, %v4211_v38, 0.0  ;;  %vm3974_vm7 = vcmp.gt.f32.partialorder %v3668_v59, 0.0  ;;  %v8158_v4 = vmul.f32 0.6931472, %v5593_v6  ;;  %v8160_v61 = vmul.f32 0.6931472, %v5595_v37 }
 0x548   : > { %4266 = vadd.xlane.f32.xlu1 %v4265_v1  ;;  %5606 = vlog2.f32 %v4000_v51  ;;  %vm8826_vm10 = vcmp.gt.f32.partialorder %v8825_v24, 0.0  ;;  %v4006_v54 = vsel %vm3974_vm7, %v3806_v50, 1.0  ;;  %v4119_v12 = vsub.f32 %v8827_v47, %v8135_v29  ;;  %v3653_v15 = vpop.xlane.xlu0 %3652  ;;  %v8832_v59 = vld [vmem:[#allocation21_spill] sm:$0xff]  ;;  %v8834_v37 = vld [vmem:[#allocation22_spill] sm:$0xff]  ;;  %v8836_v38 = vld [vmem:[#allocation47_spill] sm:$0xff] }
 0x549   : > { %v4208_v63 = vsel %vm8826_vm10, %v4176_v19, 0.0  ;;  %v4113_v49 = vsub.f32 %v8828_v36, %v4027_v22  ;;  %v3804_v42 = vmul.f32 0.125, %v3662_v17  ;;  %vm3972_vm2 = vcmp.gt.f32.partialorder %v3662_v17, 0.0  ;;  %v5599_v3 = vpop.eup %5598  ;;  %v8837_v1 = vld [vmem:[#allocation49_spill] sm:$0xff] }
 0x54a   : > { %v4256_v7 = vsel %vm3575_vm1, %v4208_v63, 0.0  ;;  %v3801_v10 = vmul.f32 0.125, %v3653_v15  ;;  %vm3969_vm4 = vcmp.gt.f32.partialorder %v3653_v15, 0.0  ;;  %v8168_v14 = vmul.f32 0.6931472, %v5597_v33  ;;  %v3659_v32 = vpop.xlane.xlu1 %3658  ;;  %v8838_v63 = vld [vmem:[#allocation23_spill] sm:$0xff] }
 0x54b   : > { %4257 = vadd.xlane.f32.xlu0 %v4256_v7  ;;  %v4151_v41 = vsub.f32 %v4119_v12, %v8011_v5  ;;  %v4145_v2 = vsub.f32 %v4113_v49, %v8008_v53  ;;  %v4117_v25 = vsub.f32 %v8829_v30, %v8139_v57  ;;  %5608 = vlog2.f32 %v4006_v54  ;;  %v5601_v62 = vpop.eup %5600  ;;  %v8840_v36 = vld [vmem:[#allocation25_spill] sm:$0xff] }
 0x54c   : > { %v4004_v29 = vsel %vm3972_vm2, %v3804_v42, 1.0  ;;  %v4001_v60 = vsel %vm3969_vm4, %v3801_v10, 1.0  ;;  %v4120_v22 = vsub.f32 %v8016_v35, %v4041_v52  ;;  %v3803_v53 = vmul.f32 0.125, %v3659_v32  ;;  %v3665_v44 = vpop.xlane.xlu0 %3664 }
 0x54d   : > { %5610 = vlog2.f32 %v4004_v29  ;;  %v4183_v55 = vmul.f32 %v4151_v41, %v8830_v0  ;;  %v4177_v9 = vmul.f32 %v4145_v2, %v8831_v26  ;;  %v4149_v6 = vsub.f32 %v4117_v25, %v8011_v5  ;;  %v5603_v27 = vpop.eup %5602 }
 0x54e   : > { %5612 = vlog2.f32 %v4001_v60  ;;  %vm3971_vm3 = vcmp.gt.f32.partialorder %v3659_v32, 0.0  ;;  %v4152_v57 = vsub.f32 %v4120_v22, %v8038_v43  ;;  %v4047_v28 = vmul.f32 0.6931472, %v5599_v3  ;;  %v3671_v17 = vpop.xlane.xlu1 %3670 }
 0x54f   : > { %vm8833_vm6 = vcmp.gt.f32.partialorder %v8832_v59, 0.0  ;;  %vm8835_vm15 = vcmp.gt.f32.partialorder %v8834_v37, 0.0  ;;  %v4181_v19 = vmul.f32 %v4149_v6, %v8836_v38  ;;  %v5605_v50 = vpop.eup %5604  ;;  %v4003_v52 = vsel %vm3971_vm3, %v3803_v53, 1.0  ;;  %v8848_v37 = vld [vmem:[#allocation55_spill] sm:$0xff]  ;;  %v8849_v38 = vld [vmem:[#allocation53_spill] sm:$0xff] }
 0x550   : > { %v4215_v35 = vsel %vm8833_vm6, %v4183_v55, 0.0  ;;  %v4209_v46 = vsel %vm8835_vm15, %v4177_v9, 0.0  ;;  %v4184_v51 = vmul.f32 %v4152_v57, %v8837_v1  ;;  %v8187_v24 = vmul.f32 0.6931472, %v5601_v62  ;;  %v8845_v57 = vld [vmem:[#allocation52_spill] sm:$0xff]  ;;  %v8852_v1 = vld [vmem:[#allocation26_spill] sm:$0xff] }
 0x551   : > { %v4277_v33 = vsel %vm3575_vm1, %v4215_v35, 0.0  ;;  %v4259_v5 = vsel %vm3575_vm1, %v4209_v46, 0.0  ;;  %5614 = vlog2.f32 %v4003_v52  ;;  %vm8839_vm13 = vcmp.gt.f32.partialorder %v8838_v63, 0.0  ;;  %v8846_v35 = vld [vmem:[#allocation24_spill] sm:$0xff] }
 0x552   : > { %4278 = vadd.xlane.f32.xlu0 %v4277_v33  ;;  %4260 = vadd.xlane.f32.xlu1 %v4259_v5  ;;  %v4213_v7 = vsel %vm8839_vm13, %v4181_v19, 0.0  ;;  %v3805_v54 = vmul.f32 0.125, %v3665_v44  ;;  %v5607_v47 = vpop.eup %5606  ;;  %v4055_v12 = vmul.f32 0.6931472, %v5603_v27  ;;  %vm8841_vm8 = vcmp.gt.f32.partialorder %v8840_v36, 0.0  ;;  %v8843_v27 = vld [vmem:[#allocation50_spill] sm:$0xff] }
 0x553   : > { %v4216_v49 = vsel %vm8841_vm8, %v4184_v51, 0.0  ;;  %vm3973_vm14 = vcmp.gt.f32.partialorder %v3665_v44, 0.0  ;;  %v3807_v15 = vmul.f32 0.125, %v3671_v17  ;;  %v4061_v42 = vmul.f32 0.6931472, %v5605_v50  ;;  %v8850_v5 = vld [vmem:[#allocation27_spill] sm:$0xff] }
 0x554   : > { %v4280_v10 = vsel %vm3575_vm1, %v4216_v49, 0.0  ;;  %v4005_v3 = vsel %vm3973_vm14, %v3805_v54, 1.0  ;;  %vm3975_vm5 = vcmp.gt.f32.partialorder %v3671_v17, 0.0  ;;  %v4271_v41 = vsel %vm3575_vm1, %v4213_v7, 0.0  ;;  %v8858_v36 = vld [vmem:[#allocation28_spill] sm:$0xff] }
 0x555   : > { %5616 = vlog2.f32 %v4005_v3  ;;  %v4007_v2 = vsel %vm3975_vm5, %v3807_v15, 1.0  ;;  %v4122_v30 = vsub.f32 %v8022_v21, %v8148_v48  ;;  %v4126_v25 = vsub.f32 %v8025_v13, %v8158_v4  ;;  %v5609_v22 = vpop.eup %5608  ;;  %v8860_v3 = vld [vmem:[#allocation67_spill] sm:$0xff] }
 0x556   : > { %4272 = vadd.xlane.f32.xlu0 %v4271_v41  ;;  %4281 = vadd.xlane.f32.xlu1 %v4280_v10  ;;  %5618 = vlog2.f32 %v4007_v2  ;;  %v4123_v29 = vsub.f32 %v8027_v16, %v4047_v28  ;;  %v4124_v60 = vsub.f32 %v8044_v58, %v8160_v61  ;;  %v4057_v62 = vmul.f32 0.6931472, %v5607_v47  ;;  %v8842_v61 = vld [vmem:[#allocation48_spill] sm:$0xff]  ;;  %v8856_v47 = vld [vmem:[#allocation30_spill] sm:$0xff] }
 0x557   : > { %v4154_v0 = vsub.f32 %v4122_v30, %v8038_v43  ;;  %v4127_v55 = vsub.f32 %v8046_v23, %v4055_v12  ;;  %v4121_v21 = vsub.f32 %v8048_v39, %v8168_v14  ;;  %v5611_v48 = vpop.eup %5610  ;;  %v4158_v26 = vsub.f32 %v4126_v25, %v8040_v56  ;;  %v8844_v14 = vld [vmem:[#allocation51_spill] sm:$0xff] }
 0x558   : > { %v4155_v9 = vsub.f32 %v4123_v29, %v8038_v43  ;;  %v4156_v13 = vsub.f32 %v4124_v60, %v8040_v56  ;;  %v4125_v16 = vsub.f32 %v8052_v18, %v8187_v24  ;;  %v5613_v58 = vpop.eup %5612  ;;  %v4065_v4 = vmul.f32 0.6931472, %v5611_v48  ;;  %v8854_v24 = vld [vmem:[#allocation68_spill] sm:$0xff] }
 0x559   : > { %v4186_v32 = vmul.f32 %v4154_v0, %v8842_v61  ;;  %v4159_v6 = vsub.f32 %v4127_v55, %v8040_v56  ;;  %v4153_v23 = vsub.f32 %v4121_v21, %v8038_v43  ;;  %v4190_v39 = vmul.f32 %v4158_v26, %v8843_v27  ;;  %v8862_v26 = vld [vmem:[#allocation60_spill] sm:$0xff] }
 0x55a   : > { %v4187_v53 = vmul.f32 %v4155_v9, %v8844_v14  ;;  %v4188_v44 = vmul.f32 %v4156_v13, %v8845_v57  ;;  %v4130_v28 = vsub.f32 %v8056_v31, %v4061_v42  ;;  %v4059_v59 = vmul.f32 0.6931472, %v5613_v58  ;;  %v8864_v58 = vld [vmem:[#allocation31_spill] sm:$0xff]  ;;  %v8869_v14 = vld [vmem:[#allocation61_spill] sm:$0xff]  ;;  %v8870_v57 = vld [vmem:[#allocation62_spill] sm:$0xff] }
 0x55b   : > { %vm8847_vm11 = vcmp.gt.f32.partialorder %v8846_v35, 0.0  ;;  %v4191_v46 = vmul.f32 %v4159_v6, %v8848_v37  ;;  %v4185_v19 = vmul.f32 %v4153_v23, %v8849_v38  ;;  %v5615_v50 = vpop.eup %5614  ;;  %v4069_v33 = vmul.f32 0.6931472, %v5609_v22  ;;  %v8861_v22 = vld [vmem:[#allocation58_spill] sm:$0xff]  ;;  %v8866_v6 = vld [vmem:[#allocation59_spill] sm:$0xff]  ;;  %v8867_v23 = vld [vmem:[#allocation32_spill] sm:$0xff] }
 0x55c   : > { %v4218_v18 = vsel %vm8847_vm11, %v4186_v32, 0.0  ;;  %vm8851_vm9 = vcmp.gt.f32.partialorder %v8850_v5, 0.0  ;;  %vm8853_vm12 = vcmp.gt.f32.partialorder %v8852_v1, 0.0  ;;  %v4132_v31 = vsub.f32 %v8854_v24, %v4065_v4  ;;  %v8872_v35 = vld [vmem:[#allocation34_spill] sm:$0xff]  ;;  %v8878_v5 = vld [vmem:[#allocation37_spill] sm:$0xff] }
 0x55d   : > { %v4286_v43 = vsel %vm3575_vm1, %v4218_v18, 0.0  ;;  %v4222_v52 = vsel %vm8851_vm9, %v4190_v39, 0.0  ;;  %v4219_v51 = vsel %vm8853_vm12, %v4187_v53, 0.0  ;;  %v4063_v63 = vmul.f32 0.6931472, %v5615_v50  ;;  %v2267_v1 = vld [vmem:[#allocation3 + $0x18] sm:$0xff] }
 0x55e   : > { %4287 = vadd.xlane.f32.xlu0 %v4286_v43  ;;  %v4289_v7 = vsel %vm3575_vm1, %v4219_v51, 0.0  ;;  %v4220_v17 = vsel %vm3836_vm0, %v4188_v44, 0.0  ;;  %vm8857_vm7 = vcmp.gt.f32.partialorder %v8856_v47, 0.0  ;;  %vm8859_vm10 = vcmp.gt.f32.partialorder %v8858_v36, 0.0  ;;  %v8880_v51 = vld [vmem:[#allocation63_spill] sm:$0xff] }
 0x55f   : > { %4290 = vadd.xlane.f32.xlu1 %v4289_v7  ;;  %v4223_v12 = vsel %vm8857_vm7, %v4191_v46, 0.0  ;;  %v4217_v49 = vsel %vm8859_vm10, %v4185_v19, 0.0  ;;  %v4157_v15 = vsub.f32 %v4125_v16, %v8040_v56  ;;  %v4103_v42 = vmul.f32 0.6931472, %v8083_v45  ;;  %v5617_v10 = vpop.eup %5616  ;;  %v2266_v56 = vld [vmem:[#allocation3 + $0x10] sm:$0xff]  ;;  %v8863_v16 = vld [vmem:[#allocation69_spill] sm:$0xff] }
 0x560   : > { %v4129_v41 = vsub.f32 %v8860_v3, %v4059_v59  ;;  %v4298_v2 = vsel %vm3575_vm1, %v4222_v52, 0.0  ;;  %v4131_v30 = vsub.f32 %v8054_v8, %v4063_v63  ;;  %v4162_v25 = vsub.f32 %v4130_v28, %v8129_v11  ;;  %v5619_v29 = vpop.eup %5618  ;;  %v8871_v28 = vld [vmem:[#allocation56_spill] sm:$0xff]  ;;  %v8881_v63 = vld [vmem:[#allocation54_spill] sm:$0xff]  ;;  %v8882_v7 = vld [vmem:[#allocation57_spill] sm:$0xff] }
 0x561   : > { %v4067_v60 = vmul.f32 0.6931472, %v5617_v10  ;;  %v4189_v0 = vmul.f32 %v4157_v15, %v8861_v22  ;;  %v4134_v55 = vsub.f32 %v8063_v20, %v4069_v33  ;;  %v4128_v21 = vsub.f32 %v8065_v40, %v4057_v62  ;;  %v8876_v33 = vld [vmem:[#allocation33_spill] sm:$0xff]  ;;  %v8887_v3 = vld [vmem:[#allocation39_spill] sm:$0xff] }
 0x562   : > { %v4071_v48 = vmul.f32 0.6931472, %v5619_v29  ;;  %4299 = vadd.xlane.f32.xlu0 %v4298_v2  ;;  %v4163_v45 = vsub.f32 %v4131_v30, %v8129_v11  ;;  %v4194_v9 = vmul.f32 %v4162_v25, %v8862_v26  ;;  %v4164_v13 = vsub.f32 %v4132_v31, %v4103_v42 }
 0x563   : > { %v4133_v8 = vsub.f32 %v8863_v16, %v4067_v60  ;;  %vm8865_vm0 = vcmp.gt.f32.partialorder %v8864_v58, 0.0  ;;  %v4166_v61 = vsub.f32 %v4134_v55, %v4103_v42  ;;  %v4160_v32 = vsub.f32 %v4128_v21, %v8129_v11  ;;  %v2192_v58 = vld [vmem:[#allocation2] sm:$0xff] }
 0x564   : > { %v4221_v4 = vsel %vm8865_vm0, %v4189_v0, 0.0  ;;  %v4195_v20 = vmul.f32 %v4163_v45, %v8866_v6  ;;  %vm8868_vm2 = vcmp.gt.f32.partialorder %v8867_v23, 0.0  ;;  %v4135_v62 = vsub.f32 %v8101_v34, %v4071_v48  ;;  %v8874_v34 = vld [vmem:[#allocation35_spill] sm:$0xff] }
 0x565   : > { %v4226_v40 = vsel %vm8868_vm2, %v4194_v9, 0.0  ;;  %v2270_v27 = vmul.f32 0.0009765625, %v2266_v56  ;;  %v4292_v39 = vsel %vm3575_vm1, %v4220_v17, 0.0  ;;  %v4198_v53 = vmul.f32 %v4166_v61, %v8869_v14  ;;  %v8883_v17 = vld [vmem:[#allocation38_spill] sm:$0xff] }
 0x566   : > { %v4192_v44 = vmul.f32 %v4160_v32, %v8870_v57  ;;  %v4196_v59 = vmul.f32 %v4164_v13, %v8871_v28  ;;  %4293 = vadd.xlane.f32.xlu0 %v4292_v39  ;;  %vm8873_vm4 = vcmp.gt.f32.partialorder %v8872_v35, 0.0  ;;  %v4167_v37 = vsub.f32 %v4135_v62, %v4103_v42  ;;  %v2265_v56 = vld [vmem:[#allocation3 + $0x8] sm:$0xff]  ;;  %v8290_v32 = vld [vmem:[#allocation2 + $0x40] sm:$0xff]  ;;  %v8297_v62 = vld [vmem:[#allocation2 + $0x10] sm:$0xff] }
 0x567   : > { %v4227_v18 = vsel %vm8873_vm4, %v4195_v20, 0.0  ;;  %v4161_v46 = vsub.f32 %v4129_v41, %v8129_v11  ;;  %v4165_v38 = vsub.f32 %v4133_v8, %v4103_v42  ;;  %vm8875_vm3 = vcmp.gt.f32.partialorder %v8874_v34, 0.0  ;;  %v8885_v42 = vld [vmem:[#allocation36_spill] sm:$0xff]  ;;  %v2193_v6 = vld [vmem:[#allocation2 + $0x8] sm:$0xff] }
 0x568   : > { %v4313_v19 = vsel %vm3575_vm1, %v4227_v18, 0.0  ;;  %v4230_v50 = vsel %vm8875_vm3, %v4198_v53, 0.0  ;;  %vm8877_vm6 = vcmp.gt.f32.partialorder %v8876_v33, 0.0  ;;  %vm8879_vm15 = vcmp.gt.f32.partialorder %v8878_v5, 0.0  ;;  %v8292_v20 = vld [vmem:[#allocation2 + $0x28] sm:$0xff]  ;;  %v8307_v28 = vld [vmem:[#allocation2 + $0x38] sm:$0xff] }
 0x569   : > { %v4224_v43 = vsel %vm8877_vm6, %v4192_v44, 0.0  ;;  %v4228_v52 = vsel %vm8879_vm15, %v4196_v59, 0.0  ;;  %4314 = vadd.xlane.f32.xlu1 %v4313_v19  ;;  %v4199_v24 = vmul.f32 %v4167_v37, %v8880_v51  ;;  %v4301_v31 = vsel %vm3575_vm1, %v4223_v12, 0.0  ;;  %v8302_v14 = vld [vmem:[#allocation2 + $0x48] sm:$0xff]  ;;  %v2195_v44 = vld [vmem:[#allocation2 + $0x18] sm:$0xff]  ;;  %v8311_v35 = vld [vmem:[#allocation2 + $0x50] sm:$0xff] }
 0x56a   : > { %v4193_v11 = vmul.f32 %v4161_v46, %v8881_v63  ;;  %v4197_v54 = vmul.f32 %v4165_v38, %v8882_v7  ;;  %4302 = vadd.xlane.f32.xlu0 %v4301_v31  ;;  %vm8884_vm13 = vcmp.gt.f32.partialorder %v8883_v17, 0.0  ;;  %vm2314_vm8 = vcmp.eq.f32.partialorder %v2270_v27, 0.0  ;;  %v8314_v37 = vld [vmem:[#allocation2 + $0x68] sm:$0xff]  ;;  %v8317_v19 = vld [vmem:[#allocation2 + $0x58] sm:$0xff]  ;;  %v8322_v33 = vld [vmem:[#allocation2 + $0x70] sm:$0xff]  ;;  %v8332_v17 = vpop.permute.xlu1 %2419 }
 0x56b   : > { %v4231_v47 = vsel %vm8884_vm13, %v4199_v24, 0.0  ;;  %v2271_v36 = vmul.f32 0.0009765625, %v2267_v1  ;;  %v4322_v15 = vsel %vm3575_vm1, %v4230_v50, 0.0  ;;  %vm8886_vm14 = vcmp.gt.f32.partialorder %v8885_v42, 0.0  ;;  %v8326_v1 = vld [vmem:[#allocation2 + $0x78] sm:$0xff] }
 0x56c   : > { %v4225_v10 = vsel %vm8886_vm14, %v4193_v11, 0.0  ;;  %vm8888_vm5 = vcmp.gt.f32.partialorder %v8887_v3, 0.0  ;;  %v4283_v12 = vsel %vm3575_vm1, %v4217_v49, 0.0  ;;  %v2318_v2 = vsel %vm2314_vm8, 1e-10, %v2270_v27  ;;  %v8299_v27 = vld [vmem:[#allocation2 + $0x30] sm:$0xff] }
 0x56d   : > { %v4229_v41 = vsel %vm8888_vm5, %v4197_v54, 0.0  ;;  %4323 = vadd.xlane.f32.xlu1 %v4322_v15  ;;  %vm2315_vm11 = vcmp.eq.f32.partialorder %v2271_v36, 0.0  ;;  %v4325_v30 = vsel %vm3575_vm1, %v4231_v47, 0.0  ;;  %5620 = vlog2.f32 %v2318_v2 }
 0x56e   : > { %4284 = vadd.xlane.f32.xlu0 %v4283_v12  ;;  %v4295_v25 = vsel %vm3575_vm1, %v4221_v4, 0.0  ;;  %v2319_v29 = vsel %vm2315_vm11, 1e-10, %v2271_v36  ;;  %v4310_v60 = vsel %vm3575_vm1, %v4226_v40, 0.0  ;;  %v4304_v22 = vsel %vm3575_vm1, %v4224_v43, 0.0  ;;  %v8287_v4 = vld [vmem:[#allocation2 + $0x20] sm:$0xff] }
 0x56f   : > { %5622 = vlog2.f32 %v2319_v29  ;;  %v4316_v49 = vsel %vm3575_vm1, %v4228_v52, 0.0  ;;  %v4307_v48 = vsel %vm3575_vm1, %v4225_v10, 0.0  ;;  %v2269_v26 = vmul.f32 0.0009765625, %v2265_v56  ;;  %v8295_v40 = vld [vmem:[#allocation2 + $0x60] sm:$0xff] }
 0x570   : > { %v4319_v9 = vsel %vm3575_vm1, %v4229_v41, 0.0  ;;  %v2224_v61 = vadd.f32 %v8287_v4, %v2192_v58  ;;  %v2233_v39 = vadd.f32 %v8292_v20, %v2193_v6  ;;  %v2242_v59 = vadd.f32 %v8299_v27, %v8297_v62 }
 0x571   : > { %4326 = vadd.xlane.f32.xlu1 %v4325_v30  ;;  %vm2313_vm9 = vcmp.eq.f32.partialorder %v2269_v26, 0.0  ;;  %v2251_v38 = vadd.f32 %v8307_v28, %v2195_v44 }
 0x572   : > { %4296 = vadd.xlane.f32.xlu0 %v4295_v25  ;;  %v2317_v13 = vsel %vm2313_vm9, 1e-10, %v2269_v26  ;;  %v2225_v23 = vadd.f32 %v2224_v61, %v8290_v32  ;;  %v2234_v18 = vadd.f32 %v2233_v39, %v8302_v14  ;;  %v2243_v34 = vadd.f32 %v2242_v59, %v8311_v35 }
 0x573   : > { %5624 = vlog2.f32 %v2317_v13  ;;  %v2252_v52 = vadd.f32 %v2251_v38, %v8317_v19  ;;  %v2211_v38 = vmul.f32 0.0009765625, %v2195_v44 }
 0x574   : > { %v2226_v53 = vadd.f32 %v2225_v23, %v8295_v40  ;;  %v2235_v43 = vadd.f32 %v2234_v18, %v8314_v37  ;;  %v2244_v51 = vadd.f32 %v2243_v34, %v8322_v33 }
 0x575   : > { %v2253_v63 = vadd.f32 %v2252_v52, %v8326_v1  ;;  %vm2275_vm4 = vcmp.eq.f32.partialorder %v2211_v38, 0.0 }
 0x576   : > { %4311 = vadd.xlane.f32.xlu0 %v4310_v60  ;;  %v2227_v46 = vrot.slane %v2226_v53, 4  ;;  %v2236_v24 = vrot.slane %v2235_v43, 4  ;;  %v2245_v7 = vrot.slane %v2244_v51, 4 }
 0x577   : > { %v5621_v0 = vpop.eup %5620  ;;  %v2254_v36 = vrot.slane %v2253_v63, 4 }
 0x578   : > { %v2414_v55 = vmul.f32 0.6931472, %v5621_v0  ;;  %v2228_v5 = vadd.f32 %v2227_v46, %v2226_v53  ;;  %v2237_v54 = vadd.f32 %v2236_v24, %v2235_v43  ;;  %v2246_v15 = vadd.f32 %v2245_v7, %v2244_v51 }
 0x579   : > { %v5623_v21 = vpop.eup %5622  ;;  %v2255_v41 = vadd.f32 %v2254_v36, %v2253_v63  ;;  %v8355_v24 = vsel %vm2275_vm4, 1e-10, %v2211_v38 }
 0x57a   : > { %4305 = vadd.xlane.f32.xlu0 %v4304_v22  ;;  %v2416_v45 = vmul.f32 0.6931472, %v5623_v21  ;;  %v2229_v31 = vrot.slane %v2228_v5, 2  ;;  %v2238_v10 = vrot.slane %v2237_v54, 2  ;;  %v2247_v2 = vrot.slane %v2246_v15, 2 }
 0x57b   : > { %v2256_v29 = vrot.slane %v2255_v41, 2 }
 0x57c   : > { %v2230_v47 = vadd.f32 %v2229_v31, %v2228_v5  ;;  %v2239_v30 = vadd.f32 %v2238_v10, %v2237_v54  ;;  %v2248_v22 = vadd.f32 %v2247_v2, %v2246_v15 }
 0x57d   : > { %v5625_v16 = vpop.eup %5624  ;;  %v2257_v21 = vadd.f32 %v2256_v29, %v2255_v41 }
 0x57e   : > { %4317 = vadd.xlane.f32.xlu0 %v4316_v49  ;;  %v2412_v8 = vmul.f32 0.6931472, %v5625_v16  ;;  %v2231_v3 = vrot.slane %v2230_v47, 1  ;;  %v2208_v49 = vmul.f32 0.0009765625, %v2192_v58  ;;  %v2209_v16 = vmul.f32 0.0009765625, %v2193_v6 }
 0x57f   : > { %v2210_v58 = vmul.f32 0.0009765625, %v8297_v62 }
 0x580   : > { %v2232_v25 = vadd.f32 %v2231_v3, %v2230_v47  ;;  %vm2272_vm1 = vcmp.eq.f32.partialorder %v2208_v49, 0.0  ;;  %vm2273_vm7 = vcmp.eq.f32.partialorder %v2209_v16, 0.0  ;;  %v8889_v47 = vlaneseq }
 0x581   : > { %v8344_v61 = vsel %vm2272_vm1, 1e-10, %v2208_v49  ;;  %vm2274_vm0 = vcmp.eq.f32.partialorder %v2210_v58, 0.0  ;;  %v8348_v6 = vsel %vm2273_vm7, 1e-10, %v2209_v16 }
 0x582   : > { %2429 = vperm.xlu1 %5440, %v2414_v55   ;;  %4308 = vadd.xlane.f32.xlu0 %v4307_v48  ;;  %v2240_v55 = vrot.slane %v2239_v30, 1  ;;  %v2260_v56 = vmul.f32 0.0009765625, %v2232_v25  ;;  %v2249_v48 = vrot.slane %v2248_v22, 1  ;;  %5626 = vlog2.f32 %v8344_v61 }
 0x583   : > { %v8352_v52 = vsel %vm2274_vm0, 1e-10, %v2210_v58  ;;  %v2321_v36 = vand.u32 127, %v8889_v47 }
 0x584   : > { %v2241_v26 = vadd.f32 %v2240_v55, %v2239_v30  ;;  %vm2304_vm12 = vcmp.eq.f32.partialorder %v2260_v56, 0.0 }
 0x585   : > { %v2308_v39 = vsel %vm2304_vm12, 1e-10, %v2260_v56  ;;  %v2322_v25 = vadd.s32 128, %v2321_v36  ;;  %v8374_v38 = vadd.s32 256, %v2321_v36 }
 0x586   : > { %2434 = vperm.xlu1 %5440, %v2416_v45   ;;  %4320 = vadd.xlane.f32.xlu0 %v4319_v9  ;;  %v2258_v9 = vrot.slane %v2257_v21, 1  ;;  %v2261_v23 = vmul.f32 0.0009765625, %v2241_v26  ;;  %5628 = vlog2.f32 %v2308_v39 }
 0x587   : > { %5630 = vlog2.f32 %v8348_v6 }
 0x588   : > { %v2259_v59 = vadd.f32 %v2258_v9, %v2257_v21  ;;  %vm2305_vm10 = vcmp.eq.f32.partialorder %v2261_v23, 0.0 }
 0x589   : > { %v2309_v5 = vsel %vm2305_vm10, 1e-10, %v2261_v23  ;;  %v2326_v23 = vand.u32 31, %v2322_v25 }
 0x58a   : > { %v2263_v34 = vmul.f32 0.0009765625, %v2259_v59  ;;  %5632 = vlog2.f32 %v2309_v5  ;;  %v2217_v5 = vmul.f32 0.0009765625, %v8302_v14 }
 0x58b   : > { %5634 = vlog2.f32 %v8352_v52  ;;  %vm8414_vm5 = vcmp.lt.s32.totalorder %v2326_v23, 30 }
 0x58c   : > { %vm2307_vm3 = vcmp.eq.f32.partialorder %v2263_v34, 0.0  ;;  %v5627_v31 = vpop.eup %5626  ;;  %vm2281_vm13 = vcmp.eq.f32.partialorder %v2217_v5, 0.0 }
 0x58d   : > { %v2311_v63 = vsel %vm2307_vm3, 1e-10, %v2263_v34  ;;  %v2354_v15 = vmul.f32 0.6931472, %v5627_v31  ;;  %v2218_v31 = vmul.f32 0.0009765625, %v8311_v35 }
 0x58f   : > { %vm2282_vm8 = vcmp.eq.f32.partialorder %v2218_v31, 0.0 }
 0x590   : > { %v5629_v7 = vpop.eup %5628 }
 0x591   : > { %v8360_v10 = vmul.f32 0.6931472, %v5629_v7  ;;  %v5631_v41 = vpop.eup %5630 }
 0x592   : > { %v2356_v26 = vmul.f32 0.6931472, %v5631_v41 }
 0x593   : > { %v2393_v29 = vsub.f32 %v2354_v15, %v8360_v10 }
 0x594   : > { %v5633_v30 = vpop.eup %5632 }
 0x595   : > { %v5635_v55 = vpop.eup %5634  ;;  %v8369_v9 = vmul.f32 0.6931472, %v5633_v30  ;;  %v2437_v39 = vsub.f32 %v2393_v29, %v8332_v17  ;;  %v2212_v30 = vmul.f32 0.0009765625, %v8287_v4 }
 0x597   : > { %v8389_v47 = vmul.f32 %v2437_v39, %v8344_v61  ;;  %v2215_v39 = vmul.f32 0.0009765625, %v8307_v28  ;;  %vm2276_vm11 = vcmp.eq.f32.partialorder %v2212_v30, 0.0 }
 0x599   : > { %vm2279_vm7 = vcmp.eq.f32.partialorder %v2215_v39, 0.0 }
 0x59c   : > { %2424 = vperm.xlu0 %5441, %v2412_v8   ;;  %v2250_v8 = vadd.f32 %v2249_v48, %v2248_v22 }
 0x59e   : > { %v2262_v18 = vmul.f32 0.0009765625, %v2250_v8  ;;  %v2325_v8 = vand.u32 31, %v2321_v36 }
 0x5a0   : > { %vm2306_vm2 = vcmp.eq.f32.partialorder %v2262_v18, 0.0  ;;  %vm8392_vm6 = vcmp.lt.s32.totalorder %v2325_v8, 30  ;;  %v8424_v8 = vsel %vm2282_vm8, 1e-10, %v2218_v31 }
 0x5a1   : > { %v2310_v51 = vsel %vm2306_vm2, 1e-10, %v2262_v18  ;;  %v2358_v18 = vmul.f32 0.6931472, %v5635_v55  ;;  %v2469_v41 = vsel %vm8392_vm6, %v8389_v47, 0.0 }
 0x5a2   : > { %5636 = vlog2.f32 %v2310_v51  ;;  %v2394_v51 = vsub.f32 %v2356_v26, %v8369_v9 }
 0x5a3   : > { %5638 = vlog2.f32 %v8355_v24 }
 0x5a4   : > { %5640 = vlog2.f32 %v2311_v63  ;;  %v2219_v63 = vmul.f32 0.0009765625, %v8317_v19  ;;  %v2438_v61 = vsub.f32 %v2394_v51, %v8332_v17 }
 0x5a6   : > { %vm2283_vm14 = vcmp.eq.f32.partialorder %v2219_v63, 0.0  ;;  %v8420_v26 = vmul.f32 %v2438_v61, %v8348_v6 }
 0x5ac   : > { %v5637_v48 = vpop.eup %5636 }
 0x5ad   : > { %v5639_v16 = vpop.eup %5638 }
 0x5ae   : > { %v5641_v58 = vpop.eup %5640 }
 0x5af   : > { %v8386_v7 = vmul.f32 0.6931472, %v5641_v58 }
 0x5b2   : > { %v8305_v57 = vpop.xlane.xlu0 %4239 }
 0x5b6   : > { %v8336_v12 = vpop.xlane.xlu1 %4251 }
 0x5ba   : > { %v8320_v50 = vpop.xlane.xlu0 %4233 }
 0x5bc   : > { %v8340_v0 = vpop.xlane.xlu1 %4254 }
 0x5be   : > { %v8330_v11 = vpop.xlane.xlu0 %4245 }
 0x5c2   : > { %v4237_v13 = vpop.xlane.xlu1 %4236 }
 0x5c3   : > { %v4328_v21 = vadd.f32 %v4237_v13, %v8320_v50  ;;  %v8376_v50 = vadd.s32 384, %v2321_v36  ;;  %v8378_v13 = vmul.f32 0.6931472, %v5637_v48 }
 0x5c4   : > { %v8334_v42 = vpop.xlane.xlu0 %4242 }
 0x5c5   : > { %v2328_v35 = vand.u32 31, %v8376_v50  ;;  %v2395_v19 = vsub.f32 %v2358_v18, %v8378_v13 }
 0x5c7   : > { %vm8468_vm3 = vcmp.lt.s32.totalorder %v2328_v35, 30 }
 0x5c8   : > { %v4249_v46 = vpop.xlane.xlu1 %4248 }
 0x5c9   : > { %v8338_v60 = vpop.xlane.xlu0 %4263  ;;  %v4337_v22 = vadd.f32 %v4249_v46, %v8330_v11  ;;  %v2216_v46 = vmul.f32 0.0009765625, %v8290_v32  ;;  %v2360_v32 = vmul.f32 0.6931472, %v5639_v16 }
 0x5cb   : > { %v4338_v59 = vadd.f32 %v4337_v22, %v8336_v12  ;;  %vm2280_vm15 = vcmp.eq.f32.partialorder %v2216_v46, 0.0  ;;  %v2396_v15 = vsub.f32 %v2360_v32, %v8386_v7  ;;  %v2214_v22 = vmul.f32 0.0009765625, %v8299_v27 }
 0x5cd   : > { %v4339_v36 = vadd.f32 %v4338_v59, %v8340_v0  ;;  %v2440_v59 = vsub.f32 %v2396_v15, %v8332_v17  ;;  %vm2278_vm1 = vcmp.eq.f32.partialorder %v2214_v22, 0.0 }
 0x5d0   : > { %v4270_v62 = vpop.xlane.xlu1 %4269 }
 0x5d3   : > { %v8342_v45 = vpop.xlane.xlu0 %4275 }
 0x5d5   : > { %v4267_v54 = vpop.xlane.xlu1 %4266 }
 0x5d8   : > { %v4258_v53 = vpop.xlane.xlu0 %4257 }
 0x5df   : > { %v8350_v43 = vpop.xlane.xlu0 %4278  ;;  %v4261_v2 = vpop.xlane.xlu1 %4260 }
 0x5e0   : > { %v4346_v56 = vadd.f32 %v4261_v2, %v4258_v53  ;;  %v4329_v53 = vadd.f32 %v4328_v21, %v8305_v57  ;;  %v4340_v2 = vrot.slane %v4339_v36, 4  ;;  %v2439_v21 = vsub.f32 %v2395_v19, %v8332_v17 }
 0x5e1   : > { %v8453_v19 = vsel %vm2279_vm7, 1e-10, %v2215_v39 }
 0x5e2   : > { %v4347_v34 = vadd.f32 %v4346_v56, %v8338_v60  ;;  %v2327_v60 = vand.u32 31, %v8374_v38  ;;  %v4341_v27 = vadd.f32 %v4340_v2, %v4339_v36  ;;  %v2455_v61 = vmul.f32 %v2439_v21, %v8352_v52 }
 0x5e3   : > { %v4273_v44 = vpop.xlane.xlu0 %4272  ;;  %v4282_v25 = vpop.xlane.xlu1 %4281 }
 0x5e4   : > { %v4355_v12 = vadd.f32 %v4273_v44, %v4270_v62  ;;  %v4330_v62 = vadd.f32 %v4329_v53, %v8334_v42  ;;  %v4348_v44 = vadd.f32 %v4347_v34, %v4267_v54  ;;  %v8408_v42 = vsel %vm2280_vm15, 1e-10, %v2216_v46 }
 0x5e5   : > { %v8410_v54 = vsel %vm2281_vm13, 1e-10, %v2217_v5  ;;  %5642 = vlog2.f32 %v8408_v42  ;;  %v8435_v34 = vsel %vm2276_vm11, 1e-10, %v2212_v30  ;;  %vm8437_vm12 = vcmp.lt.s32.totalorder %v2327_v60, 30 }
 0x5e6   : > { %v4356_v0 = vadd.f32 %v4355_v12, %v8342_v45  ;;  %v2213_v45 = vmul.f32 0.0009765625, %v8292_v20  ;;  %v4331_v56 = vrot.slane %v4330_v62, 4  ;;  %v4349_v48 = vrot.slane %v4348_v44, 4 }
 0x5e7   : > { %v8427_v20 = vsel %vm2283_vm14, 1e-10, %v2219_v63  ;;  %5644 = vlog2.f32 %v8410_v54  ;;  %v4342_v17 = vrot.slane %v4341_v27, 2  ;;  %v2471_v35 = vsel %vm8437_vm12, %v2455_v61, 0.0 }
 0x5e8   : > { %v4357_v16 = vadd.f32 %v4356_v0, %v8350_v43  ;;  %vm2277_vm9 = vcmp.eq.f32.partialorder %v2213_v45, 0.0  ;;  %v4332_v6 = vadd.f32 %v4331_v56, %v4330_v62  ;;  %v4350_v43 = vadd.f32 %v4349_v48, %v4348_v44 }
 0x5e9   : > { %v8442_v51 = vsel %vm2277_vm9, 1e-10, %v2213_v45  ;;  %5646 = vlog2.f32 %v8424_v8  ;;  %v4343_v62 = vadd.f32 %v4342_v17, %v4341_v27  ;;  %v2456_v56 = vmul.f32 %v2440_v59, %v8355_v24 }
 0x5ea   : > { %v4358_v53 = vrot.slane %v4357_v16, 4  ;;  %v4333_v63 = vrot.slane %v4332_v6, 2  ;;  %v4351_v32 = vrot.slane %v4350_v43, 2  ;;  %5648 = vlog2.f32 %v8435_v34 }
 0x5eb   : > { %v8362_v3 = vpop.xlane.xlu0 %4287  ;;  %5650 = vlog2.f32 %v8442_v51  ;;  %vm8898_vm15 = vcmask 0  }
 0x5ec   : > { %v4291_v58 = vpop.xlane.xlu1 %4290  ;;  %v4359_v60 = vadd.f32 %v4358_v53, %v4357_v16  ;;  %v4352_v2 = vadd.f32 %v4351_v32, %v4350_v43  ;;  %vm8899_vm13 = vmmov %vm8898_vm15 }
 0x5ed   : > { %vm8900_vm8 = vmmov %vm8899_vm13 }
 0x5ee   : > { %vm8901_vm14 = vmmov %vm8900_vm8 }
 0x5ef   : > { %v8366_v49 = vpop.xlane.xlu0 %4299  ;;  %v5643_v30 = vpop.eup %5642  ;;  %vm8902_vm11 = vmmov %vm8900_vm8 }
 0x5f0   : > { %v8493_v32 = vmul.f32 0.6931472, %v5643_v30  ;;  %vm8903_vm9 = vmmov %vm8900_vm8 }
 0x5f1   : > { %v5645_v21 = vpop.eup %5644 }
 0x5f3   : > { %v4294_v11 = vpop.xlane.xlu0 %4293  ;;  %v5647_v39 = vpop.eup %5646 }
 0x5f6   : > { %v4315_v52 = vpop.xlane.xlu1 %4314 }
 0x5f7   : > { %v4303_v14 = vpop.xlane.xlu0 %4302 }
 0x5fb   : > { %v4285_v29 = vpop.xlane.xlu0 %4284 }
 0x5fc   : > { %v4364_v4 = vadd.f32 %v4285_v29, %v4282_v25  ;;  %v4360_v25 = vrot.slane %v4359_v60, 2 }
 0x5fe   : > { %v4365_v23 = vadd.f32 %v4364_v4, %v8362_v3  ;;  %v2220_v3 = vmul.f32 0.0009765625, %v8295_v40  ;;  %v8449_v40 = vsel %vm2278_vm1, 1e-10, %v2214_v22  ;;  %vm8904_vm1 = vmmov %vm8900_vm8 }
 0x5ff   : > { %v4297_v18 = vpop.xlane.xlu0 %4296  ;;  %5652 = vlog2.f32 %v8449_v40  ;;  %vm8905_vm7 = vmmov %vm8904_vm1 }
 0x600   : > { %v4366_v46 = vadd.f32 %v4365_v23, %v4291_v58  ;;  %v4373_v38 = vadd.f32 %v4297_v18, %v4294_v11  ;;  %v2221_v11 = vmul.f32 0.0009765625, %v8314_v37  ;;  %v2223_v37 = vmul.f32 0.0009765625, %v8326_v1 }
 0x601   : > { %vm2284_vm10 = vcmp.eq.f32.partialorder %v2220_v3, 0.0  ;;  %5654 = vlog2.f32 %v8453_v19  ;;  %v4344_v1 = vrot.slane %v4343_v62, 1  ;;  %v4353_v23 = vrot.slane %v4352_v2, 1 }
 0x602   : > { %v4374_v5 = vadd.f32 %v4373_v38, %v8366_v49  ;;  %v4367_v12 = vrot.slane %v4366_v46, 4  ;;  %v2222_v49 = vmul.f32 0.0009765625, %v8322_v33  ;;  %v4334_v33 = vadd.f32 %v4333_v63, %v4332_v6 }
 0x603   : > { %v8444_v31 = vpop.xlane.xlu0 %4311  ;;  %vm2285_vm0 = vcmp.eq.f32.partialorder %v2221_v11, 0.0  ;;  %5656 = vlog2.f32 %v8427_v20  ;;  %v8464_v45 = vsel %vm2284_vm10, 1e-10, %v2220_v3  ;;  %vm2287_vm4 = vcmp.eq.f32.partialorder %v2223_v37, 0.0 }
 0x604   : > { %v4375_v36 = vadd.f32 %v4374_v5, %v4303_v14  ;;  %v2470_v14 = vsel %vm8414_vm5, %v8420_v26, 0.0  ;;  %v4368_v0 = vadd.f32 %v4367_v12, %v4366_v46  ;;  %vm2286_vm2 = vcmp.eq.f32.partialorder %v2222_v49, 0.0  ;;  %v4324_v5 = vpop.xlane.xlu1 %4323 }
 0x605   : > { %v2485_v48 = vadd.f32 %v2470_v14, %v2469_v41  ;;  %v8478_v16 = vsel %vm2285_vm0, 1e-10, %v2221_v11  ;;  %v4335_v27 = vrot.slane %v4334_v33, 1  ;;  %v8480_v50 = vsel %vm2286_vm2, 1e-10, %v2222_v49  ;;  %v5649_v41 = vpop.eup %5648 }
 0x606   : > { %v4376_v44 = vrot.slane %v4375_v36, 4  ;;  %v4369_v4 = vrot.slane %v4368_v0, 2  ;;  %v4361_v58 = vadd.f32 %v4360_v25, %v4359_v60  ;;  %5658 = vlog2.f32 %v8464_v45  ;;  %v5651_v18 = vpop.eup %5650 }
 0x607   : > { %v4306_v15 = vpop.xlane.xlu0 %4305  ;;  %v8486_v47 = vsel %vm2287_vm4, 1e-10, %v2223_v37  ;;  %v4345_v59 = vadd.f32 %v4344_v1, %v4343_v62  ;;  %5660 = vlog2.f32 %v8478_v16  ;;  %v2472_v46 = vsel %vm8468_vm3, %v2456_v56, 0.0 }
 0x608   : > { %v4377_v29 = vadd.f32 %v4376_v44, %v4375_v36  ;;  %v4370_v6 = vadd.f32 %v4369_v4, %v4368_v0  ;;  %5662 = vlog2.f32 %v8480_v50  ;;  %v2486_v38 = vadd.f32 %v2485_v48, %v2471_v35 }
 0x609   : > { %v5653_v53 = vpop.eup %5652  ;;  %v4336_v3 = vadd.f32 %v4335_v27, %v4334_v33  ;;  %v4354_v17 = vadd.f32 %v4353_v23, %v4352_v2  ;;  %5664 = vlog2.f32 %v8486_v47  ;;  %v4362_v11 = vrot.slane %v4361_v58, 1  ;;  %v4327_v27 = vpop.xlane.xlu1 %4326 }
 0x60a   : > { %v4378_v24 = vrot.slane %v4377_v29, 2  ;;  %v8495_v36 = vmul.f32 0.6931472, %v5645_v21  ;;  %v4401_v49 = vmax.f32 %v4345_v59, 0.0  ;;  %v8497_v62 = vmul.f32 0.6931472, %v5647_v39 }
 0x60b   : > { %v4318_v26 = vpop.xlane.xlu0 %4317  ;;  %v5655_v60 = vpop.eup %5654  ;;  %v2362_v37 = vmul.f32 0.6931472, %v5649_v41  ;;  %v4371_v14 = vrot.slane %v4370_v6, 1  ;;  %v2364_v33 = vmul.f32 0.6931472, %v5651_v18  ;;  %v8500_v2 = vadd.f32 %v2486_v38, %v2472_v46 }
 0x60c   : > { %v4379_v63 = vadd.f32 %v4378_v24, %v4377_v29  ;;  %v4400_v25 = vmax.f32 %v4336_v3, 0.0  ;;  %v4402_v29 = vmax.f32 %v4354_v17, 0.0  ;;  %v4363_v21 = vadd.f32 %v4362_v11, %v4361_v58 }
 0x60d   : > { %v5657_v61 = vpop.eup %5656  ;;  %v2401_v48 = vsub.f32 %v8493_v32, %v8360_v10  ;;  %v2368_v4 = vmul.f32 0.6931472, %v5655_v60  ;;  %v4372_v41 = vadd.f32 %v4371_v14, %v4370_v6  ;;  %v2397_v59 = vsub.f32 %v2362_v37, %v8360_v10 }
 0x60e   : > { %v4380_v56 = vrot.slane %v4379_v63, 1  ;;  %v8505_v23 = vmul.f32 0.6931472, %v5657_v61  ;;  %v4408_v18 = vsel %vm8899_vm13, %v4400_v25, 0.0  ;;  %v4403_v17 = vmax.f32 %v4363_v21, 0.0 }
 0x60f   : > { %v4309_v43 = vpop.xlane.xlu0 %4308  ;;  %v2402_v11 = vsub.f32 %v8495_v36, %v8369_v9  ;;  %v2403_v32 = vsub.f32 %v8497_v62, %v8378_v13  ;;  %v4404_v37 = vmax.f32 %v4372_v41, 0.0 }
 0x610   : > { %v4382_v12 = vadd.f32 %v4309_v43, %v4306_v15  ;;  %v2366_v15 = vmul.f32 0.6931472, %v5653_v53  ;;  %v5659_v24 = vpop.eup %5658  ;;  %v4411_v43 = vsel %vm8900_vm8, %v4402_v29, 0.0  ;;  %v2404_v61 = vsub.f32 %v8505_v23, %v8386_v7 }
 0x611   : > { %v5661_v58 = vpop.eup %5660  ;;  %v2378_v14 = vmul.f32 0.6931472, %v5659_v24 }
 0x612   : > { %v4383_v44 = vadd.f32 %v4382_v12, %v8444_v31  ;;  %v4409_v31 = vsel %vm8898_vm15, %v4401_v49, 0.0  ;;  %v5663_v53 = vpop.eup %5662  ;;  %v4381_v12 = vadd.f32 %v4380_v56, %v4379_v63  ;;  %v2380_v23 = vmul.f32 0.6931472, %v5661_v58 }
 0x613   : > { %v4321_v0 = vpop.xlane.xlu0 %4320  ;;  %v4410_v3 = vadd.f32 %v4409_v31, %v4408_v18  ;;  %v5665_v6 = vpop.eup %5664 }
 0x614   : > { %v4384_v30 = vadd.f32 %v4383_v44, %v4315_v52  ;;  %v4391_v1 = vadd.f32 %v4321_v0, %v4318_v26  ;;  %v2398_v52 = vsub.f32 %v2364_v33, %v8369_v9  ;;  %v2399_v26 = vsub.f32 %v2366_v15, %v8378_v13  ;;  %v2430_v33 = vpop.permute.xlu1 %2429 }
 0x615   : > { %v4412_v44 = vadd.f32 %v4411_v43, %v4410_v3  ;;  %v4405_v21 = vmax.f32 %v4381_v12, 0.0 }
 0x616   : > { %v4385_v35 = vrot.slane %v4384_v30, 4  ;;  %v4392_v39 = vadd.f32 %v4391_v1, %v4324_v5  ;;  %v2400_v5 = vsub.f32 %v2368_v4, %v8386_v7 }
 0x617   : > { %v4417_v43 = vsel %vm8903_vm9, %v4405_v21, 0.0 }
 0x618   : > { %v4386_v46 = vadd.f32 %v4385_v35, %v4384_v30  ;;  %v4393_v38 = vadd.f32 %v4392_v39, %v4327_v27  ;;  %v4413_v30 = vsel %vm8901_vm14, %v4403_v17, 0.0  ;;  %v2445_v27 = vsub.f32 %v2401_v48, %v2430_v33 }
 0x619   : > { %v2382_v35 = vmul.f32 0.6931472, %v5663_v53  ;;  %v4415_v39 = vsel %vm8902_vm11, %v4404_v37, 0.0  ;;  %v4414_v18 = vadd.f32 %v4413_v30, %v4412_v44  ;;  %v2448_v37 = vsub.f32 %v2404_v61, %v2430_v33  ;;  %v8906_v61 = vld [vmem:[#allocation14_spill] sm:$0xff] }
 0x61a   : > { %v4387_v60 = vrot.slane %v4386_v46, 2  ;;  %v4394_v49 = vrot.slane %v4393_v38, 4  ;;  %v2461_v17 = vmul.f32 %v2445_v27, %v8408_v42  ;;  %vm2332_vm10 = vcmp.lt.s32.totalorder %v8906_v61, 30 }
 0x61b   : > { %v2425_v0 = vpop.permute.xlu0 %2424  ;;  %v4416_v53 = vadd.f32 %v4415_v39, %v4414_v18  ;;  %v2407_v42 = vsub.f32 %v2382_v35, %v8378_v13  ;;  %vm2349_vm0 = vmand %vm2332_vm10, %vm8392_vm6 }
 0x61c   : > { %v4388_v15 = vadd.f32 %v4387_v60, %v4386_v46  ;;  %v4395_v25 = vadd.f32 %v4394_v49, %v4393_v38  ;;  %v2441_v63 = vsub.f32 %v2397_v59, %v2425_v0  ;;  %v2442_v29 = vsub.f32 %v2398_v52, %v2425_v0  ;;  %vm2350_vm2 = vmand %vm2332_vm10, %vm8414_vm5 }
 0x61d   : > { %v2443_v36 = vsub.f32 %v2399_v26, %v2425_v0  ;;  %v2444_v1 = vsub.f32 %v2400_v5, %v2425_v0  ;;  %v2446_v26 = vsub.f32 %v2402_v11, %v2430_v33  ;;  %v2447_v38 = vsub.f32 %v2403_v32, %v2430_v33  ;;  %v2435_v11 = vpop.permute.xlu1 %2434  ;;  %vm2352_vm4 = vmand %vm2332_vm10, %vm8468_vm3 }
 0x61e   : > { %v4396_v62 = vrot.slane %v4395_v25, 2  ;;  %v2457_v56 = vmul.f32 %v2441_v63, %v8435_v34  ;;  %v2458_v4 = vmul.f32 %v2442_v29, %v8442_v51  ;;  %v4389_v31 = vrot.slane %v4388_v15, 1 }
 0x61f   : > { %v2459_v24 = vmul.f32 %v2443_v36, %v8449_v40  ;;  %v2460_v51 = vmul.f32 %v2444_v1, %v8453_v19  ;;  %v2405_v40 = vsub.f32 %v2378_v14, %v8360_v10  ;;  %v2406_v19 = vsub.f32 %v2380_v23, %v8369_v9 }
 0x620   : > { %v2473_v41 = vsel %vm8392_vm6, %v2457_v56, 0.0  ;;  %v4390_v59 = vadd.f32 %v4389_v31, %v4388_v15  ;;  %v4397_v52 = vadd.f32 %v4396_v62, %v4395_v25  ;;  %v2474_v48 = vsel %vm8414_vm5, %v2458_v4, 0.0 }
 0x621   : > { %v2488_v34 = vadd.f32 %v8500_v2, %v2473_v41  ;;  %v2475_v2 = vsel %vm8437_vm12, %v2459_v24, 0.0  ;;  %v4418_v60 = vadd.f32 %v4417_v43, %v4416_v53  ;;  %v2384_v49 = vmul.f32 0.6931472, %v5665_v6 }
 0x622   : > { %v4398_v58 = vrot.slane %v4397_v52, 1  ;;  %v4406_v46 = vmax.f32 %v4390_v59, 0.0  ;;  %v2462_v32 = vmul.f32 %v2446_v26, %v8410_v54  ;;  %v2476_v14 = vsel %vm8468_vm3, %v2460_v51, 0.0 }
 0x623   : > { %v2489_v3 = vadd.f32 %v2488_v34, %v2474_v48  ;;  %v2463_v25 = vmul.f32 %v2447_v38, %v8424_v8  ;;  %v2477_v63 = vsel %vm8392_vm6, %v2461_v17, 0.0  ;;  %v2449_v9 = vsub.f32 %v2405_v40, %v2435_v11  ;;  %vm2351_vm6 = vmand %vm2332_vm10, %vm8437_vm12  ;;  %v4432_v38 = vld [vmem:[#allocation4] sm:$0x1] }
 0x624   : > { %v4399_v5 = vadd.f32 %v4398_v58, %v4397_v52  ;;  %v4419_v12 = vsel %vm8904_vm1, %v4406_v46, 0.0  ;;  %v2464_v33 = vmul.f32 %v2448_v37, %v8427_v20  ;;  %v2478_v30 = vsel %vm8414_vm5, %v2462_v32, 0.0  ;;  %vm8907_vm5 = vmmov %vm8904_vm1 }
 0x625   : > { %v2490_v44 = vadd.f32 %v2489_v3, %v2475_v2  ;;  %v4420_v0 = vadd.f32 %v4419_v12, %v4418_v60  ;;  %v2450_v13 = vsub.f32 %v2406_v19, %v2435_v11  ;;  %v2408_v36 = vsub.f32 %v2384_v49, %v8386_v7 }
 0x626   : > { %v4407_v10 = vmax.f32 %v4399_v5, 0.0  ;;  %v2451_v1 = vsub.f32 %v2407_v42, %v2435_v11  ;;  %v2465_v21 = vmul.f32 %v2449_v9, %v8464_v45  ;;  %v2479_v62 = vsel %vm8437_vm12, %v2463_v25, 0.0 }
 0x627   : > { %v2491_v15 = vadd.f32 %v2490_v44, %v2476_v14  ;;  %v2466_v56 = vmul.f32 %v2450_v13, %v8478_v16  ;;  %v2452_v4 = vsub.f32 %v2408_v36, %v2435_v11  ;;  %v2480_v7 = vsel %vm8468_vm3, %v2464_v33, 0.0 }
 0x628   : > { %v4421_v6 = vsel %vm8905_vm7, %v4407_v10, 0.0  ;;  %v2467_v31 = vmul.f32 %v2451_v1, %v8480_v50  ;;  %v2481_v27 = vsel %vm2349_vm0, %v2465_v21, 0.0  ;;  %v4433_v40 = vmul.f32 0.0009765625, %v4432_v38 }
 0x629   : > { %v4422_v29 = vadd.f32 %v4421_v6, %v4420_v0  ;;  %v2492_v54 = vadd.f32 %v2491_v15, %v2477_v63  ;;  %v2468_v16 = vmul.f32 %v2452_v4, %v8486_v47  ;;  %v2482_v23 = vsel %vm2350_vm2, %v2466_v56, 0.0 }
 0x62a   : > { %v2483_v35 = vsel %vm2351_vm6, %v2467_v31, 0.0 }
 0x62b   : > { %4423 = vadd.xlane.f32.xlu0 %v4422_v29  ;;  %v2493_v8 = vadd.f32 %v2492_v54, %v2478_v30  ;;  %v2484_v24 = vsel %vm2352_vm4, %v2468_v16, 0.0 }
 0x62d   : > { %v2494_v20 = vadd.f32 %v2493_v8, %v2479_v62 }
 0x62f   : > { %v2495_v45 = vadd.f32 %v2494_v20, %v2480_v7 }
 0x631   : > { %v2496_v57 = vadd.f32 %v2495_v45, %v2481_v27 }
 0x633   : > { %v2497_v55 = vadd.f32 %v2496_v57, %v2482_v23 }
 0x635   : > { %v2498_v39 = vadd.f32 %v2497_v55, %v2483_v35 }
 0x637   : > { %v2499_v50 = vadd.f32 %v2498_v39, %v2484_v24 }
 0x639   : > { %2500 = vadd.xlane.f32.xlu1 %v2499_v50 }
 0x6b8   : > { %v4424_v41 = vpop.xlane.xlu0 %4423 }
 0x6b9   : > { %v4425_v28 = vrot.slane %v4424_v41, 4 }
 0x6bb   : > { %v4426_v59 = vadd.f32 %v4425_v28, %v4424_v41 }
 0x6bd   : > { %v4427_v52 = vrot.slane %v4426_v59, 2 }
 0x6bf   : > { %v4428_v47 = vadd.f32 %v4427_v52, %v4426_v59 }
 0x6c1   : > { %v4429_v22 = vrot.slane %v4428_v47, 1 }
 0x6c3   : > { %v4430_v46 = vadd.f32 %v4429_v22, %v4428_v47 }
 0x6c6   : > { %v2501_v26 = vpop.xlane.xlu1 %2500 }
 0x6c7   : > { %v2502_v18 = vrot.slane %v2501_v26, 4 }
 0x6c9   : > { %v2503_v43 = vadd.f32 %v2502_v18, %v2501_v26 }
 0x6cb   : > { %v2504_v34 = vrot.slane %v2503_v43, 2 }
 0x6cd   : > { %v2505_v51 = vadd.f32 %v2504_v34, %v2503_v43 }
 0x6cf   : > { %v2506_v48 = vrot.slane %v2505_v51, 1 }
 0x6d1   : > { %v2507_v58 = vadd.f32 %v2506_v48, %v2505_v51 }
 0x6d3   : > { %5335 = vpush %v2507_v58 }
 0x6d4   : > { %5369 = vpush %v4430_v46 }
 0x704   : > { %s5336_s20 = spop %5335 }
 0x705   : > { %s5370_s16 = spop %5369 }
 0x706   : > { %s4434_s17 = smul.f32 0.5, %s5370_s16 }
 0x708   : > { %s4435_s23 = ssub.f32 %s5336_s20, %s4434_s17 }
 0x70a   : > { %s4436_s15 = smul.f32 0.1, %s4435_s23 }
 0x70c   : > { %v4437_v53 = vstv %s4436_s15 }
 0x70d   : > { %v4438_v3 = vadd.f32 %v4437_v53, %v4433_v40 }
 0x70f   : > { %4439 = vst.msk [vmem:[#allocation10] sm:$0x1] %vm8907_vm5, %v4438_v3 }
 0x710 PF: > { %p5392_p6 = scmp.eq.s32.totalorder %s5858_s9, 1  ;;  %s5793_s27 = smov [#allocation10]  }
 0x711   : > { %s4447_s11 = sshll.u32 %s5793_s27, 4  ;;  %s4448_s11 = int_to_ptr.vmem [resolvable:$true] %s4447_s11 }
 0x712   : > { %s5711_s14 = scalar_lea.vmem %s4448_s11, 16  ;;  %s5717_s21 = scalar_lea.vmem %s4448_s11, 32 }
 0x713   : > { %p5712_p7 = scmp.ne.s32.totalorder %s4448_s11, %s5711_s14  ;;  %p5718_p9 = scmp.lt.s32.totalorder %s4448_s11, %s4448_s11 }
 0x714   : > { %p5719_p13 = scmp.lt.s32.totalorder %s5717_s21, %s5711_s14 }
 0x715   : > { %p5713_p11 = pnand %p5712_p7, %p5392_p6 }
 0x716   : > { %p5720_p1 = por %p5719_p13, %p5718_p9 }
 0x717   : > { %p5714_p4 = pneg %p5713_p11 }
 0x719   : > { %p5721_p2 = pnand %p5720_p1, %p5714_p4 }
 0x71b   : > { %5724 = shalt.err (!%p5721_p2)
}
 0x71c   : > { %s5725_s24 = scalar_lea.hbm %s8619_s8, 16 }
 0x71d   : > { %p5726_p8 = scmp.ne.s32.totalorder %s8619_s8, %s5725_s24  ;;  %p5731_p10 = scmp.lt.u32.totalorder %s5725_s24, %s8619_s8 }
 0x71f   : > { %p5727_p12 = pnand %p5726_p8, %p5392_p6 }
 0x721   : > { %p5728_p5 = pneg %p5727_p12 }
 0x723   : > { %p5733_p0 = pnand %p5731_p10, %p5728_p5 }
 0x725   : > { %5736 = shalt.err (!%p5733_p0)
}
 0x726   : > { %5378 = dma.vmem_to_hbm [thread:$0]  (%p5392_p6), %s4448_s11, 16, %s8619_s8, [#allocation7]  }
 0x727   : > { %5762 = dma.done.wait (%p5392_p6), [#allocation7], 16  }
 0x728   : > { %5764 = vsyncadd (%p5392_p6), [#allocation7], 4294967280 }
 0x729 PF: > { %p20_p3 = scmp.ge.s32.totalorder %s5861_s10, 4   ;;  %s8908_s27 = smov %s5771_s28 }
 0x72a   : > { %s8909_s28 = smov %s5775_s29  ;;  %s8910_s29 = smov %s5871_s13 }
 0x72b   : > { %s8911_s30 = smov %s5861_s10  ;;  %22 = sbr.rel (!%p20_p3) target bundleno = 5 (0x5), region = 108 }
 0x732   :  { %4460 = vsyncpa [#allocation6], 1 }
 0x733   :  { %4462 = vsyncpa [#allocation6 + $0x1], 1 }
 0x734   :  { %4463 = vsyncpa [#allocation7], 1 }
 0x735   :  { %4465 = vsyncpa [#allocation7 + $0x1], 1 }
 0x736   :  { %4466 = vsyncpa [#allocation8], 1 }
 0x737   :  { %4468 = vsyncpa [#allocation8 + $0x1], 1 }

</bundles_post_ra>
